<compile_context>
chip_gen: v7x
topology: tpu7x:2x2x1
jax: 0.10.0
libtpu: 0.0.40
codegen_flags: <defaults>
</compile_context>

<pallas_src>
import jax
import jax.numpy as jnp
from jax import lax
from jax.experimental import pallas as pl
from jax.experimental.pallas import tpu as pltpu


CONV_BLOCK_B = 16                       # images per conv/FC grid step
_VMEM_LIMIT = 48 * 1024 * 1024          # > v5e/v6e scoped defaults, < v7x 64 MiB


def _round_up(n, m):
    return (n + m - 1) // m * m


# -----------------------------------------------------------------------------
# Pallas kernels
# -----------------------------------------------------------------------------
def _conv_relu_pool_kernel(p_ref, w_ref, b_ref, o_ref):
    """Fused conv (im2col matmul) + bias + relu + 2x2/2 max-pool for B images.

    p_ref : (4, B, Mo_pad, K) bf16 — quarter-grid im2col patches, one slab per
            pooling-window offset; Mo_pad = padded pooled_H * pooled_W.
    w_ref : (K, C) bf16 conv weight, rows ordered (kh, kw, ci).
    b_ref : (1, C) f32 bias.
    o_ref : (B, Mo_pad, C) bf16 pooled, relu'd activations.
    """
    _, bb, mp, kk = p_ref.shape
    cc = w_ref.shape[1]
    w = w_ref[...]

    def off_dot(off):
        # p_ref[off] is a contiguous (B, Mo_pad, K) chunk; Mo_pad % 8 == 0 so the
        # merge to 2-D is a free relabel; f32 accumulation on the MXU.
        return jnp.dot(p_ref[off].reshape(bb * mp, kk), w,
                       preferred_element_type=jnp.float32)

    # max over the 2x2 pooling window (relu commutes with max, bias is shared)
    y = jnp.maximum(jnp.maximum(off_dot(0), off_dot(1)),
                    jnp.maximum(off_dot(2), off_dot(3)))
    y = y.reshape(bb, mp, cc)
    o_ref[...] = jnp.maximum(y + b_ref[...], 0.0).astype(o_ref.dtype)


def _fc_stack_kernel(x_ref, w1_ref, b1_ref, w2_ref, b2_ref, w3_ref, b3_ref, o_ref):
    """fc1 -> relu -> fc2 -> relu -> fc3 for one batch tile; bf16 matmuls, f32 accum."""
    h = jnp.dot(x_ref[...], w1_ref[...], preferred_element_type=jnp.float32) + b1_ref[...]
    h = jnp.maximum(h, 0.0).astype(jnp.bfloat16)
    h = jnp.dot(h, w2_ref[...], preferred_element_type=jnp.float32) + b2_ref[...]
    h = jnp.maximum(h, 0.0).astype(jnp.bfloat16)
    y = jnp.dot(h, w3_ref[...], preferred_element_type=jnp.float32) + b3_ref[...]
    o_ref[...] = y.astype(o_ref.dtype)


# -----------------------------------------------------------------------------
# Pallas wrappers
# -----------------------------------------------------------------------------
def conv_relu_pool_pallas(slab, w, b, block_b):
    """slab: (4, N_pad, Mo_pad, K) bf16; w: (K, C) bf16; b: (1, C) f32."""
    _, n_pad, mo_pad, kk = slab.shape
    cc = w.shape[1]
    return pl.pallas_call(
        _conv_relu_pool_kernel,
        out_shape=jax.ShapeDtypeStruct((n_pad, mo_pad, cc), jnp.bfloat16),
        grid=(n_pad // block_b,),
        in_specs=[pl.BlockSpec((4, block_b, mo_pad, kk), lambda i: (0, i, 0, 0)),
                  pl.BlockSpec((kk, cc), lambda i: (0, 0)),
                  pl.BlockSpec((1, cc), lambda i: (0, 0))],
        out_specs=pl.BlockSpec((block_b, mo_pad, cc), lambda i: (i, 0, 0)),
        compiler_params=pltpu.CompilerParams(
            dimension_semantics=("parallel",),
            vmem_limit_bytes=_VMEM_LIMIT),
    )(slab, w, b)


def fc_stack_pallas(x, w1, b1, w2, b2, w3, b3, block_n):
    """x: (N_pad, 400) bf16, tiled over the batch; weights VMEM-resident."""
    n_pad, d_in = x.shape
    d_out = w3.shape[1]

    def const_spec(arr):
        return pl.BlockSpec(arr.shape, lambda i, _nd=arr.ndim: (0,) * _nd)

    return pl.pallas_call(
        _fc_stack_kernel,
        out_shape=jax.ShapeDtypeStruct((n_pad, d_out), jnp.float32),
        grid=(n_pad // block_n,),
        in_specs=[pl.BlockSpec((block_n, d_in), lambda i: (i, 0)),
                  const_spec(w1), const_spec(b1), const_spec(w2),
                  const_spec(b2), const_spec(w3), const_spec(b3)],
        out_specs=pl.BlockSpec((block_n, d_out), lambda i: (i, 0)),
        compiler_params=pltpu.CompilerParams(
            dimension_semantics=("parallel",),
            vmem_limit_bytes=_VMEM_LIMIT),
    )(x, w1, b1, w2, b2, w3, b3)


# -----------------------------------------------------------------------------
# XLA-side layout glue: stacked quarter-grid im2col (data rearrangement only)
# -----------------------------------------------------------------------------
def _pool_im2col(xh, k, mo_pad):
    """xh: (N, H, W, C) NHWC (bf16).  For a VALID kxk conv followed by a 2x2/2
    max-pool, build ONE stacked slab (4, N, mo_pad, K): axis 0 = pooling-window
    offset, rows = pooled output positions (zero-padded from Hp*Wp to mo_pad so
    they're tile-aligned), columns ordered (kh, kw, ci) with K = C*k*k unpadded."""
    n, h, w, c = xh.shape
    ho, wo = h - k + 1, w - k + 1
    hp, wp = ho // 2, wo // 2
    kdim = c * k * k
    offs = []
    for dh in range(2):
        for dw in range(2):
            cols = [xh[:, dh + kh: dh + kh + 2 * hp - 1: 2,
                        dw + kw: dw + kw + 2 * wp - 1: 2, :]
                    for kh in range(k) for kw in range(k)]
            offs.append(jnp.concatenate(cols, axis=-1).reshape(n, hp * wp, kdim))
    slab = jnp.stack(offs, axis=0)                       # (4, N, Hp*Wp, K)
    if mo_pad > hp * wp:
        slab = jnp.pad(slab, ((0, 0), (0, 0), (0, mo_pad - hp * wp), (0, 0)))
    return slab.astype(jnp.bfloat16), hp, wp, hp * wp


# -----------------------------------------------------------------------------
# Full ConvNet forward (3 pallas_calls total)
# -----------------------------------------------------------------------------
def convnet_forward(x_nchw, prepped):
    (w1m, b1m, w2m, b2m, wf1m, bf1m, wf2m, bf2m, wf3m, bf3m) = prepped
    n = x_nchw.shape[0]
    bb = min(CONV_BLOCK_B, n)
    n_pad = _round_up(n, bb)

    xh = jnp.transpose(x_nchw, (0, 2, 3, 1)).astype(jnp.bfloat16)   # NHWC (N,32,32,3)
    if n_pad > n:
        xh = jnp.pad(xh, ((0, n_pad - n), (0, 0), (0, 0), (0, 0)))

    # conv1 (3->6, k=5) + relu + 2x2 pool — one fused, batch-blocked kernel
    slab1, hp1, wp1, mo1 = _pool_im2col(xh, 5, 200)       # (4, n_pad, 200, 75) bf16
    o1 = conv_relu_pool_pallas(slab1, w1m, b1m, bb)       # (n_pad, 200, 6) bf16
    o1 = o1[:, :mo1, :].reshape(n_pad, hp1, wp1, 6)       # (n_pad, 14, 14, 6) NHWC

    # conv2 (6->16, k=5) + relu + 2x2 pool — one fused, batch-blocked kernel
    slab2, hp2, wp2, mo2 = _pool_im2col(o1, 5, 32)        # (4, n_pad, 32, 150) bf16
    o2 = conv_relu_pool_pallas(slab2, w2m, b2m, bb)       # (n_pad, 32, 16) bf16

    # TODO(synk): the reference forward's `x.view(-1, 16*5, 5)` is a bug (fc1 expects
    # 400 input features); we implement the intended flatten to (N, 400).
    flat = o2[:, :mo2, :].reshape(n_pad, hp2 * wp2 * 16)  # (h, w, c) order; wf1m matches

    # fc1 -> relu -> fc2 -> relu -> fc3 — one batch-tiled kernel
    logits = fc_stack_pallas(flat, wf1m, bf1m, wf2m, bf2m, wf3m, bf3m, bb)
    return logits[:n]


# -----------------------------------------------------------------------------
# One-time parameter re-layout (done OUTSIDE the jitted forward)
# -----------------------------------------------------------------------------
def prepare_params(params):
    (w1, b1, w2, b2, wf1, bf1, wf2, bf2, wf3, bf3) = params

    def conv_w(w):                                   # (co, ci, k, k) -> (k*k*ci, co)
        co, ci, k, _ = w.shape
        return jnp.transpose(w, (2, 3, 1, 0)).reshape(k * k * ci, co).astype(jnp.bfloat16)

    # fc1's 400 inputs are NCHW-flattened (c, h, w) in PyTorch; our activations are
    # flattened (h, w, c), so permute fc1's input columns accordingly.
    wf1m = jnp.transpose(wf1.reshape(120, 16, 5, 5), (2, 3, 1, 0)).reshape(400, 120)
    return (conv_w(w1), b1.reshape(1, -1).astype(jnp.float32),
            conv_w(w2), b2.reshape(1, -1).astype(jnp.float32),
            wf1m.astype(jnp.bfloat16), bf1.reshape(1, -1).astype(jnp.float32),
            wf2.T.astype(jnp.bfloat16), bf2.reshape(1, -1).astype(jnp.float32),
            wf3.T.astype(jnp.bfloat16), bf3.reshape(1, -1).astype(jnp.float32))


# -----------------------------------------------------------------------------
# Deterministic parameter init (PyTorch-style U(-1/sqrt(fan_in), 1/sqrt(fan_in)))
# -----------------------------------------------------------------------------
def init_params(key):
    def u(k, shape, fan_in):
        bound = 1.0 / jnp.sqrt(jnp.float32(fan_in))
        return jax.random.uniform(k, shape, jnp.float32, -bound, bound)

    ks = jax.random.split(key, 10)
    w1 = u(ks[0], (6, 3, 5, 5), 3 * 5 * 5)
    b1 = u(ks[1], (6,), 3 * 5 * 5)
    w2 = u(ks[2], (16, 6, 5, 5), 6 * 5 * 5)
    b2 = u(ks[3], (16,), 6 * 5 * 5)
    wf1 = u(ks[4], (120, 400), 400)
    bf1 = u(ks[5], (120,), 400)
    wf2 = u(ks[6], (84, 120), 120)
    bf2 = u(ks[7], (84,), 120)
    wf3 = u(ks[8], (10, 84), 84)
    bf3 = u(ks[9], (10,), 84)
    return (w1, b1, w2, b2, wf1, bf1, wf2, bf2, wf3, bf3)


# -----------------------------------------------------------------------------
# Pure-JAX f32 reference for correctness check
# -----------------------------------------------------------------------------
def reference_forward(x, params):
    (w1, b1, w2, b2, wf1, bf1, wf2, bf2, wf3, bf3) = params
    hp = lax.Precision.HIGHEST

    def conv(x, w, b):
        y = lax.conv_general_dilated(
            x, w, window_strides=(1, 1), padding="VALID",
            dimension_numbers=("NCHW", "OIHW", "NCHW"), precision=hp)
        return y + b[None, :, None, None]

    def pool(x):
        return lax.reduce_window(x, -jnp.inf, lax.max,
                                 (1, 1, 2, 2), (1, 1, 2, 2), "VALID")

    y = pool(jax.nn.relu(conv(x, w1, b1)))
    y = pool(jax.nn.relu(conv(y, w2, b2)))
    y = y.reshape(y.shape[0], -1)
    y = jax.nn.relu(y @ wf1.T + bf1)
    y = jax.nn.relu(y @ wf2.T + bf2)
    return y @ wf3.T + bf3


if __name__ == "__main__":
    key = jax.random.PRNGKey(0)
    kx, kp = jax.random.split(key)
    x = jax.random.normal(kx, (2, 3, 32, 32), jnp.float32)   # NCHW, like PyTorch
    params = init_params(kp)
    prepped = prepare_params(params)   # one-time re-layout, outside the jitted forward

    out = jax.jit(convnet_forward)(x, prepped)
    out = jax.block_until_ready(out)
    assert out.shape == (2, 10), out.shape

    ref = jax.block_until_ready(jax.jit(reference_forward)(x, params))
    # bf16 slabs/weights vs the f32 HIGHEST reference -> looser tolerance
    assert jnp.allclose(out, ref, atol=3e-2, rtol=3e-2), (
        float(jnp.max(jnp.abs(out - ref))))

    print("KERNEL_OK")
</pallas_src>

<mosaic_0001>
module attributes {stable_mosaic.version = 11 : i64} {
  func.func @_conv_relu_pool_kernel(%arg0: i32, %arg1: memref<4x2x200x75xbf16, #tpu.memory_space<vmem>>, %arg2: memref<75x6xbf16, #tpu.memory_space<vmem>>, %arg3: memref<1x6xf32, #tpu.memory_space<vmem>>, %arg4: memref<2x200x6xbf16, #tpu.memory_space<vmem>>) attributes {dimension_semantics = [#tpu.dimension_semantics<parallel>], iteration_bounds = array<i64: 1>, scalar_prefetch = 0 : i64, scratch_operands = 0 : i64, tpu.core_type = #tpu.core_type<tc>, window_params = [{transform_indices = @transform_0, window_bounds = array<i64: 4, 2, 200, 75>}, {pipeline_mode = #tpu.pipeline_mode<synchronous>, transform_indices = @transform_1, window_bounds = array<i64: 75, 6>}, {pipeline_mode = #tpu.pipeline_mode<synchronous>, transform_indices = @transform_2, window_bounds = array<i64: 1, 6>}, {transform_indices = @transform_3, window_bounds = array<i64: 2, 200, 6>}]} {
    %c0 = arith.constant 0 : index
    %c0_0 = arith.constant 0 : index
    %0 = vector.load %arg2[%c0, %c0_0] : memref<75x6xbf16, #tpu.memory_space<vmem>>, vector<75x6xbf16>
    %c0_1 = arith.constant 0 : index
    %c0_2 = arith.constant 0 : index
    %c0_3 = arith.constant 0 : index
    %c0_4 = arith.constant 0 : index
    %1 = vector.load %arg1[%c0_1, %c0_2, %c0_3, %c0_4] : memref<4x2x200x75xbf16, #tpu.memory_space<vmem>>, vector<1x2x200x75xbf16>
    %2 = vector.shape_cast %1 : vector<1x2x200x75xbf16> to vector<2x200x75xbf16>
    %3 = vector.shape_cast %2 : vector<2x200x75xbf16> to vector<400x75xbf16>
    %cst = arith.constant dense<0.000000e+00> : vector<400x6xf32>
    %4 = tpu.matmul %3, %0, %cst {dimension_numbers = #tpu.dot_dimension_numbers<[1], [0], [0], [1], [0, 0, 1, 1], [], []>} : vector<400x75xbf16>, vector<75x6xbf16>, vector<400x6xf32> -> vector<400x6xf32>
    %c1 = arith.constant 1 : index
    %c0_5 = arith.constant 0 : index
    %c0_6 = arith.constant 0 : index
    %c0_7 = arith.constant 0 : index
    %5 = vector.load %arg1[%c1, %c0_5, %c0_6, %c0_7] : memref<4x2x200x75xbf16, #tpu.memory_space<vmem>>, vector<1x2x200x75xbf16>
    %6 = vector.shape_cast %5 : vector<1x2x200x75xbf16> to vector<2x200x75xbf16>
    %7 = vector.shape_cast %6 : vector<2x200x75xbf16> to vector<400x75xbf16>
    %cst_8 = arith.constant dense<0.000000e+00> : vector<400x6xf32>
    %8 = tpu.matmul %7, %0, %cst_8 {dimension_numbers = #tpu.dot_dimension_numbers<[1], [0], [0], [1], [0, 0, 1, 1], [], []>} : vector<400x75xbf16>, vector<75x6xbf16>, vector<400x6xf32> -> vector<400x6xf32>
    %9 = arith.maximumf %4, %8 : vector<400x6xf32>
    %c2 = arith.constant 2 : index
    %c0_9 = arith.constant 0 : index
    %c0_10 = arith.constant 0 : index
    %c0_11 = arith.constant 0 : index
    %10 = vector.load %arg1[%c2, %c0_9, %c0_10, %c0_11] : memref<4x2x200x75xbf16, #tpu.memory_space<vmem>>, vector<1x2x200x75xbf16>
    %11 = vector.shape_cast %10 : vector<1x2x200x75xbf16> to vector<2x200x75xbf16>
    %12 = vector.shape_cast %11 : vector<2x200x75xbf16> to vector<400x75xbf16>
    %cst_12 = arith.constant dense<0.000000e+00> : vector<400x6xf32>
    %13 = tpu.matmul %12, %0, %cst_12 {dimension_numbers = #tpu.dot_dimension_numbers<[1], [0], [0], [1], [0, 0, 1, 1], [], []>} : vector<400x75xbf16>, vector<75x6xbf16>, vector<400x6xf32> -> vector<400x6xf32>
    %c3 = arith.constant 3 : index
    %c0_13 = arith.constant 0 : index
    %c0_14 = arith.constant 0 : index
    %c0_15 = arith.constant 0 : index
    %14 = vector.load %arg1[%c3, %c0_13, %c0_14, %c0_15] : memref<4x2x200x75xbf16, #tpu.memory_space<vmem>>, vector<1x2x200x75xbf16>
    %15 = vector.shape_cast %14 : vector<1x2x200x75xbf16> to vector<2x200x75xbf16>
    %16 = vector.shape_cast %15 : vector<2x200x75xbf16> to vector<400x75xbf16>
    %cst_16 = arith.constant dense<0.000000e+00> : vector<400x6xf32>
    %17 = tpu.matmul %16, %0, %cst_16 {dimension_numbers = #tpu.dot_dimension_numbers<[1], [0], [0], [1], [0, 0, 1, 1], [], []>} : vector<400x75xbf16>, vector<75x6xbf16>, vector<400x6xf32> -> vector<400x6xf32>
    %18 = arith.maximumf %13, %17 : vector<400x6xf32>
    %19 = arith.maximumf %9, %18 : vector<400x6xf32>
    %20 = vector.shape_cast %19 : vector<400x6xf32> to vector<2x200x6xf32>
    %c0_17 = arith.constant 0 : index
    %c0_18 = arith.constant 0 : index
    %21 = vector.load %arg3[%c0_17, %c0_18] : memref<1x6xf32, #tpu.memory_space<vmem>>, vector<1x6xf32>
    %22 = vector.shape_cast %21 : vector<1x6xf32> to vector<1x1x6xf32>
    %23 = vector.broadcast %22 : vector<1x1x6xf32> to vector<2x200x6xf32>
    %24 = arith.addf %20, %23 : vector<2x200x6xf32>
    %cst_19 = arith.constant 0.000000e+00 : f32
    %25 = vector.broadcast %cst_19 : f32 to vector<2x200x6xf32>
    %26 = arith.maximumf %24, %25 : vector<2x200x6xf32>
    %27 = arith.truncf %26 : vector<2x200x6xf32> to vector<2x200x6xbf16>
    %c0_20 = arith.constant 0 : index
    %c0_21 = arith.constant 0 : index
    %c0_22 = arith.constant 0 : index
    %28 = vector.load %arg4[%c0_20, %c0_21, %c0_22] : memref<2x200x6xbf16, #tpu.memory_space<vmem>>, vector<2x200x6xbf16>
    tpu.vector_store %arg4[%c0_20, %c0_21, %c0_22], %27 {strides = array<i32>} : memref<2x200x6xbf16, #tpu.memory_space<vmem>>, vector<2x200x6xbf16>,
    return
  }
  func.func @transform_0(%arg0: i32) -> (i32, i32, i32, i32) {
    %c0_i32 = arith.constant 0 : i32
    %c0_i32_0 = arith.constant 0 : i32
    %c0_i32_1 = arith.constant 0 : i32
    %c0_i32_2 = arith.constant 0 : i32
    return %c0_i32, %arg0, %c0_i32_0, %c0_i32_1 : i32, i32, i32, i32
  }
  func.func @transform_1(%arg0: i32) -> (i32, i32) {
    %c0_i32 = arith.constant 0 : i32
    %c0_i32_0 = arith.constant 0 : i32
    %c0_i32_1 = arith.constant 0 : i32
    return %c0_i32, %c0_i32_0 : i32, i32
  }
  func.func @transform_2(%arg0: i32) -> (i32, i32) {
    %c0_i32 = arith.constant 0 : i32
    %c0_i32_0 = arith.constant 0 : i32
    %c0_i32_1 = arith.constant 0 : i32
    return %c0_i32, %c0_i32_0 : i32, i32
  }
  func.func @transform_3(%arg0: i32) -> (i32, i32, i32) {
    %c0_i32 = arith.constant 0 : i32
    %c0_i32_0 = arith.constant 0 : i32
    %c0_i32_1 = arith.constant 0 : i32
    return %arg0, %c0_i32, %c0_i32_0 : i32, i32, i32
  }
}

module attributes {stable_mosaic.version = 11 : i64} {
  func.func @_conv_relu_pool_kernel(%arg0: i32, %arg1: memref<4x2x32x150xbf16, #tpu.memory_space<vmem>>, %arg2: memref<150x16xbf16, #tpu.memory_space<vmem>>, %arg3: memref<1x16xf32, #tpu.memory_space<vmem>>, %arg4: memref<2x32x16xbf16, #tpu.memory_space<vmem>>) attributes {dimension_semantics = [#tpu.dimension_semantics<parallel>], iteration_bounds = array<i64: 1>, scalar_prefetch = 0 : i64, scratch_operands = 0 : i64, tpu.core_type = #tpu.core_type<tc>, window_params = [{transform_indices = @transform_0, window_bounds = array<i64: 4, 2, 32, 150>}, {pipeline_mode = #tpu.pipeline_mode<synchronous>, transform_indices = @transform_1, window_bounds = array<i64: 150, 16>}, {pipeline_mode = #tpu.pipeline_mode<synchronous>, transform_indices = @transform_2, window_bounds = array<i64: 1, 16>}, {transform_indices = @transform_3, window_bounds = array<i64: 2, 32, 16>}]} {
    %c0 = arith.constant 0 : index
    %c0_0 = arith.constant 0 : index
    %0 = vector.load %arg2[%c0, %c0_0] : memref<150x16xbf16, #tpu.memory_space<vmem>>, vector<150x16xbf16>
    %c0_1 = arith.constant 0 : index
    %c0_2 = arith.constant 0 : index
    %c0_3 = arith.constant 0 : index
    %c0_4 = arith.constant 0 : index
    %1 = vector.load %arg1[%c0_1, %c0_2, %c0_3, %c0_4] : memref<4x2x32x150xbf16, #tpu.memory_space<vmem>>, vector<1x2x32x150xbf16>
    %2 = vector.shape_cast %1 : vector<1x2x32x150xbf16> to vector<2x32x150xbf16>
    %3 = vector.shape_cast %2 : vector<2x32x150xbf16> to vector<64x150xbf16>
    %cst = arith.constant dense<0.000000e+00> : vector<64x16xf32>
    %4 = tpu.matmul %3, %0, %cst {dimension_numbers = #tpu.dot_dimension_numbers<[1], [0], [0], [1], [0, 0, 1, 1], [], []>} : vector<64x150xbf16>, vector<150x16xbf16>, vector<64x16xf32> -> vector<64x16xf32>
    %c1 = arith.constant 1 : index
    %c0_5 = arith.constant 0 : index
    %c0_6 = arith.constant 0 : index
    %c0_7 = arith.constant 0 : index
    %5 = vector.load %arg1[%c1, %c0_5, %c0_6, %c0_7] : memref<4x2x32x150xbf16, #tpu.memory_space<vmem>>, vector<1x2x32x150xbf16>
    %6 = vector.shape_cast %5 : vector<1x2x32x150xbf16> to vector<2x32x150xbf16>
    %7 = vector.shape_cast %6 : vector<2x32x150xbf16> to vector<64x150xbf16>
    %cst_8 = arith.constant dense<0.000000e+00> : vector<64x16xf32>
    %8 = tpu.matmul %7, %0, %cst_8 {dimension_numbers = #tpu.dot_dimension_numbers<[1], [0], [0], [1], [0, 0, 1, 1], [], []>} : vector<64x150xbf16>, vector<150x16xbf16>, vector<64x16xf32> -> vector<64x16xf32>
    %9 = arith.maximumf %4, %8 : vector<64x16xf32>
    %c2 = arith.constant 2 : index
    %c0_9 = arith.constant 0 : index
    %c0_10 = arith.constant 0 : index
    %c0_11 = arith.constant 0 : index
    %10 = vector.load %arg1[%c2, %c0_9, %c0_10, %c0_11] : memref<4x2x32x150xbf16, #tpu.memory_space<vmem>>, vector<1x2x32x150xbf16>
    %11 = vector.shape_cast %10 : vector<1x2x32x150xbf16> to vector<2x32x150xbf16>
    %12 = vector.shape_cast %11 : vector<2x32x150xbf16> to vector<64x150xbf16>
    %cst_12 = arith.constant dense<0.000000e+00> : vector<64x16xf32>
    %13 = tpu.matmul %12, %0, %cst_12 {dimension_numbers = #tpu.dot_dimension_numbers<[1], [0], [0], [1], [0, 0, 1, 1], [], []>} : vector<64x150xbf16>, vector<150x16xbf16>, vector<64x16xf32> -> vector<64x16xf32>
    %c3 = arith.constant 3 : index
    %c0_13 = arith.constant 0 : index
    %c0_14 = arith.constant 0 : index
    %c0_15 = arith.constant 0 : index
    %14 = vector.load %arg1[%c3, %c0_13, %c0_14, %c0_15] : memref<4x2x32x150xbf16, #tpu.memory_space<vmem>>, vector<1x2x32x150xbf16>
    %15 = vector.shape_cast %14 : vector<1x2x32x150xbf16> to vector<2x32x150xbf16>
    %16 = vector.shape_cast %15 : vector<2x32x150xbf16> to vector<64x150xbf16>
    %cst_16 = arith.constant dense<0.000000e+00> : vector<64x16xf32>
    %17 = tpu.matmul %16, %0, %cst_16 {dimension_numbers = #tpu.dot_dimension_numbers<[1], [0], [0], [1], [0, 0, 1, 1], [], []>} : vector<64x150xbf16>, vector<150x16xbf16>, vector<64x16xf32> -> vector<64x16xf32>
    %18 = arith.maximumf %13, %17 : vector<64x16xf32>
    %19 = arith.maximumf %9, %18 : vector<64x16xf32>
    %20 = vector.shape_cast %19 : vector<64x16xf32> to vector<2x32x16xf32>
    %c0_17 = arith.constant 0 : index
    %c0_18 = arith.constant 0 : index
    %21 = vector.load %arg3[%c0_17, %c0_18] : memref<1x16xf32, #tpu.memory_space<vmem>>, vector<1x16xf32>
    %22 = vector.shape_cast %21 : vector<1x16xf32> to vector<1x1x16xf32>
    %23 = vector.broadcast %22 : vector<1x1x16xf32> to vector<2x32x16xf32>
    %24 = arith.addf %20, %23 : vector<2x32x16xf32>
    %cst_19 = arith.constant 0.000000e+00 : f32
    %25 = vector.broadcast %cst_19 : f32 to vector<2x32x16xf32>
    %26 = arith.maximumf %24, %25 : vector<2x32x16xf32>
    %27 = arith.truncf %26 : vector<2x32x16xf32> to vector<2x32x16xbf16>
    %c0_20 = arith.constant 0 : index
    %c0_21 = arith.constant 0 : index
    %c0_22 = arith.constant 0 : index
    %28 = vector.load %arg4[%c0_20, %c0_21, %c0_22] : memref<2x32x16xbf16, #tpu.memory_space<vmem>>, vector<2x32x16xbf16>
    tpu.vector_store %arg4[%c0_20, %c0_21, %c0_22], %27 {strides = array<i32>} : memref<2x32x16xbf16, #tpu.memory_space<vmem>>, vector<2x32x16xbf16>,
    return
  }
  func.func @transform_0(%arg0: i32) -> (i32, i32, i32, i32) {
    %c0_i32 = arith.constant 0 : i32
    %c0_i32_0 = arith.constant 0 : i32
    %c0_i32_1 = arith.constant 0 : i32
    %c0_i32_2 = arith.constant 0 : i32
    return %c0_i32, %arg0, %c0_i32_0, %c0_i32_1 : i32, i32, i32, i32
  }
  func.func @transform_1(%arg0: i32) -> (i32, i32) {
    %c0_i32 = arith.constant 0 : i32
    %c0_i32_0 = arith.constant 0 : i32
    %c0_i32_1 = arith.constant 0 : i32
    return %c0_i32, %c0_i32_0 : i32, i32
  }
  func.func @transform_2(%arg0: i32) -> (i32, i32) {
    %c0_i32 = arith.constant 0 : i32
    %c0_i32_0 = arith.constant 0 : i32
    %c0_i32_1 = arith.constant 0 : i32
    return %c0_i32, %c0_i32_0 : i32, i32
  }
  func.func @transform_3(%arg0: i32) -> (i32, i32, i32) {
    %c0_i32 = arith.constant 0 : i32
    %c0_i32_0 = arith.constant 0 : i32
    %c0_i32_1 = arith.constant 0 : i32
    return %arg0, %c0_i32, %c0_i32_0 : i32, i32, i32
  }
}

module attributes {stable_mosaic.version = 11 : i64} {
  func.func @_fc_stack_kernel(%arg0: i32, %arg1: memref<2x400xbf16, #tpu.memory_space<vmem>>, %arg2: memref<400x120xbf16, #tpu.memory_space<vmem>>, %arg3: memref<1x120xf32, #tpu.memory_space<vmem>>, %arg4: memref<120x84xbf16, #tpu.memory_space<vmem>>, %arg5: memref<1x84xf32, #tpu.memory_space<vmem>>, %arg6: memref<84x10xbf16, #tpu.memory_space<vmem>>, %arg7: memref<1x10xf32, #tpu.memory_space<vmem>>, %arg8: memref<2x10xf32, #tpu.memory_space<vmem>>) attributes {dimension_semantics = [#tpu.dimension_semantics<parallel>], iteration_bounds = array<i64: 1>, scalar_prefetch = 0 : i64, scratch_operands = 0 : i64, tpu.core_type = #tpu.core_type<tc>, window_params = [{transform_indices = @transform_0, window_bounds = array<i64: 2, 400>}, {pipeline_mode = #tpu.pipeline_mode<synchronous>, transform_indices = @transform_1, window_bounds = array<i64: 400, 120>}, {pipeline_mode = #tpu.pipeline_mode<synchronous>, transform_indices = @transform_2, window_bounds = array<i64: 1, 120>}, {pipeline_mode = #tpu.pipeline_mode<synchronous>, transform_indices = @transform_3, window_bounds = array<i64: 120, 84>}, {pipeline_mode = #tpu.pipeline_mode<synchronous>, transform_indices = @transform_4, window_bounds = array<i64: 1, 84>}, {pipeline_mode = #tpu.pipeline_mode<synchronous>, transform_indices = @transform_5, window_bounds = array<i64: 84, 10>}, {pipeline_mode = #tpu.pipeline_mode<synchronous>, transform_indices = @transform_6, window_bounds = array<i64: 1, 10>}, {transform_indices = @transform_7, window_bounds = array<i64: 2, 10>}]} {
    %c0 = arith.constant 0 : index
    %c0_0 = arith.constant 0 : index
    %0 = vector.load %arg1[%c0, %c0_0] : memref<2x400xbf16, #tpu.memory_space<vmem>>, vector<2x400xbf16>
    %c0_1 = arith.constant 0 : index
    %c0_2 = arith.constant 0 : index
    %1 = vector.load %arg2[%c0_1, %c0_2] : memref<400x120xbf16, #tpu.memory_space<vmem>>, vector<400x120xbf16>
    %cst = arith.constant dense<0.000000e+00> : vector<2x120xf32>
    %2 = tpu.matmul %0, %1, %cst {dimension_numbers = #tpu.dot_dimension_numbers<[1], [0], [0], [1], [0, 0, 1, 1], [], []>} : vector<2x400xbf16>, vector<400x120xbf16>, vector<2x120xf32> -> vector<2x120xf32>
    %c0_3 = arith.constant 0 : index
    %c0_4 = arith.constant 0 : index
    %3 = vector.load %arg3[%c0_3, %c0_4] : memref<1x120xf32, #tpu.memory_space<vmem>>, vector<1x120xf32>
    %4 = vector.broadcast %3 : vector<1x120xf32> to vector<2x120xf32>
    %5 = arith.addf %2, %4 : vector<2x120xf32>
    %cst_5 = arith.constant 0.000000e+00 : f32
    %6 = vector.broadcast %cst_5 : f32 to vector<2x120xf32>
    %7 = arith.maximumf %5, %6 : vector<2x120xf32>
    %8 = arith.truncf %7 : vector<2x120xf32> to vector<2x120xbf16>
    %c0_6 = arith.constant 0 : index
    %c0_7 = arith.constant 0 : index
    %9 = vector.load %arg4[%c0_6, %c0_7] : memref<120x84xbf16, #tpu.memory_space<vmem>>, vector<120x84xbf16>
    %cst_8 = arith.constant dense<0.000000e+00> : vector<2x84xf32>
    %10 = tpu.matmul %8, %9, %cst_8 {dimension_numbers = #tpu.dot_dimension_numbers<[1], [0], [0], [1], [0, 0, 1, 1], [], []>} : vector<2x120xbf16>, vector<120x84xbf16>, vector<2x84xf32> -> vector<2x84xf32>
    %c0_9 = arith.constant 0 : index
    %c0_10 = arith.constant 0 : index
    %11 = vector.load %arg5[%c0_9, %c0_10] : memref<1x84xf32, #tpu.memory_space<vmem>>, vector<1x84xf32>
    %12 = vector.broadcast %11 : vector<1x84xf32> to vector<2x84xf32>
    %13 = arith.addf %10, %12 : vector<2x84xf32>
    %cst_11 = arith.constant 0.000000e+00 : f32
    %14 = vector.broadcast %cst_11 : f32 to vector<2x84xf32>
    %15 = arith.maximumf %13, %14 : vector<2x84xf32>
    %16 = arith.truncf %15 : vector<2x84xf32> to vector<2x84xbf16>
    %c0_12 = arith.constant 0 : index
    %c0_13 = arith.constant 0 : index
    %17 = vector.load %arg6[%c0_12, %c0_13] : memref<84x10xbf16, #tpu.memory_space<vmem>>, vector<84x10xbf16>
    %cst_14 = arith.constant dense<0.000000e+00> : vector<2x10xf32>
    %18 = tpu.matmul %16, %17, %cst_14 {dimension_numbers = #tpu.dot_dimension_numbers<[1], [0], [0], [1], [0, 0, 1, 1], [], []>} : vector<2x84xbf16>, vector<84x10xbf16>, vector<2x10xf32> -> vector<2x10xf32>
    %c0_15 = arith.constant 0 : index
    %c0_16 = arith.constant 0 : index
    %19 = vector.load %arg7[%c0_15, %c0_16] : memref<1x10xf32, #tpu.memory_space<vmem>>, vector<1x10xf32>
    %20 = vector.broadcast %19 : vector<1x10xf32> to vector<2x10xf32>
    %21 = arith.addf %18, %20 : vector<2x10xf32>
    %c0_17 = arith.constant 0 : index
    %c0_18 = arith.constant 0 : index
    %22 = vector.load %arg8[%c0_17, %c0_18] : memref<2x10xf32, #tpu.memory_space<vmem>>, vector<2x10xf32>
    tpu.vector_store %arg8[%c0_17, %c0_18], %21 {strides = array<i32>} : memref<2x10xf32, #tpu.memory_space<vmem>>, vector<2x10xf32>,
    return
  }
  func.func @transform_0(%arg0: i32) -> (i32, i32) {
    %c0_i32 = arith.constant 0 : i32
    %c0_i32_0 = arith.constant 0 : i32
    return %arg0, %c0_i32 : i32, i32
  }
  func.func @transform_1(%arg0: i32) -> (i32, i32) {
    %c0_i32 = arith.constant 0 : i32
    %c0_i32_0 = arith.constant 0 : i32
    %c0_i32_1 = arith.constant 0 : i32
    return %c0_i32, %c0_i32_0 : i32, i32
  }
  func.func @transform_2(%arg0: i32) -> (i32, i32) {
    %c0_i32 = arith.constant 0 : i32
    %c0_i32_0 = arith.constant 0 : i32
    %c0_i32_1 = arith.constant 0 : i32
    return %c0_i32, %c0_i32_0 : i32, i32
  }
  func.func @transform_3(%arg0: i32) -> (i32, i32) {
    %c0_i32 = arith.constant 0 : i32
    %c0_i32_0 = arith.constant 0 : i32
    %c0_i32_1 = arith.constant 0 : i32
    return %c0_i32, %c0_i32_0 : i32, i32
  }
  func.func @transform_4(%arg0: i32) -> (i32, i32) {
    %c0_i32 = arith.constant 0 : i32
    %c0_i32_0 = arith.constant 0 : i32
    %c0_i32_1 = arith.constant 0 : i32
    return %c0_i32, %c0_i32_0 : i32, i32
  }
  func.func @transform_5(%arg0: i32) -> (i32, i32) {
    %c0_i32 = arith.constant 0 : i32
    %c0_i32_0 = arith.constant 0 : i32
    %c0_i32_1 = arith.constant 0 : i32
    return %c0_i32, %c0_i32_0 : i32, i32
  }
  func.func @transform_6(%arg0: i32) -> (i32, i32) {
    %c0_i32 = arith.constant 0 : i32
    %c0_i32_0 = arith.constant 0 : i32
    %c0_i32_1 = arith.constant 0 : i32
    return %c0_i32, %c0_i32_0 : i32, i32
  }
  func.func @transform_7(%arg0: i32) -> (i32, i32) {
    %c0_i32 = arith.constant 0 : i32
    %c0_i32_0 = arith.constant 0 : i32
    return %arg0, %c0_i32 : i32, i32
  }
}

</mosaic_0001>

<bundles_post_ra>
// kernel: convnet_forward.3
= control target key start
LH: loop header
LB: loop body
LE: loop exit
PB: predicated region body
PF: predicated region fallthrough
CT: control target
= control target key end

     0   :  { %v5002_v0 = vmov 0.0   ;;  %vm3636_vm0 = vmmov 0   ;;  %vm305_vm1 = vcmask 1044480   ;;  %vm306_vm2 = vcmask 1045504   ;;  %s4998_s1 = inlined_call_operand.vmem [shape: bf16[75,6], index: 1, kind: input, shape index: {}]   ;;  %s4999_s0 = inlined_call_operand.vmem [shape: bf16[4,2,200,75], index: 0, kind: input, shape index: {}]   ;;  %s5000_s2 = inlined_call_operand.vmem [shape: f32[1,6], index: 2, kind: input, shape index: {}]   ;;  %s5001_s3 = inlined_call_operand.vmem [shape: bf16[2,200,6], index: 3, kind: output, shape index: {}]  }
   0x1   :  { %3087 = vmatprep.subr.bf16.mxu0 %v5002_v0  ;;  %3197 = vmatprep.subr.bf16.mxu1 %v5002_v0  ;;  %v3530_v1 = vld [vmem:[%s4998_s1] sm:$0xff]   ;;  %v3531_v2 = vld [vmem:[%s4998_s1 + $0x8] sm:$0xff]   ;;  %v3532_v3 = vld [vmem:[%s4998_s1 + $0x10] sm:$0xff]   ;;  %v3637_v4 = vmov 65535   ;;  %vm229_vm3 = vcmask 613376   ;;  %vm2456_vm4 = vcmask 44032  }
   0x2   :  { %3088 = vmatpush3.bf16.msra.mxu0 %v3530_v1  ;;  %3198 = vmatpush3.bf16.msra.mxu1 %v3530_v1  ;;  %v307_v5 = vsel %vm305_vm1, 4294967295, %v3637_v4  ;;  %v3533_v6 = vld [vmem:[%s4998_s1 + $0x18] sm:$0xff]   ;;  %v3534_v7 = vld [vmem:[%s4998_s1 + $0x20] sm:$0x3f]   ;;  %v3536_v11 = vld [vmem:[%s4999_s0 + $0xc8] sm:$0xff]  }
   0x3   :  { %3089 = vmatprep.subr.bf16.mxu0 %v5002_v0  ;;  %3199 = vmatprep.subr.bf16.mxu1 %v5002_v0  ;;  %v308_v8 = vsel %vm306_vm2, %v307_v5, 0  ;;  %v3535_v10 = vld [vmem:[%s4999_s0] sm:$0xff]   ;;  %v3537_v12 = vld [vmem:[%s4999_s0 + $0x8] sm:$0xff]   ;;  %v3538_v13 = vld [vmem:[%s4999_s0 + $0xd0] sm:$0xff]  }
   0x4   :  { %3097 = vmatprep.mubr.msk.bf16.mxu0 %vm3636_vm0, %v5002_v0  ;;  %3207 = vmatprep.mubr.msk.bf16.mxu1 %vm3636_vm0, %v5002_v0  ;;  %v310_v9 = vand.u32 %v3534_v7, %v308_v8  ;;  %v3539_v14 = vld [vmem:[%s4999_s0 + $0x10] sm:$0xff]   ;;  %v3540_v15 = vld [vmem:[%s4999_s0 + $0xd8] sm:$0xff]   ;;  %v3542_v17 = vld [vmem:[%s4999_s0 + $0xe0] sm:$0xff]  }
   0x5   :  { %v3541_v16 = vld [vmem:[%s4999_s0 + $0x18] sm:$0xff]   ;;  %v3543_v18 = vld [vmem:[%s4999_s0 + $0x20] sm:$0xff]   ;;  %v3544_v19 = vld [vmem:[%s4999_s0 + $0xe8] sm:$0xff]  }
   0x6   :  { %3090 = vmatpush3.bf16.msra.mxu0 %v3531_v2  ;;  %3200 = vmatpush3.bf16.msra.mxu1 %v3531_v2  ;;  %v3545_v20 = vld [vmem:[%s4999_s0 + $0x28] sm:$0xff]   ;;  %v3546_v21 = vld [vmem:[%s4999_s0 + $0xf0] sm:$0xff]   ;;  %v3548_v23 = vld [vmem:[%s4999_s0 + $0xf8] sm:$0xff]  }
   0x7   :  { %3091 = vmatprep.subr.bf16.mxu0 %v5002_v0  ;;  %3201 = vmatprep.subr.bf16.mxu1 %v5002_v0  ;;  %v3547_v22 = vld [vmem:[%s4999_s0 + $0x30] sm:$0xff]   ;;  %v3549_v24 = vld [vmem:[%s4999_s0 + $0x38] sm:$0xff]   ;;  %v3550_v25 = vld [vmem:[%s4999_s0 + $0x100] sm:$0xff]  }
   0x8   :  { %v3551_v26 = vld [vmem:[%s4999_s0 + $0x40] sm:$0xff]   ;;  %v3552_v27 = vld [vmem:[%s4999_s0 + $0x108] sm:$0xff]   ;;  %v3554_v29 = vld [vmem:[%s4999_s0 + $0x110] sm:$0xff]  }
   0x9   :  { %v3553_v28 = vld [vmem:[%s4999_s0 + $0x48] sm:$0xff]   ;;  %v3555_v30 = vld [vmem:[%s4999_s0 + $0x50] sm:$0xff]   ;;  %v3556_v31 = vld [vmem:[%s4999_s0 + $0x118] sm:$0xff]  }
   0xa   :  { %3092 = vmatpush3.bf16.msra.mxu0 %v3532_v3  ;;  %3202 = vmatpush3.bf16.msra.mxu1 %v3532_v3  ;;  %v3557_v32 = vld [vmem:[%s4999_s0 + $0x58] sm:$0xff]   ;;  %v3558_v33 = vld [vmem:[%s4999_s0 + $0x120] sm:$0xff]   ;;  %v3560_v35 = vld [vmem:[%s4999_s0 + $0x128] sm:$0xff]  }
   0xb   :  { %3093 = vmatprep.subr.bf16.mxu0 %v5002_v0  ;;  %3203 = vmatprep.subr.bf16.mxu1 %v5002_v0  ;;  %v3559_v34 = vld [vmem:[%s4999_s0 + $0x60] sm:$0xff]   ;;  %v3561_v36 = vld [vmem:[%s4999_s0 + $0x68] sm:$0xff]   ;;  %v3562_v37 = vld [vmem:[%s4999_s0 + $0x130] sm:$0xff]  }
   0xc   :  { %v3563_v38 = vld [vmem:[%s4999_s0 + $0x70] sm:$0xff]   ;;  %v3564_v39 = vld [vmem:[%s4999_s0 + $0x138] sm:$0xff]   ;;  %v3566_v41 = vld [vmem:[%s4999_s0 + $0x140] sm:$0xff]  }
   0xd   :  { %v3565_v40 = vld [vmem:[%s4999_s0 + $0x78] sm:$0xff]   ;;  %v3567_v42 = vld [vmem:[%s4999_s0 + $0x80] sm:$0xff]   ;;  %v3568_v43 = vld [vmem:[%s4999_s0 + $0x148] sm:$0xff]  }
   0xe   :  { %3094 = vmatpush3.bf16.msra.mxu0 %v3533_v6  ;;  %3204 = vmatpush3.bf16.msra.mxu1 %v3533_v6  ;;  %v3569_v44 = vld [vmem:[%s4999_s0 + $0x88] sm:$0xff]   ;;  %v3570_v45 = vld [vmem:[%s4999_s0 + $0x150] sm:$0xff]   ;;  %v3572_v47 = vld [vmem:[%s4999_s0 + $0x158] sm:$0xff]  }
   0xf   :  { %3095 = vmatprep.subr.bf16.mxu0 %v5002_v0  ;;  %3205 = vmatprep.subr.bf16.mxu1 %v5002_v0  ;;  %v3571_v46 = vld [vmem:[%s4999_s0 + $0x90] sm:$0xff]   ;;  %v3573_v48 = vld [vmem:[%s4999_s0 + $0x98] sm:$0xff]   ;;  %v3574_v49 = vld [vmem:[%s4999_s0 + $0x160] sm:$0xff]  }
  0x10   :  { %v3575_v50 = vld [vmem:[%s4999_s0 + $0xa0] sm:$0xff]   ;;  %v3576_v51 = vld [vmem:[%s4999_s0 + $0x168] sm:$0xff]   ;;  %v3578_v53 = vld [vmem:[%s4999_s0 + $0x170] sm:$0xff]  }
  0x11   :  { %v3577_v52 = vld [vmem:[%s4999_s0 + $0xa8] sm:$0xff]   ;;  %v3579_v54 = vld [vmem:[%s4999_s0 + $0xb0] sm:$0xff]   ;;  %v3580_v55 = vld [vmem:[%s4999_s0 + $0x178] sm:$0xff]  }
  0x12   :  { %3096 = vmatpush3.bf16.msra.mxu0 %v310_v9  ;;  %3206 = vmatpush3.bf16.msra.mxu1 %v310_v9  ;;  %v3581_v56 = vld [vmem:[%s4999_s0 + $0xb8] sm:$0xff]   ;;  %v3582_v57 = vld [vmem:[%s4999_s0 + $0x180] sm:$0xff]   ;;  %v3584_v59 = vld [vmem:[%s4999_s0 + $0x188] sm:$0xff]  }
  0x13   :  { %3307 = vmatprep.subr.bf16.mxu0 %v5002_v0  ;;  %3417 = vmatprep.subr.bf16.mxu1 %v5002_v0  ;;  %v3583_v58 = vld [vmem:[%s4999_s0 + $0xc0] sm:$0xff]   ;;  %v3585_v60 = vld [vmem:[%s4999_s0 + $0x190] sm:$0xff]   ;;  %v3586_v61 = vld [vmem:[%s4999_s0 + $0x258] sm:$0xff]  }
  0x14   :  { %v3587_v62 = vld [vmem:[%s4999_s0 + $0x198] sm:$0xff]   ;;  %v3588_v63 = vld [vmem:[%s4999_s0 + $0x260] sm:$0xff]   ;;  %v3590_v7 = vld [vmem:[%s4999_s0 + $0x268] sm:$0xff]  }
  0x15   :  { %3098 = vmatmul.mubr.msk.bf16.vlgmr.msra.gmra.mrb[0].mxu0 %vm229_vm3, %v3535_v10  ;;  %3208 = vmatmul.mubr.msk.bf16.vlgmr.msra.gmra.mrb[0].mxu1 %vm229_vm3, %v3536_v11 }
  0x16   :  { %3308 = vmatpush3.bf16.msra.mxu0 %v3530_v1  ;;  %3418 = vmatpush3.bf16.msra.mxu1 %v3530_v1 }
  0x17   :  { %3101 = vmatprep.mubr.msk.bf16.mxu0 %vm3636_vm0, %v5002_v0  ;;  %3211 = vmatprep.mubr.msk.bf16.mxu1 %vm3636_vm0, %v5002_v0 }
  0x18   :  { %3309 = vmatprep.subr.bf16.mxu0 %v5002_v0  ;;  %3419 = vmatprep.subr.bf16.mxu1 %v5002_v0 }
  0x1a   :  { %3310 = vmatpush3.bf16.msra.mxu0 %v3531_v2  ;;  %3420 = vmatpush3.bf16.msra.mxu1 %v3531_v2 }
  0x1b   :  { %3311 = vmatprep.subr.bf16.mxu0 %v5002_v0  ;;  %3421 = vmatprep.subr.bf16.mxu1 %v5002_v0 }
  0x1d   :  { %3102 = vmatmul.mubr.msk.bf16.gmra.mrb[4].mxu0 %vm229_vm3, %v3537_v12  ;;  %3212 = vmatmul.mubr.msk.bf16.gmra.mrb[4].mxu1 %vm229_vm3, %v3538_v13 }
  0x1e   :  { %3105 = vmatprep.mubr.msk.bf16.mxu0 %vm3636_vm0, %v5002_v0  ;;  %3215 = vmatprep.mubr.msk.bf16.mxu1 %vm3636_vm0, %v5002_v0 }
  0x1f   :  { %3312 = vmatpush3.bf16.msra.mxu0 %v3532_v3  ;;  %3422 = vmatpush3.bf16.msra.mxu1 %v3532_v3 }
  0x20   :  { %3313 = vmatprep.subr.bf16.mxu0 %v5002_v0  ;;  %3423 = vmatprep.subr.bf16.mxu1 %v5002_v0 }
  0x23   :  { %3314 = vmatpush3.bf16.msra.mxu0 %v3533_v6  ;;  %3424 = vmatpush3.bf16.msra.mxu1 %v3533_v6  ;;  %v3589_v6 = vld [vmem:[%s4999_s0 + $0x1a0] sm:$0xff]  }
  0x24   :  { %3315 = vmatprep.subr.bf16.mxu0 %v5002_v0  ;;  %3425 = vmatprep.subr.bf16.mxu1 %v5002_v0 }
  0x25   :  { %3106 = vmatmul.mubr.msk.bf16.gmra.mrb[8].mxu0 %vm229_vm3, %v3539_v14  ;;  %3216 = vmatmul.mubr.msk.bf16.gmra.mrb[8].mxu1 %vm229_vm3, %v3540_v15 }
  0x26   :  { %3109 = vmatprep.mubr.msk.bf16.mxu0 %vm3636_vm0, %v5002_v0  ;;  %3219 = vmatprep.mubr.msk.bf16.mxu1 %vm3636_vm0, %v5002_v0 }
  0x27   :  { %3316 = vmatpush3.bf16.msra.mxu0 %v310_v9  ;;  %3426 = vmatpush3.bf16.msra.mxu1 %v310_v9 }
  0x2d   :  { %3110 = vmatmul.mubr.msk.bf16.gmra.mrb[12].mxu0 %vm229_vm3, %v3541_v16  ;;  %3220 = vmatmul.mubr.msk.bf16.gmra.mrb[12].mxu1 %vm229_vm3, %v3542_v17 }
  0x2e   :  { %3113 = vmatprep.mubr.msk.bf16.mxu0 %vm3636_vm0, %v5002_v0  ;;  %3223 = vmatprep.mubr.msk.bf16.mxu1 %vm3636_vm0, %v5002_v0 }
  0x35   :  { %3114 = vmatmul.mubr.msk.bf16.gmra.mrb[16].mxu0 %vm229_vm3, %v3543_v18  ;;  %3224 = vmatmul.mubr.msk.bf16.gmra.mrb[16].mxu1 %vm229_vm3, %v3544_v19  ;;  %v3591_v18 = vld [vmem:[%s4999_s0 + $0x1a8] sm:$0xff]   ;;  %v3592_v19 = vld [vmem:[%s4999_s0 + $0x270] sm:$0xff]  }
  0x36   :  { %3117 = vmatprep.mubr.msk.bf16.mxu0 %vm3636_vm0, %v5002_v0  ;;  %3227 = vmatprep.mubr.msk.bf16.mxu1 %vm3636_vm0, %v5002_v0 }
  0x3d   :  { %3118 = vmatmul.mubr.msk.bf16.gmra.mrb[20].mxu0 %vm229_vm3, %v3545_v20  ;;  %3228 = vmatmul.mubr.msk.bf16.gmra.mrb[20].mxu1 %vm229_vm3, %v3546_v21 }
  0x3e   :  { %3121 = vmatprep.mubr.msk.bf16.mxu0 %vm3636_vm0, %v5002_v0  ;;  %3231 = vmatprep.mubr.msk.bf16.mxu1 %vm3636_vm0, %v5002_v0 }
  0x45   :  { %3122 = vmatmul.mubr.msk.bf16.gmra.mrb[24].mxu0 %vm229_vm3, %v3547_v22  ;;  %3232 = vmatmul.mubr.msk.bf16.gmra.mrb[24].mxu1 %vm229_vm3, %v3548_v23 }
  0x46   :  { %3125 = vmatprep.mubr.msk.bf16.mxu0 %vm3636_vm0, %v5002_v0  ;;  %3235 = vmatprep.mubr.msk.bf16.mxu1 %vm3636_vm0, %v5002_v0 }
  0x4d   :  { %3126 = vmatmul.mubr.msk.bf16.gmra.mrb[28].mxu0 %vm229_vm3, %v3549_v24  ;;  %3236 = vmatmul.mubr.msk.bf16.gmra.mrb[28].mxu1 %vm229_vm3, %v3550_v25 }
  0x4e   :  { %3129 = vmatprep.mubr.msk.bf16.mxu0 %vm3636_vm0, %v5002_v0  ;;  %3239 = vmatprep.mubr.msk.bf16.mxu1 %vm3636_vm0, %v5002_v0 }
  0x55   :  { %3130 = vmatmul.mubr.msk.bf16.gmra.mrb[32].mxu0 %vm229_vm3, %v3551_v26  ;;  %3240 = vmatmul.mubr.msk.bf16.gmra.mrb[32].mxu1 %vm229_vm3, %v3552_v27 }
  0x56   :  { %3133 = vmatprep.mubr.msk.bf16.mxu0 %vm3636_vm0, %v5002_v0  ;;  %3243 = vmatprep.mubr.msk.bf16.mxu1 %vm3636_vm0, %v5002_v0 }
  0x5d   :  { %3134 = vmatmul.mubr.msk.bf16.gmra.mrb[36].mxu0 %vm229_vm3, %v3553_v28  ;;  %3244 = vmatmul.mubr.msk.bf16.gmra.mrb[36].mxu1 %vm229_vm3, %v3554_v29 }
  0x5e   :  { %3137 = vmatprep.mubr.msk.bf16.mxu0 %vm3636_vm0, %v5002_v0  ;;  %3247 = vmatprep.mubr.msk.bf16.mxu1 %vm3636_vm0, %v5002_v0 }
  0x65   :  { %3138 = vmatmul.mubr.msk.bf16.gmra.mrb[40].mxu0 %vm229_vm3, %v3555_v30  ;;  %3248 = vmatmul.mubr.msk.bf16.gmra.mrb[40].mxu1 %vm229_vm3, %v3556_v31  ;;  %v3593_v30 = vld [vmem:[%s4999_s0 + $0x1b0] sm:$0xff]   ;;  %v3594_v31 = vld [vmem:[%s4999_s0 + $0x278] sm:$0xff]  }
  0x66   :  { %3141 = vmatprep.mubr.msk.bf16.mxu0 %vm3636_vm0, %v5002_v0  ;;  %3251 = vmatprep.mubr.msk.bf16.mxu1 %vm3636_vm0, %v5002_v0 }
  0x6d   :  { %3142 = vmatmul.mubr.msk.bf16.gmra.mrb[44].mxu0 %vm229_vm3, %v3557_v32  ;;  %3252 = vmatmul.mubr.msk.bf16.gmra.mrb[44].mxu1 %vm229_vm3, %v3558_v33 }
  0x6e   :  { %3145 = vmatprep.mubr.msk.bf16.mxu0 %vm3636_vm0, %v5002_v0  ;;  %3255 = vmatprep.mubr.msk.bf16.mxu1 %vm3636_vm0, %v5002_v0 }
  0x75   :  { %3146 = vmatmul.mubr.msk.bf16.gmra.mrb[48].mxu0 %vm229_vm3, %v3559_v34  ;;  %3256 = vmatmul.mubr.msk.bf16.gmra.mrb[48].mxu1 %vm229_vm3, %v3560_v35 }
  0x76   :  { %3149 = vmatprep.mubr.msk.bf16.mxu0 %vm3636_vm0, %v5002_v0  ;;  %3259 = vmatprep.mubr.msk.bf16.mxu1 %vm3636_vm0, %v5002_v0 }
  0x7d   :  { %3150 = vmatmul.mubr.msk.bf16.gmra.mrb[52].mxu0 %vm229_vm3, %v3561_v36  ;;  %3260 = vmatmul.mubr.msk.bf16.gmra.mrb[52].mxu1 %vm229_vm3, %v3562_v37 }
  0x7e   :  { %3153 = vmatprep.mubr.msk.bf16.mxu0 %vm3636_vm0, %v5002_v0  ;;  %3263 = vmatprep.mubr.msk.bf16.mxu1 %vm3636_vm0, %v5002_v0 }
  0x85   :  { %3154 = vmatmul.mubr.msk.bf16.gmra.mrb[56].mxu0 %vm229_vm3, %v3563_v38  ;;  %3264 = vmatmul.mubr.msk.bf16.gmra.mrb[56].mxu1 %vm229_vm3, %v3564_v39 }
  0x86   :  { %3157 = vmatprep.mubr.msk.bf16.mxu0 %vm3636_vm0, %v5002_v0  ;;  %3267 = vmatprep.mubr.msk.bf16.mxu1 %vm3636_vm0, %v5002_v0 }
  0x8d   :  { %3158 = vmatmul.mubr.msk.bf16.gmra.mrb[60].mxu0 %vm229_vm3, %v3565_v40  ;;  %3268 = vmatmul.mubr.msk.bf16.gmra.mrb[60].mxu1 %vm229_vm3, %v3566_v41 }
  0x8e   :  { %3161 = vmatprep.mubr.msk.bf16.mxu0 %vm3636_vm0, %v5002_v0  ;;  %3271 = vmatprep.mubr.msk.bf16.mxu1 %vm3636_vm0, %v5002_v0 }
  0x95   :  { %3162 = vmatmul.mubr.msk.bf16.gmra.mrb[64].mxu0 %vm229_vm3, %v3567_v42  ;;  %3272 = vmatmul.mubr.msk.bf16.gmra.mrb[64].mxu1 %vm229_vm3, %v3568_v43  ;;  %v3595_v42 = vld [vmem:[%s4999_s0 + $0x1b8] sm:$0xff]   ;;  %v3596_v43 = vld [vmem:[%s4999_s0 + $0x280] sm:$0xff]  }
  0x96   :  { %3165 = vmatprep.mubr.msk.bf16.mxu0 %vm3636_vm0, %v5002_v0  ;;  %3275 = vmatprep.mubr.msk.bf16.mxu1 %vm3636_vm0, %v5002_v0 }
  0x9d   :  { %3166 = vmatmul.mubr.msk.bf16.gmra.mrb[68].mxu0 %vm229_vm3, %v3569_v44  ;;  %3276 = vmatmul.mubr.msk.bf16.gmra.mrb[68].mxu1 %vm229_vm3, %v3570_v45 }
  0x9e   :  { %3169 = vmatprep.mubr.msk.bf16.mxu0 %vm3636_vm0, %v5002_v0  ;;  %3279 = vmatprep.mubr.msk.bf16.mxu1 %vm3636_vm0, %v5002_v0 }
  0xa5   :  { %3170 = vmatmul.mubr.msk.bf16.gmra.mrb[72].mxu0 %vm229_vm3, %v3571_v46  ;;  %3280 = vmatmul.mubr.msk.bf16.gmra.mrb[72].mxu1 %vm229_vm3, %v3572_v47 }
  0xa6   :  { %3173 = vmatprep.mubr.msk.bf16.mxu0 %vm3636_vm0, %v5002_v0  ;;  %3283 = vmatprep.mubr.msk.bf16.mxu1 %vm3636_vm0, %v5002_v0 }
  0xad   :  { %3174 = vmatmul.mubr.msk.bf16.gmra.mrb[76].mxu0 %vm229_vm3, %v3573_v48  ;;  %3284 = vmatmul.mubr.msk.bf16.gmra.mrb[76].mxu1 %vm229_vm3, %v3574_v49 }
  0xae   :  { %3177 = vmatprep.mubr.msk.bf16.mxu0 %vm3636_vm0, %v5002_v0  ;;  %3287 = vmatprep.mubr.msk.bf16.mxu1 %vm3636_vm0, %v5002_v0 }
  0xb5   :  { %3178 = vmatmul.mubr.msk.bf16.gmra.mrb[80].mxu0 %vm229_vm3, %v3575_v50  ;;  %3288 = vmatmul.mubr.msk.bf16.gmra.mrb[80].mxu1 %vm229_vm3, %v3576_v51 }
  0xb6   :  { %3181 = vmatprep.mubr.msk.bf16.mxu0 %vm3636_vm0, %v5002_v0  ;;  %3291 = vmatprep.mubr.msk.bf16.mxu1 %vm3636_vm0, %v5002_v0 }
  0xbd   :  { %3182 = vmatmul.mubr.msk.bf16.gmra.mrb[84].mxu0 %vm229_vm3, %v3577_v52  ;;  %3292 = vmatmul.mubr.msk.bf16.gmra.mrb[84].mxu1 %vm229_vm3, %v3578_v53 }
  0xbe   :  { %3185 = vmatprep.mubr.msk.bf16.mxu0 %vm3636_vm0, %v5002_v0  ;;  %3295 = vmatprep.mubr.msk.bf16.mxu1 %vm3636_vm0, %v5002_v0 }
  0xc5   :  { %3186 = vmatmul.mubr.msk.bf16.gmra.mrb[88].mxu0 %vm229_vm3, %v3579_v54  ;;  %3296 = vmatmul.mubr.msk.bf16.gmra.mrb[88].mxu1 %vm229_vm3, %v3580_v55  ;;  %v3597_v54 = vld [vmem:[%s4999_s0 + $0x1c0] sm:$0xff]   ;;  %v3598_v55 = vld [vmem:[%s4999_s0 + $0x288] sm:$0xff]  }
  0xc6   :  { %3189 = vmatprep.mubr.msk.bf16.mxu0 %vm3636_vm0, %v5002_v0  ;;  %3299 = vmatprep.mubr.msk.bf16.mxu1 %vm3636_vm0, %v5002_v0 }
  0xcd   :  { %3190 = vmatmul.mubr.msk.bf16.gmra.mrb[92].mxu0 %vm229_vm3, %v3581_v56  ;;  %3300 = vmatmul.mubr.msk.bf16.gmra.mrb[92].mxu1 %vm229_vm3, %v3582_v57 }
  0xce   :  { %3193 = vmatprep.mubr.msk.bf16.mxu0 %vm3636_vm0, %v5002_v0  ;;  %3303 = vmatprep.mubr.msk.bf16.mxu1 %vm3636_vm0, %v5002_v0 }
  0xd5   :  { %3194 = vmatmul.mubr.msk.bf16.gmra.mrb[96].mxu0 %vm229_vm3, %v3583_v58  ;;  %3304 = vmatmul.mubr.msk.bf16.gmra.mrb[96].mxu1 %vm229_vm3, %v3584_v59 }
  0xd6   :  { %3317 = vmatprep.mubr.msk.bf16.mxu0 %vm3636_vm0, %v5002_v0  ;;  %3427 = vmatprep.mubr.msk.bf16.mxu1 %vm3636_vm0, %v5002_v0 }
  0xdd   :  { %3318 = vmatmul.mubr.msk.bf16.vlgmr.msra.gmra.mrb[100].mxu0 %vm229_vm3, %v3585_v60  ;;  %3428 = vmatmul.mubr.msk.bf16.vlgmr.msra.gmra.mrb[100].mxu1 %vm229_vm3, %v3586_v61 }
  0xde   :  { %3321 = vmatprep.mubr.msk.bf16.mxu0 %vm3636_vm0, %v5002_v0  ;;  %3431 = vmatprep.mubr.msk.bf16.mxu1 %vm3636_vm0, %v5002_v0 }
  0xe5   :  { %3322 = vmatmul.mubr.msk.bf16.gmra.mrb[104].mxu0 %vm229_vm3, %v3587_v62  ;;  %3432 = vmatmul.mubr.msk.bf16.gmra.mrb[104].mxu1 %vm229_vm3, %v3588_v63 }
  0xe6   :  { %3325 = vmatprep.mubr.msk.bf16.mxu0 %vm3636_vm0, %v5002_v0  ;;  %3435 = vmatprep.mubr.msk.bf16.mxu1 %vm3636_vm0, %v5002_v0 }
  0xe8   :  { %v4021_v1 = vpop.f32.mrb[0].mxu0  ;;  %v4023_v2 = vpop.f32.mrb[0].mxu1 }
  0xe9   :  { %v3099_v4 = vpop.f32.mrb[1].mxu0  ;;  %v3209_v5 = vpop.f32.mrb[1].mxu1 }
  0xea   :  { %v4033_v8 = vpop.f32.mrb[2].mxu0  ;;  %v4035_v9 = vpop.f32.mrb[2].mxu1 }
  0xeb   :  { %v3100_v11 = vpop.f32.mrb[3].mxu0  ;;  %v3210_v12 = vpop.f32.mrb[3].mxu1 }
  0xed   :  { %3326 = vmatmul.mubr.msk.bf16.gmra.mrb[108].mxu0 %vm229_vm3, %v3589_v6  ;;  %3436 = vmatmul.mubr.msk.bf16.gmra.mrb[108].mxu1 %vm229_vm3, %v3590_v7  ;;  %v3599_v6 = vld [vmem:[%s4999_s0 + $0x1c8] sm:$0xff]   ;;  %v3600_v7 = vld [vmem:[%s4999_s0 + $0x290] sm:$0xff]  }
  0xee   :  { %3329 = vmatprep.mubr.msk.bf16.mxu0 %vm3636_vm0, %v5002_v0  ;;  %3439 = vmatprep.mubr.msk.bf16.mxu1 %vm3636_vm0, %v5002_v0 }
  0xf0   :  { %v4045_v13 = vpop.f32.mrb[4].mxu0  ;;  %v4047_v14 = vpop.f32.mrb[4].mxu1 }
  0xf1   :  { %v3103_v16 = vpop.f32.mrb[5].mxu0  ;;  %v3213_v17 = vpop.f32.mrb[5].mxu1 }
  0xf2   :  { %v4057_v20 = vpop.f32.mrb[6].mxu0  ;;  %v4059_v21 = vpop.f32.mrb[6].mxu1 }
  0xf3   :  { %v3104_v23 = vpop.f32.mrb[7].mxu0  ;;  %v3214_v24 = vpop.f32.mrb[7].mxu1 }
  0xf5   :  { %3330 = vmatmul.mubr.msk.bf16.gmra.mrb[112].mxu0 %vm229_vm3, %v3591_v18  ;;  %3440 = vmatmul.mubr.msk.bf16.gmra.mrb[112].mxu1 %vm229_vm3, %v3592_v19 }
  0xf6   :  { %3333 = vmatprep.mubr.msk.bf16.mxu0 %vm3636_vm0, %v5002_v0  ;;  %3443 = vmatprep.mubr.msk.bf16.mxu1 %vm3636_vm0, %v5002_v0 }
  0xf8   :  { %v4069_v25 = vpop.f32.mrb[8].mxu0  ;;  %v4071_v26 = vpop.f32.mrb[8].mxu1 }
  0xf9   :  { %v3107_v28 = vpop.f32.mrb[9].mxu0  ;;  %v3217_v29 = vpop.f32.mrb[9].mxu1 }
  0xfa   :  { %v4081_v32 = vpop.f32.mrb[10].mxu0  ;;  %v4083_v33 = vpop.f32.mrb[10].mxu1 }
  0xfb   :  { %v3108_v35 = vpop.f32.mrb[11].mxu0  ;;  %v3218_v36 = vpop.f32.mrb[11].mxu1 }
  0xfd   :  { %3334 = vmatmul.mubr.msk.bf16.gmra.mrb[116].mxu0 %vm229_vm3, %v3593_v30  ;;  %3444 = vmatmul.mubr.msk.bf16.gmra.mrb[116].mxu1 %vm229_vm3, %v3594_v31  ;;  %v3601_v30 = vld [vmem:[%s4999_s0 + $0x1d0] sm:$0xff]   ;;  %v3602_v31 = vld [vmem:[%s4999_s0 + $0x298] sm:$0xff]  }
  0xfe   :  { %3337 = vmatprep.mubr.msk.bf16.mxu0 %vm3636_vm0, %v5002_v0  ;;  %3447 = vmatprep.mubr.msk.bf16.mxu1 %vm3636_vm0, %v5002_v0 }
 0x100   :  { %v4093_v37 = vpop.f32.mrb[12].mxu0  ;;  %v4095_v38 = vpop.f32.mrb[12].mxu1 }
 0x101   :  { %v3111_v40 = vpop.f32.mrb[13].mxu0  ;;  %v3221_v41 = vpop.f32.mrb[13].mxu1 }
 0x102   :  { %v4105_v44 = vpop.f32.mrb[14].mxu0  ;;  %v4107_v45 = vpop.f32.mrb[14].mxu1 }
 0x103   :  { %v3112_v47 = vpop.f32.mrb[15].mxu0  ;;  %v3222_v48 = vpop.f32.mrb[15].mxu1 }
 0x105   :  { %3338 = vmatmul.mubr.msk.bf16.gmra.mrb[120].mxu0 %vm229_vm3, %v3595_v42  ;;  %3448 = vmatmul.mubr.msk.bf16.gmra.mrb[120].mxu1 %vm229_vm3, %v3596_v43 }
 0x106   :  { %3341 = vmatprep.mubr.msk.bf16.mxu0 %vm3636_vm0, %v5002_v0  ;;  %3451 = vmatprep.mubr.msk.bf16.mxu1 %vm3636_vm0, %v5002_v0 }
 0x108   :  { %v4117_v49 = vpop.f32.mrb[16].mxu0  ;;  %v4119_v50 = vpop.f32.mrb[16].mxu1 }
 0x109   :  { %v3115_v52 = vpop.f32.mrb[17].mxu0  ;;  %v3225_v53 = vpop.f32.mrb[17].mxu1 }
 0x10a   :  { %v4129_v56 = vpop.f32.mrb[18].mxu0  ;;  %v4131_v57 = vpop.f32.mrb[18].mxu1 }
 0x10b   :  { %v3116_v59 = vpop.f32.mrb[19].mxu0  ;;  %v3226_v60 = vpop.f32.mrb[19].mxu1 }
 0x10d   :  { %3342 = vmatmul.mubr.msk.bf16.gmra.mrb[124].mxu0 %vm229_vm3, %v3597_v54  ;;  %3452 = vmatmul.mubr.msk.bf16.gmra.mrb[124].mxu1 %vm229_vm3, %v3598_v55  ;;  %v3603_v54 = vld [vmem:[%s4999_s0 + $0x1d8] sm:$0xff]   ;;  %v3604_v55 = vld [vmem:[%s4999_s0 + $0x2a0] sm:$0xff]  }
 0x10e   :  { %3345 = vmatprep.mubr.msk.bf16.mxu0 %vm3636_vm0, %v5002_v0  ;;  %3455 = vmatprep.mubr.msk.bf16.mxu1 %vm3636_vm0, %v5002_v0 }
 0x110   :  { %v4141_v61 = vpop.f32.mrb[20].mxu0  ;;  %v4143_v62 = vpop.f32.mrb[20].mxu1 }
 0x111   :  { %v3119_v4 = vpop.f32.mrb[21].mxu0  ;;  %v3229_v5 = vpop.f32.mrb[21].mxu1 }
 0x112   :  { %v4153_v11 = vpop.f32.mrb[22].mxu0  ;;  %v4155_v12 = vpop.f32.mrb[22].mxu1 }
 0x113   :  { %v3120_v17 = vpop.f32.mrb[23].mxu0  ;;  %v3230_v18 = vpop.f32.mrb[23].mxu1 }
 0x115   :  { %3346 = vmatmul.mubr.msk.bf16.gmra.mrb[128].mxu0 %vm229_vm3, %v3599_v6  ;;  %3456 = vmatmul.mubr.msk.bf16.gmra.mrb[128].mxu1 %vm229_vm3, %v3600_v7 }
 0x116   :  { %3349 = vmatprep.mubr.msk.bf16.mxu0 %vm3636_vm0, %v5002_v0  ;;  %3459 = vmatprep.mubr.msk.bf16.mxu1 %vm3636_vm0, %v5002_v0 }
 0x118   :  { %v4165_v19 = vpop.f32.mrb[24].mxu0  ;;  %v4167_v23 = vpop.f32.mrb[24].mxu1 }
 0x119   :  { %v3123_v28 = vpop.f32.mrb[25].mxu0  ;;  %v3233_v29 = vpop.f32.mrb[25].mxu1 }
 0x11a   :  { %v4177_v35 = vpop.f32.mrb[26].mxu0  ;;  %v4179_v36 = vpop.f32.mrb[26].mxu1 }
 0x11b   :  { %v3124_v41 = vpop.f32.mrb[27].mxu0  ;;  %v3234_v42 = vpop.f32.mrb[27].mxu1 }
 0x11d   :  { %3350 = vmatmul.mubr.msk.bf16.gmra.mrb[132].mxu0 %vm229_vm3, %v3601_v30  ;;  %3460 = vmatmul.mubr.msk.bf16.gmra.mrb[132].mxu1 %vm229_vm3, %v3602_v31  ;;  %v3605_v30 = vld [vmem:[%s4999_s0 + $0x1e0] sm:$0xff]   ;;  %v3606_v31 = vld [vmem:[%s4999_s0 + $0x2a8] sm:$0xff]  }
 0x11e   :  { %3353 = vmatprep.mubr.msk.bf16.mxu0 %vm3636_vm0, %v5002_v0  ;;  %3463 = vmatprep.mubr.msk.bf16.mxu1 %vm3636_vm0, %v5002_v0 }
 0x120   :  { %v4189_v43 = vpop.f32.mrb[28].mxu0  ;;  %v4191_v47 = vpop.f32.mrb[28].mxu1 }
 0x121   :  { %v3127_v52 = vpop.f32.mrb[29].mxu0  ;;  %v3237_v53 = vpop.f32.mrb[29].mxu1 }
 0x122   :  { %v4201_v59 = vpop.f32.mrb[30].mxu0  ;;  %v4203_v60 = vpop.f32.mrb[30].mxu1 }
 0x123   :  { %v3128_v5 = vpop.f32.mrb[31].mxu0  ;;  %v3238_v6 = vpop.f32.mrb[31].mxu1 }
 0x125   :  { %3354 = vmatmul.mubr.msk.bf16.gmra.mrb[136].mxu0 %vm229_vm3, %v3603_v54  ;;  %3464 = vmatmul.mubr.msk.bf16.gmra.mrb[136].mxu1 %vm229_vm3, %v3604_v55 }
 0x126   :  { %3357 = vmatprep.mubr.msk.bf16.mxu0 %vm3636_vm0, %v5002_v0  ;;  %3467 = vmatprep.mubr.msk.bf16.mxu1 %vm3636_vm0, %v5002_v0 }
 0x128   :  { %v4213_v7 = vpop.f32.mrb[32].mxu0  ;;  %v4215_v17 = vpop.f32.mrb[32].mxu1 }
 0x129   :  { %v3131_v28 = vpop.f32.mrb[33].mxu0  ;;  %v3241_v29 = vpop.f32.mrb[33].mxu1 }
 0x12a   :  { %v4225_v41 = vpop.f32.mrb[34].mxu0  ;;  %v4227_v42 = vpop.f32.mrb[34].mxu1 }
 0x12b   :  { %v3132_v53 = vpop.f32.mrb[35].mxu0  ;;  %v3242_v54 = vpop.f32.mrb[35].mxu1 }
 0x12d   :  { %3358 = vmatmul.mubr.msk.bf16.gmra.mrb[140].mxu0 %vm229_vm3, %v3605_v30  ;;  %3468 = vmatmul.mubr.msk.bf16.gmra.mrb[140].mxu1 %vm229_vm3, %v3606_v31  ;;  %v3607_v30 = vld [vmem:[%s4999_s0 + $0x1e8] sm:$0xff]   ;;  %v3608_v31 = vld [vmem:[%s4999_s0 + $0x2b0] sm:$0xff]  }
 0x12e   :  { %3361 = vmatprep.mubr.msk.bf16.mxu0 %vm3636_vm0, %v5002_v0  ;;  %3471 = vmatprep.mubr.msk.bf16.mxu1 %vm3636_vm0, %v5002_v0 }
 0x130   :  { %v4237_v55 = vpop.f32.mrb[36].mxu0  ;;  %v4239_v5 = vpop.f32.mrb[36].mxu1 }
 0x131   :  { %v3135_v28 = vpop.f32.mrb[37].mxu0  ;;  %v3245_v29 = vpop.f32.mrb[37].mxu1 }
 0x132   :  { %v4249_v53 = vpop.f32.mrb[38].mxu0  ;;  %v4251_v54 = vpop.f32.mrb[38].mxu1 }
 0x133   :  { %v3136_v18 = vpop.f32.mrb[39].mxu0  ;;  %v3246_v4 = vpop.f32.mrb[39].mxu1 }
 0x134   :  { %v3609_v4 = vld [vmem:[%s4999_s0 + $0x1f0] sm:$0xff]  }
 0x135   :  { %3362 = vmatmul.mubr.msk.bf16.gmra.mrb[144].mxu0 %vm229_vm3, %v3607_v30  ;;  %3472 = vmatmul.mubr.msk.bf16.gmra.mrb[144].mxu1 %vm229_vm3, %v3608_v31  ;;  %v3610_v30 = vld [vmem:[%s4999_s0 + $0x2b8] sm:$0xff]  }
 0x136   :  { %3365 = vmatprep.mubr.msk.bf16.mxu0 %vm3636_vm0, %v5002_v0  ;;  %3475 = vmatprep.mubr.msk.bf16.mxu1 %vm3636_vm0, %v5002_v0 }
 0x138   :  { %v4261_v28 = vpop.f32.mrb[40].mxu0  ;;  %v4263_v29 = vpop.f32.mrb[40].mxu1 }
 0x139   :  { %v3139_v52 = vpop.f32.mrb[41].mxu0  ;;  %v3249_v18 = vpop.f32.mrb[41].mxu1 }
 0x13a   :  { %v4273_v31 = vpop.f32.mrb[42].mxu0  ;;  %v4275_v48 = vpop.f32.mrb[42].mxu1 }
 0x13b   :  { %v3140_v24 = vpop.f32.mrb[43].mxu0  ;;  %v3250_v16 = vpop.f32.mrb[43].mxu1 }
 0x13c   :  { %v3611_v16 = vld [vmem:[%s4999_s0 + $0x1f8] sm:$0xff]  }
 0x13d   :  { %3366 = vmatmul.mubr.msk.bf16.gmra.mrb[148].mxu0 %vm229_vm3, %v3609_v4  ;;  %3476 = vmatmul.mubr.msk.bf16.gmra.mrb[148].mxu1 %vm229_vm3, %v3610_v30  ;;  %v3612_v4 = vld [vmem:[%s4999_s0 + $0x2c0] sm:$0xff]  }
 0x13e   :  { %3369 = vmatprep.mubr.msk.bf16.mxu0 %vm3636_vm0, %v5002_v0  ;;  %3479 = vmatprep.mubr.msk.bf16.mxu1 %vm3636_vm0, %v5002_v0 }
 0x140   :  { %v4285_v52 = vpop.f32.mrb[44].mxu0  ;;  %v4287_v18 = vpop.f32.mrb[44].mxu1 }
 0x141   :  { %5059 = vst [vmem:[#allocation2_spill] sm:$0xff] %v4287_v18  ;;  %v3143_v40 = vpop.f32.mrb[45].mxu0  ;;  %v3253_v24 = vpop.f32.mrb[45].mxu1 }
 0x142   :  { %v4297_v30 = vpop.f32.mrb[46].mxu0  ;;  %v4299_v63 = vpop.f32.mrb[46].mxu1 }
 0x143   :  { %5060 = vst [vmem:[#allocation3_spill] sm:$0xff] %v4297_v30  ;;  %5061 = vst [vmem:[#allocation4_spill] sm:$0xff] %v4299_v63  ;;  %v3144_v51 = vpop.f32.mrb[47].mxu0  ;;  %v3254_v46 = vpop.f32.mrb[47].mxu1 }
 0x144   :  { %v3613_v46 = vld [vmem:[%s4999_s0 + $0x200] sm:$0xff]  }
 0x145   :  { %3370 = vmatmul.mubr.msk.bf16.gmra.mrb[152].mxu0 %vm229_vm3, %v3611_v16  ;;  %3480 = vmatmul.mubr.msk.bf16.gmra.mrb[152].mxu1 %vm229_vm3, %v3612_v4  ;;  %v3614_v16 = vld [vmem:[%s4999_s0 + $0x2c8] sm:$0xff]  }
 0x146   :  { %3373 = vmatprep.mubr.msk.bf16.mxu0 %vm3636_vm0, %v5002_v0  ;;  %3483 = vmatprep.mubr.msk.bf16.mxu1 %vm3636_vm0, %v5002_v0 }
 0x148   :  { %v4309_v40 = vpop.f32.mrb[48].mxu0  ;;  %v4311_v24 = vpop.f32.mrb[48].mxu1 }
 0x149   :  { %5062 = vst [vmem:[#allocation5_spill] sm:$0xff] %v4309_v40  ;;  %5063 = vst [vmem:[#allocation6_spill] sm:$0xff] %v4311_v24  ;;  %v3147_v58 = vpop.f32.mrb[49].mxu0  ;;  %v3257_v51 = vpop.f32.mrb[49].mxu1 }
 0x14a   :  { %v4321_v4 = vpop.f32.mrb[50].mxu0  ;;  %v4323_v39 = vpop.f32.mrb[50].mxu1 }
 0x14b   :  { %5064 = vst [vmem:[#allocation7_spill] sm:$0xff] %v4321_v4  ;;  %5065 = vst [vmem:[#allocation8_spill] sm:$0xff] %v4323_v39  ;;  %v3148_v27 = vpop.f32.mrb[51].mxu0  ;;  %v3258_v22 = vpop.f32.mrb[51].mxu1 }
 0x14c   :  { %v3615_v22 = vld [vmem:[%s4999_s0 + $0x208] sm:$0xff]  }
 0x14d   :  { %3374 = vmatmul.mubr.msk.bf16.gmra.mrb[156].mxu0 %vm229_vm3, %v3613_v46  ;;  %3484 = vmatmul.mubr.msk.bf16.gmra.mrb[156].mxu1 %vm229_vm3, %v3614_v16  ;;  %v3616_v46 = vld [vmem:[%s4999_s0 + $0x2d0] sm:$0xff]  }
 0x14e   :  { %3377 = vmatprep.mubr.msk.bf16.mxu0 %vm3636_vm0, %v5002_v0  ;;  %3487 = vmatprep.mubr.msk.bf16.mxu1 %vm3636_vm0, %v5002_v0 }
 0x150   :  { %v4333_v58 = vpop.f32.mrb[52].mxu0  ;;  %v4335_v51 = vpop.f32.mrb[52].mxu1 }
 0x151   :  { %5066 = vst [vmem:[#allocation9_spill] sm:$0xff] %v4333_v58  ;;  %5067 = vst [vmem:[#allocation10_spill] sm:$0xff] %v4335_v51  ;;  %v3151_v34 = vpop.f32.mrb[53].mxu0  ;;  %v3261_v27 = vpop.f32.mrb[53].mxu1 }
 0x152   :  { %v4345_v16 = vpop.f32.mrb[54].mxu0  ;;  %v4347_v15 = vpop.f32.mrb[54].mxu1  ;;  %v5070_v34 = vmov 0.0  }
 0x153   :  { %5068 = vst [vmem:[#allocation11_spill] sm:$0xff] %v4345_v16  ;;  %5069 = vst [vmem:[#allocation12_spill] sm:$0xff] %v4347_v15  ;;  %v3152_v3 = vpop.f32.mrb[55].mxu0  ;;  %v3262_v0 = vpop.f32.mrb[55].mxu1 }
 0x154   :  { %v3617_v0 = vld [vmem:[%s4999_s0 + $0x210] sm:$0xff]  }
 0x155   :  { %3378 = vmatmul.mubr.msk.bf16.gmra.mrb[160].mxu0 %vm229_vm3, %v3615_v22  ;;  %3488 = vmatmul.mubr.msk.bf16.gmra.mrb[160].mxu1 %vm229_vm3, %v3616_v46  ;;  %v3618_v22 = vld [vmem:[%s4999_s0 + $0x2d8] sm:$0xff]  }
 0x156   :  { %3381 = vmatprep.mubr.msk.bf16.mxu0 %vm3636_vm0, %v5070_v34  ;;  %3491 = vmatprep.mubr.msk.bf16.mxu1 %vm3636_vm0, %v5070_v34 }
 0x158   :  { %v4357_v27 = vpop.f32.mrb[56].mxu0  ;;  %v4359_v6 = vpop.f32.mrb[56].mxu1 }
 0x159   :  { %5071 = vst [vmem:[#allocation13_spill] sm:$0xff] %v4357_v27  ;;  %5072 = vst [vmem:[#allocation14_spill] sm:$0xff] %v4359_v6  ;;  %v3155_v10 = vpop.f32.mrb[57].mxu0  ;;  %v3265_v3 = vpop.f32.mrb[57].mxu1 }
 0x15a   :  { %v4369_v46 = vpop.f32.mrb[58].mxu0  ;;  %v4371_v15 = vpop.f32.mrb[58].mxu1 }
 0x15b   :  { %5073 = vst [vmem:[#allocation15_spill] sm:$0xff] %v4369_v46  ;;  %5074 = vst [vmem:[#allocation16_spill] sm:$0xff] %v4371_v15  ;;  %v3156_v58 = vpop.f32.mrb[59].mxu0  ;;  %v3266_v39 = vpop.f32.mrb[59].mxu1 }
 0x15c   :  { %v3619_v39 = vld [vmem:[%s4999_s0 + $0x218] sm:$0xff]  }
 0x15d   :  { %3382 = vmatmul.mubr.msk.bf16.gmra.mrb[164].mxu0 %vm229_vm3, %v3617_v0  ;;  %3492 = vmatmul.mubr.msk.bf16.gmra.mrb[164].mxu1 %vm229_vm3, %v3618_v22  ;;  %v3620_v0 = vld [vmem:[%s4999_s0 + $0x2e0] sm:$0xff]  }
 0x15e   :  { %3385 = vmatprep.mubr.msk.bf16.mxu0 %vm3636_vm0, %v5070_v34  ;;  %3495 = vmatprep.mubr.msk.bf16.mxu1 %vm3636_vm0, %v5070_v34 }
 0x160   :  { %v4381_v10 = vpop.f32.mrb[60].mxu0  ;;  %v4383_v3 = vpop.f32.mrb[60].mxu1 }
 0x161   :  { %5075 = vst [vmem:[#allocation17_spill] sm:$0xff] %v4381_v10  ;;  %5076 = vst [vmem:[#allocation18_spill] sm:$0xff] %v4383_v3  ;;  %v3159_v16 = vpop.f32.mrb[61].mxu0  ;;  %v3269_v58 = vpop.f32.mrb[61].mxu1 }
 0x162   :  { %v4393_v22 = vpop.f32.mrb[62].mxu0  ;;  %v4395_v15 = vpop.f32.mrb[62].mxu1 }
 0x163   :  { %5077 = vst [vmem:[#allocation19_spill] sm:$0xff] %v4393_v22  ;;  %5078 = vst [vmem:[#allocation20_spill] sm:$0xff] %v4395_v15  ;;  %v3160_v6 = vpop.f32.mrb[63].mxu0  ;;  %v3270_v27 = vpop.f32.mrb[63].mxu1 }
 0x164   :  { %v3621_v27 = vld [vmem:[%s4999_s0 + $0x220] sm:$0xff]  }
 0x165   :  { %3386 = vmatmul.mubr.msk.bf16.gmra.mrb[168].mxu0 %vm229_vm3, %v3619_v39  ;;  %3496 = vmatmul.mubr.msk.bf16.gmra.mrb[168].mxu1 %vm229_vm3, %v3620_v0  ;;  %v3622_v39 = vld [vmem:[%s4999_s0 + $0x2e8] sm:$0xff]  }
 0x166   :  { %3389 = vmatprep.mubr.msk.bf16.mxu0 %vm3636_vm0, %v5070_v34  ;;  %3499 = vmatprep.mubr.msk.bf16.mxu1 %vm3636_vm0, %v5070_v34 }
 0x168   :  { %v4405_v16 = vpop.f32.mrb[64].mxu0  ;;  %v4407_v58 = vpop.f32.mrb[64].mxu1 }
 0x169   :  { %5079 = vst [vmem:[#allocation21_spill] sm:$0xff] %v4405_v16  ;;  %5080 = vst [vmem:[#allocation22_spill] sm:$0xff] %v4407_v58  ;;  %v3163_v46 = vpop.f32.mrb[65].mxu0  ;;  %v3273_v6 = vpop.f32.mrb[65].mxu1 }
 0x16a   :  { %v4417_v0 = vpop.f32.mrb[66].mxu0  ;;  %v4419_v15 = vpop.f32.mrb[66].mxu1 }
 0x16b   :  { %5081 = vst [vmem:[#allocation23_spill] sm:$0xff] %v4417_v0  ;;  %5082 = vst [vmem:[#allocation24_spill] sm:$0xff] %v4419_v15  ;;  %v3164_v3 = vpop.f32.mrb[67].mxu0  ;;  %v3274_v10 = vpop.f32.mrb[67].mxu1 }
 0x16c   :  { %v3623_v10 = vld [vmem:[%s4999_s0 + $0x228] sm:$0xff]  }
 0x16d   :  { %3390 = vmatmul.mubr.msk.bf16.gmra.mrb[172].mxu0 %vm229_vm3, %v3621_v27  ;;  %3500 = vmatmul.mubr.msk.bf16.gmra.mrb[172].mxu1 %vm229_vm3, %v3622_v39  ;;  %v3624_v27 = vld [vmem:[%s4999_s0 + $0x2f0] sm:$0xff]  }
 0x16e   :  { %3393 = vmatprep.mubr.msk.bf16.mxu0 %vm3636_vm0, %v5070_v34  ;;  %3503 = vmatprep.mubr.msk.bf16.mxu1 %vm3636_vm0, %v5070_v34 }
 0x170   :  { %v4429_v46 = vpop.f32.mrb[68].mxu0  ;;  %v4431_v6 = vpop.f32.mrb[68].mxu1 }
 0x171   :  { %5083 = vst [vmem:[#allocation25_spill] sm:$0xff] %v4429_v46  ;;  %5084 = vst [vmem:[#allocation26_spill] sm:$0xff] %v4431_v6  ;;  %v3167_v22 = vpop.f32.mrb[69].mxu0  ;;  %v3277_v3 = vpop.f32.mrb[69].mxu1 }
 0x172   :  { %v4441_v39 = vpop.f32.mrb[70].mxu0  ;;  %v4443_v15 = vpop.f32.mrb[70].mxu1 }
 0x173   :  { %5085 = vst [vmem:[#allocation27_spill] sm:$0xff] %v4441_v39  ;;  %5086 = vst [vmem:[#allocation28_spill] sm:$0xff] %v4443_v15  ;;  %v3168_v58 = vpop.f32.mrb[71].mxu0  ;;  %v3278_v16 = vpop.f32.mrb[71].mxu1 }
 0x174   :  { %v3625_v16 = vld [vmem:[%s4999_s0 + $0x230] sm:$0xff]  }
 0x175   :  { %3394 = vmatmul.mubr.msk.bf16.gmra.mrb[176].mxu0 %vm229_vm3, %v3623_v10  ;;  %3504 = vmatmul.mubr.msk.bf16.gmra.mrb[176].mxu1 %vm229_vm3, %v3624_v27  ;;  %v3626_v10 = vld [vmem:[%s4999_s0 + $0x2f8] sm:$0xff]  }
 0x176   :  { %3397 = vmatprep.mubr.msk.bf16.mxu0 %vm3636_vm0, %v5070_v34  ;;  %3507 = vmatprep.mubr.msk.bf16.mxu1 %vm3636_vm0, %v5070_v34 }
 0x178   :  { %v4453_v22 = vpop.f32.mrb[72].mxu0  ;;  %v4455_v3 = vpop.f32.mrb[72].mxu1 }
 0x179   :  { %5087 = vst [vmem:[#allocation29_spill] sm:$0xff] %v4453_v22  ;;  %5088 = vst [vmem:[#allocation30_spill] sm:$0xff] %v4455_v3  ;;  %v3171_v0 = vpop.f32.mrb[73].mxu0  ;;  %v3281_v58 = vpop.f32.mrb[73].mxu1 }
 0x17a   :  { %v4465_v27 = vpop.f32.mrb[74].mxu0  ;;  %v4467_v15 = vpop.f32.mrb[74].mxu1 }
 0x17b   :  { %5089 = vst [vmem:[#allocation31_spill] sm:$0xff] %v4465_v27  ;;  %5090 = vst [vmem:[#allocation32_spill] sm:$0xff] %v4467_v15  ;;  %v3172_v6 = vpop.f32.mrb[75].mxu0  ;;  %v3282_v46 = vpop.f32.mrb[75].mxu1 }
 0x17c   :  { %v3627_v46 = vld [vmem:[%s4999_s0 + $0x238] sm:$0xff]  }
 0x17d   :  { %3398 = vmatmul.mubr.msk.bf16.gmra.mrb[180].mxu0 %vm229_vm3, %v3625_v16  ;;  %3508 = vmatmul.mubr.msk.bf16.gmra.mrb[180].mxu1 %vm229_vm3, %v3626_v10  ;;  %v3628_v16 = vld [vmem:[%s4999_s0 + $0x300] sm:$0xff]  }
 0x17e   :  { %3401 = vmatprep.mubr.msk.bf16.mxu0 %vm3636_vm0, %v5070_v34  ;;  %3511 = vmatprep.mubr.msk.bf16.mxu1 %vm3636_vm0, %v5070_v34 }
 0x180   :  { %v4477_v0 = vpop.f32.mrb[76].mxu0  ;;  %v4479_v58 = vpop.f32.mrb[76].mxu1 }
 0x181   :  { %5091 = vst [vmem:[#allocation33_spill] sm:$0xff] %v4477_v0  ;;  %5092 = vst [vmem:[#allocation34_spill] sm:$0xff] %v4479_v58  ;;  %v3175_v39 = vpop.f32.mrb[77].mxu0  ;;  %v3285_v6 = vpop.f32.mrb[77].mxu1 }
 0x182   :  { %v4489_v10 = vpop.f32.mrb[78].mxu0  ;;  %v4491_v15 = vpop.f32.mrb[78].mxu1 }
 0x183   :  { %5093 = vst [vmem:[#allocation35_spill] sm:$0xff] %v4489_v10  ;;  %5094 = vst [vmem:[#allocation36_spill] sm:$0xff] %v4491_v15  ;;  %v3176_v3 = vpop.f32.mrb[79].mxu0  ;;  %v3286_v22 = vpop.f32.mrb[79].mxu1 }
 0x184   :  { %v3629_v22 = vld [vmem:[%s4999_s0 + $0x240] sm:$0xff]  }
 0x185   :  { %3402 = vmatmul.mubr.msk.bf16.gmra.mrb[184].mxu0 %vm229_vm3, %v3627_v46  ;;  %3512 = vmatmul.mubr.msk.bf16.gmra.mrb[184].mxu1 %vm229_vm3, %v3628_v16  ;;  %v3630_v46 = vld [vmem:[%s4999_s0 + $0x308] sm:$0xff]  }
 0x186   :  { %3405 = vmatprep.mubr.msk.bf16.mxu0 %vm3636_vm0, %v5070_v34  ;;  %3515 = vmatprep.mubr.msk.bf16.mxu1 %vm3636_vm0, %v5070_v34 }
 0x188   :  { %v4501_v39 = vpop.f32.mrb[80].mxu0  ;;  %v4503_v6 = vpop.f32.mrb[80].mxu1 }
 0x189   :  { %5095 = vst [vmem:[#allocation37_spill] sm:$0xff] %v4501_v39  ;;  %5096 = vst [vmem:[#allocation38_spill] sm:$0xff] %v4503_v6  ;;  %v3179_v27 = vpop.f32.mrb[81].mxu0  ;;  %v3289_v3 = vpop.f32.mrb[81].mxu1 }
 0x18a   :  { %v4513_v16 = vpop.f32.mrb[82].mxu0  ;;  %v4515_v15 = vpop.f32.mrb[82].mxu1 }
 0x18b   :  { %5097 = vst [vmem:[#allocation39_spill] sm:$0xff] %v4513_v16  ;;  %5098 = vst [vmem:[#allocation40_spill] sm:$0xff] %v4515_v15  ;;  %v3180_v58 = vpop.f32.mrb[83].mxu0  ;;  %v3290_v0 = vpop.f32.mrb[83].mxu1 }
 0x18c   :  { %v3631_v0 = vld [vmem:[%s4999_s0 + $0x248] sm:$0xff]  }
 0x18d   :  { %3406 = vmatmul.mubr.msk.bf16.gmra.mrb[188].mxu0 %vm229_vm3, %v3629_v22  ;;  %3516 = vmatmul.mubr.msk.bf16.gmra.mrb[188].mxu1 %vm229_vm3, %v3630_v46  ;;  %v3632_v22 = vld [vmem:[%s4999_s0 + $0x310] sm:$0xff]  }
 0x18e   :  { %3409 = vmatprep.mubr.msk.bf16.mxu0 %vm3636_vm0, %v5070_v34  ;;  %3519 = vmatprep.mubr.msk.bf16.mxu1 %vm3636_vm0, %v5070_v34 }
 0x190   :  { %v4525_v27 = vpop.f32.mrb[84].mxu0  ;;  %v4527_v3 = vpop.f32.mrb[84].mxu1 }
 0x191   :  { %5099 = vst [vmem:[#allocation41_spill] sm:$0xff] %v4525_v27  ;;  %5100 = vst [vmem:[#allocation42_spill] sm:$0xff] %v4527_v3  ;;  %v3183_v10 = vpop.f32.mrb[85].mxu0  ;;  %v3293_v58 = vpop.f32.mrb[85].mxu1 }
 0x192   :  { %v4537_v46 = vpop.f32.mrb[86].mxu0  ;;  %v4539_v15 = vpop.f32.mrb[86].mxu1 }
 0x193   :  { %5101 = vst [vmem:[#allocation43_spill] sm:$0xff] %v4537_v46  ;;  %5102 = vst [vmem:[#allocation44_spill] sm:$0xff] %v4539_v15  ;;  %v3184_v6 = vpop.f32.mrb[87].mxu0  ;;  %v3294_v39 = vpop.f32.mrb[87].mxu1 }
 0x194   :  { %v3633_v39 = vld [vmem:[%s4999_s0 + $0x250] sm:$0xff]  }
 0x195   :  { %3410 = vmatmul.mubr.msk.bf16.gmra.mrb[192].mxu0 %vm229_vm3, %v3631_v0  ;;  %3520 = vmatmul.mubr.msk.bf16.gmra.mrb[192].mxu1 %vm229_vm3, %v3632_v22  ;;  %v3634_v0 = vld [vmem:[%s4999_s0 + $0x318] sm:$0xff]  }
 0x196   :  { %3413 = vmatprep.mubr.msk.bf16.mxu0 %vm3636_vm0, %v5070_v34  ;;  %3523 = vmatprep.mubr.msk.bf16.mxu1 %vm3636_vm0, %v5070_v34 }
 0x198   :  { %v4549_v10 = vpop.f32.mrb[88].mxu0  ;;  %v4551_v58 = vpop.f32.mrb[88].mxu1 }
 0x199   :  { %5103 = vst [vmem:[#allocation45_spill] sm:$0xff] %v4549_v10  ;;  %5104 = vst [vmem:[#allocation46_spill] sm:$0xff] %v4551_v58  ;;  %v3187_v16 = vpop.f32.mrb[89].mxu0  ;;  %v3297_v6 = vpop.f32.mrb[89].mxu1 }
 0x19a   :  { %v4561_v22 = vpop.f32.mrb[90].mxu0  ;;  %v4563_v34 = vpop.f32.mrb[90].mxu1 }
 0x19b   :  { %5105 = vst [vmem:[#allocation47_spill] sm:$0xff] %v4561_v22  ;;  %5106 = vst [vmem:[#allocation48_spill] sm:$0xff] %v4563_v34  ;;  %v3188_v46 = vpop.f32.mrb[91].mxu0  ;;  %v3298_v3 = vpop.f32.mrb[91].mxu1  ;;  %v4596_v34 = vld [vmem:[%s5000_s2] ss:$0 sm:$0xff] }
 0x19d   :  { %3414 = vmatmul.mubr.msk.bf16.gmra.mrb[196].mxu0 %vm229_vm3, %v3633_v39  ;;  %3524 = vmatmul.mubr.msk.bf16.gmra.mrb[196].mxu1 %vm229_vm3, %v3634_v0 }
 0x1a0   :  { %v4569_v16 = vpop.f32.mrb[92].mxu0  ;;  %v4571_v6 = vpop.f32.mrb[92].mxu1 }
 0x1a1   :  { %5107 = vst [vmem:[#allocation49_spill] sm:$0xff] %v4569_v16  ;;  %5108 = vst [vmem:[#allocation50_spill] sm:$0xff] %v4571_v6  ;;  %v3191_v58 = vpop.f32.mrb[93].mxu0  ;;  %v3301_v10 = vpop.f32.mrb[93].mxu1 }
 0x1a2   :  { %v4575_v27 = vpop.f32.mrb[94].mxu0  ;;  %v4577_v4 = vpop.f32.mrb[94].mxu1 }
 0x1a3   :  { %5109 = vst [vmem:[#allocation51_spill] sm:$0xff] %v4575_v27  ;;  %5110 = vst [vmem:[#allocation52_spill] sm:$0xff] %v4577_v4  ;;  %v3192_v46 = vpop.f32.mrb[95].mxu0  ;;  %v3302_v39 = vpop.f32.mrb[95].mxu1 }
 0x1a8   :  { %v4581_v15 = vpop.f32.mrb[96].mxu0  ;;  %v4583_v0 = vpop.f32.mrb[96].mxu1 }
 0x1a9   :  { %5111 = vst [vmem:[#allocation53_spill] sm:$0xff] %v4581_v15  ;;  %5112 = vst [vmem:[#allocation54_spill] sm:$0xff] %v4583_v0  ;;  %v3195_v22 = vpop.f32.mrb[97].mxu0  ;;  %v3305_v51 = vpop.f32.mrb[97].mxu1  ;;  %v5115_v0 = vmax.f32 %v4021_v1, %v4023_v2 }
 0x1aa   :  { %v4587_v58 = vpop.f32.mrb[98].mxu0  ;;  %v4589_v10 = vpop.f32.mrb[98].mxu1 }
 0x1ab   :  { %5113 = vst [vmem:[#allocation55_spill] sm:$0xff] %v4587_v58  ;;  %5114 = vst [vmem:[#allocation56_spill] sm:$0xff] %v4589_v10  ;;  %v3196_v16 = vpop.f32.mrb[99].mxu0  ;;  %v3306_v3 = vpop.f32.mrb[99].mxu1 }
 0x1b0   :  { %v1364_v46 = vpop.f32.mrb[100].mxu0  ;;  %v1848_v39 = vpop.f32.mrb[100].mxu1 }
 0x1b1   :  { %v2047_v4 = vmax.f32 %v1364_v46, %v1848_v39  ;;  %v3319_v27 = vpop.f32.mrb[101].mxu0  ;;  %v3429_v24 = vpop.f32.mrb[101].mxu1 }
 0x1b2   :  { %v1367_v51 = vpop.f32.mrb[102].mxu0  ;;  %v1851_v22 = vpop.f32.mrb[102].mxu1  ;;  %v5116_v27 = vmax.f32 %v4033_v8, %v4035_v9  ;;  %v5117_v9 = vmax.f32 %v4045_v13, %v4047_v14 }
 0x1b3   :  { %v2097_v15 = vmax.f32 %v5115_v0, %v2047_v4  ;;  %v2048_v40 = vmax.f32 %v1367_v51, %v1851_v22  ;;  %v3320_v6 = vpop.f32.mrb[103].mxu0  ;;  %v3430_v16 = vpop.f32.mrb[103].mxu1 }
 0x1b5   :  { %v2154_v3 = vadd.f32 %v4596_v34, %v2097_v15  ;;  %v2098_v24 = vmax.f32 %v5116_v27, %v2048_v40 }
 0x1b7   :  { %v2204_v46 = vmax.f32 %v2154_v3, 0.0  ;;  %v2155_v39 = vadd.f32 %v4596_v34, %v2098_v24 }
 0x1b8   :  { %v1372_v10 = vpop.f32.mrb[104].mxu0  ;;  %v1856_v58 = vpop.f32.mrb[104].mxu1 }
 0x1b9   :  { %v2917_v63 = vpack.c.bf16 %v2204_v46, %v2204_v46  ;;  %v2205_v30 = vmax.f32 %v2155_v39, 0.0  ;;  %v2049_v18 = vmax.f32 %v1372_v10, %v1856_v58  ;;  %v3323_v1 = vpop.f32.mrb[105].mxu0  ;;  %v3433_v2 = vpop.f32.mrb[105].mxu1  ;;  %v5118_v10 = vmax.f32 %v4057_v20, %v4059_v21 }
 0x1ba   :  { %v1375_v4 = vpop.f32.mrb[106].mxu0  ;;  %v1859_v6 = vpop.f32.mrb[106].mxu1  ;;  %v5119_v20 = vmax.f32 %v4069_v25, %v4071_v26 }
 0x1bb   :  { %2457 = vst.msk [vmem:[%s5001_s3] sm:$0xf] %vm2456_vm4, %v2917_v63  ;;  %v2918_v8 = vpack.c.bf16 %v2205_v30, %v2205_v30  ;;  %v2099_v15 = vmax.f32 %v5117_v9, %v2049_v18  ;;  %v2050_v40 = vmax.f32 %v1375_v4, %v1859_v6  ;;  %v3324_v0 = vpop.f32.mrb[107].mxu0  ;;  %v3434_v51 = vpop.f32.mrb[107].mxu1  ;;  %v5120_v9 = vmax.f32 %v4081_v32, %v4083_v33 }
 0x1bc   :  { %v5121_v32 = vmax.f32 %v4093_v37, %v4095_v38 }
 0x1bd   :  { %2458 = vst.msk [vmem:[%s5001_s3 + $0x4] sm:$0xf] %vm2456_vm4, %v2918_v8  ;;  %v2156_v58 = vadd.f32 %v4596_v34, %v2099_v15  ;;  %v2100_v22 = vmax.f32 %v5118_v10, %v2050_v40 }
 0x1bf   :  { %v2206_v63 = vmax.f32 %v2156_v58, 0.0  ;;  %v2157_v30 = vadd.f32 %v4596_v34, %v2100_v22 }
 0x1c0   :  { %v1380_v16 = vpop.f32.mrb[108].mxu0  ;;  %v1864_v13 = vpop.f32.mrb[108].mxu1 }
 0x1c1   :  { %v2919_v14 = vpack.c.bf16 %v2206_v63, %v2206_v63  ;;  %v2207_v18 = vmax.f32 %v2157_v30, 0.0  ;;  %v2051_v3 = vmax.f32 %v1380_v16, %v1864_v13  ;;  %v3327_v27 = vpop.f32.mrb[109].mxu0  ;;  %v3437_v24 = vpop.f32.mrb[109].mxu1 }
 0x1c2   :  { %v1383_v46 = vpop.f32.mrb[110].mxu0  ;;  %v1867_v39 = vpop.f32.mrb[110].mxu1  ;;  %v5122_v24 = vmax.f32 %v4105_v44, %v4107_v45  ;;  %v5123_v44 = vmax.f32 %v4117_v49, %v4119_v50 }
 0x1c3   :  { %2459 = vst.msk [vmem:[%s5001_s3 + $0x8] sm:$0xf] %vm2456_vm4, %v2919_v14  ;;  %v2920_v1 = vpack.c.bf16 %v2207_v18, %v2207_v18  ;;  %v2101_v21 = vmax.f32 %v5119_v20, %v2051_v3  ;;  %v2052_v2 = vmax.f32 %v1383_v46, %v1867_v39  ;;  %v3328_v4 = vpop.f32.mrb[111].mxu0  ;;  %v3438_v6 = vpop.f32.mrb[111].mxu1 }
 0x1c5   :  { %2460 = vst.msk [vmem:[%s5001_s3 + $0xc] sm:$0xf] %vm2456_vm4, %v2920_v1  ;;  %v2158_v8 = vadd.f32 %v4596_v34, %v2101_v21  ;;  %v2102_v15 = vmax.f32 %v5120_v9, %v2052_v2 }
 0x1c7   :  { %v2208_v40 = vmax.f32 %v2158_v8, 0.0  ;;  %v2159_v0 = vadd.f32 %v4596_v34, %v2102_v15 }
 0x1c8   :  { %v1388_v51 = vpop.f32.mrb[112].mxu0  ;;  %v1872_v25 = vpop.f32.mrb[112].mxu1 }
 0x1c9   :  { %v2921_v26 = vpack.c.bf16 %v2208_v40, %v2208_v40  ;;  %v2209_v58 = vmax.f32 %v2159_v0, 0.0  ;;  %v2053_v10 = vmax.f32 %v1388_v51, %v1872_v25  ;;  %v3331_v22 = vpop.f32.mrb[113].mxu0  ;;  %v3441_v63 = vpop.f32.mrb[113].mxu1 }
 0x1ca   :  { %v1391_v30 = vpop.f32.mrb[114].mxu0  ;;  %v1875_v16 = vpop.f32.mrb[114].mxu1 }
 0x1cb   :  { %2461 = vst.msk [vmem:[%s5001_s3 + $0x10] sm:$0xf] %vm2456_vm4, %v2921_v26  ;;  %v2922_v13 = vpack.c.bf16 %v2209_v58, %v2209_v58  ;;  %v2103_v33 = vmax.f32 %v5121_v32, %v2053_v10  ;;  %v2054_v14 = vmax.f32 %v1391_v30, %v1875_v16  ;;  %v3332_v18 = vpop.f32.mrb[115].mxu0  ;;  %v3442_v3 = vpop.f32.mrb[115].mxu1  ;;  %v5124_v26 = vmax.f32 %v4129_v56, %v4131_v57 }
 0x1cc   :  { %v5125_v56 = vmax.f32 %v4141_v61, %v4143_v62 }
 0x1cd   :  { %2462 = vst.msk [vmem:[%s5001_s3 + $0x14] sm:$0xf] %vm2456_vm4, %v2922_v13  ;;  %v2160_v27 = vadd.f32 %v4596_v34, %v2103_v33  ;;  %v2104_v46 = vmax.f32 %v5122_v24, %v2054_v14 }
 0x1cf   :  { %v2210_v39 = vmax.f32 %v2160_v27, 0.0  ;;  %v2161_v1 = vadd.f32 %v4596_v34, %v2104_v46 }
 0x1d0   :  { %v1396_v20 = vpop.f32.mrb[116].mxu0  ;;  %v1880_v37 = vpop.f32.mrb[116].mxu1 }
 0x1d1   :  { %v2923_v38 = vpack.c.bf16 %v2210_v39, %v2210_v39  ;;  %v2211_v21 = vmax.f32 %v2161_v1, 0.0  ;;  %v2055_v2 = vmax.f32 %v1396_v20, %v1880_v37  ;;  %v3335_v4 = vpop.f32.mrb[117].mxu0  ;;  %v3445_v6 = vpop.f32.mrb[117].mxu1  ;;  %v5126_v39 = vmax.f32 %v4153_v11, %v4155_v12 }
 0x1d2   :  { %v1399_v8 = vpop.f32.mrb[118].mxu0  ;;  %v1883_v9 = vpop.f32.mrb[118].mxu1  ;;  %v5127_v11 = vmax.f32 %v4165_v19, %v4167_v23 }
 0x1d3   :  { %2463 = vst.msk [vmem:[%s5001_s3 + $0x18] sm:$0xf] %vm2456_vm4, %v2923_v38  ;;  %v2924_v15 = vpack.c.bf16 %v2211_v21, %v2211_v21  ;;  %v2105_v45 = vmax.f32 %v5123_v44, %v2055_v2  ;;  %v2056_v40 = vmax.f32 %v1399_v8, %v1883_v9  ;;  %v3336_v0 = vpop.f32.mrb[119].mxu0  ;;  %v3446_v51 = vpop.f32.mrb[119].mxu1 }
 0x1d4   :  { %v5128_v51 = vmax.f32 %v4177_v35, %v4179_v36  ;;  %v5129_v35 = vmax.f32 %v4189_v43, %v4191_v47 }
 0x1d5   :  { %2464 = vst.msk [vmem:[%s5001_s3 + $0x1c] sm:$0xf] %vm2456_vm4, %v2924_v15  ;;  %v2162_v25 = vadd.f32 %v4596_v34, %v2105_v45  ;;  %v2106_v58 = vmax.f32 %v5124_v26, %v2056_v40 }
 0x1d7   :  { %v2212_v10 = vmax.f32 %v2162_v25, 0.0  ;;  %v2163_v22 = vadd.f32 %v4596_v34, %v2106_v58 }
 0x1d8   :  { %v1404_v63 = vpop.f32.mrb[120].mxu0  ;;  %v1888_v49 = vpop.f32.mrb[120].mxu1 }
 0x1d9   :  { %v2925_v50 = vpack.c.bf16 %v2212_v10, %v2212_v10  ;;  %v2213_v30 = vmax.f32 %v2163_v22, 0.0  ;;  %v2057_v16 = vmax.f32 %v1404_v63, %v1888_v49  ;;  %v3339_v13 = vpop.f32.mrb[121].mxu0  ;;  %v3449_v32 = vpop.f32.mrb[121].mxu1 }
 0x1da   :  { %v1407_v33 = vpop.f32.mrb[122].mxu0  ;;  %v1891_v14 = vpop.f32.mrb[122].mxu1 }
 0x1db   :  { %2465 = vst.msk [vmem:[%s5001_s3 + $0x20] sm:$0xf] %vm2456_vm4, %v2925_v50  ;;  %v2926_v18 = vpack.c.bf16 %v2213_v30, %v2213_v30  ;;  %v2107_v57 = vmax.f32 %v5125_v56, %v2057_v16  ;;  %v2058_v3 = vmax.f32 %v1407_v33, %v1891_v14  ;;  %v3340_v27 = vpop.f32.mrb[123].mxu0  ;;  %v3450_v24 = vpop.f32.mrb[123].mxu1  ;;  %v5130_v56 = vmax.f32 %v4201_v59, %v4203_v60 }
 0x1dc   :  { %v5131_v59 = vmax.f32 %v4213_v7, %v4215_v17 }
 0x1dd   :  { %2466 = vst.msk [vmem:[%s5001_s3 + $0x24] sm:$0xf] %vm2456_vm4, %v2926_v18  ;;  %v2164_v46 = vadd.f32 %v4596_v34, %v2107_v57  ;;  %v2108_v1 = vmax.f32 %v5126_v39, %v2058_v3 }
 0x1df   :  { %v2214_v20 = vmax.f32 %v2164_v46, 0.0  ;;  %v2165_v37 = vadd.f32 %v4596_v34, %v2108_v1 }
 0x1e0   :  { %v1412_v38 = vpop.f32.mrb[124].mxu0  ;;  %v1896_v61 = vpop.f32.mrb[124].mxu1 }
 0x1e1   :  { %v2927_v62 = vpack.c.bf16 %v2214_v20, %v2214_v20  ;;  %v2215_v21 = vmax.f32 %v2165_v37, 0.0  ;;  %v2059_v2 = vmax.f32 %v1412_v38, %v1896_v61  ;;  %v3343_v4 = vpop.f32.mrb[125].mxu0  ;;  %v3453_v6 = vpop.f32.mrb[125].mxu1 }
 0x1e2   :  { %v1415_v8 = vpop.f32.mrb[126].mxu0  ;;  %v1899_v9 = vpop.f32.mrb[126].mxu1  ;;  %v5132_v6 = vmax.f32 %v4225_v41, %v4227_v42  ;;  %v5133_v41 = vmax.f32 %v4237_v55, %v4239_v5 }
 0x1e3   :  { %2467 = vst.msk [vmem:[%s5001_s3 + $0x28] sm:$0xf] %vm2456_vm4, %v2927_v62  ;;  %v2928_v15 = vpack.c.bf16 %v2215_v21, %v2215_v21  ;;  %v2109_v12 = vmax.f32 %v5127_v11, %v2059_v2  ;;  %v2060_v44 = vmax.f32 %v1415_v8, %v1899_v9  ;;  %v3344_v45 = vpop.f32.mrb[127].mxu0  ;;  %v3454_v40 = vpop.f32.mrb[127].mxu1 }
 0x1e5   :  { %2468 = vst.msk [vmem:[%s5001_s3 + $0x2c] sm:$0xf] %vm2456_vm4, %v2928_v15  ;;  %v2166_v0 = vadd.f32 %v4596_v34, %v2109_v12  ;;  %v2110_v25 = vmax.f32 %v5128_v51, %v2060_v44 }
 0x1e7   :  { %v2216_v26 = vmax.f32 %v2166_v0, 0.0  ;;  %v2167_v58 = vadd.f32 %v4596_v34, %v2110_v25 }
 0x1e8   :  { %v1420_v10 = vpop.f32.mrb[128].mxu0  ;;  %v1904_v19 = vpop.f32.mrb[128].mxu1 }
 0x1e9   :  { %v2929_v23 = vpack.c.bf16 %v2216_v26, %v2216_v26  ;;  %v2217_v22 = vmax.f32 %v2167_v58, 0.0  ;;  %v2061_v63 = vmax.f32 %v1420_v10, %v1904_v19  ;;  %v3347_v49 = vpop.f32.mrb[129].mxu0  ;;  %v3457_v50 = vpop.f32.mrb[129].mxu1 }
 0x1ea   :  { %v1423_v30 = vpop.f32.mrb[130].mxu0  ;;  %v1907_v16 = vpop.f32.mrb[130].mxu1 }
 0x1eb   :  { %2469 = vst.msk [vmem:[%s5001_s3 + $0x30] sm:$0xf] %vm2456_vm4, %v2929_v23  ;;  %v2930_v13 = vpack.c.bf16 %v2217_v22, %v2217_v22  ;;  %v2111_v36 = vmax.f32 %v5129_v35, %v2061_v63  ;;  %v2062_v32 = vmax.f32 %v1423_v30, %v1907_v16  ;;  %v3348_v33 = vpop.f32.mrb[131].mxu0  ;;  %v3458_v14 = vpop.f32.mrb[131].mxu1  ;;  %v5134_v23 = vmax.f32 %v4249_v53, %v4251_v54 }
 0x1ec   :  { %v5135_v53 = vmax.f32 %v4261_v28, %v4263_v29 }
 0x1ed   :  { %2470 = vst.msk [vmem:[%s5001_s3 + $0x34] sm:$0xf] %vm2456_vm4, %v2930_v13  ;;  %v2168_v18 = vadd.f32 %v4596_v34, %v2111_v36  ;;  %v2112_v57 = vmax.f32 %v5130_v56, %v2062_v32 }
 0x1ef   :  { %v2218_v3 = vmax.f32 %v2168_v18, 0.0  ;;  %v2169_v27 = vadd.f32 %v4596_v34, %v2112_v57 }
 0x1f0   :  { %v1428_v24 = vpop.f32.mrb[132].mxu0  ;;  %v1912_v43 = vpop.f32.mrb[132].mxu1 }
 0x1f1   :  { %v2931_v47 = vpack.c.bf16 %v2218_v3, %v2218_v3  ;;  %v2219_v46 = vmax.f32 %v2169_v27, 0.0  ;;  %v2063_v39 = vmax.f32 %v1428_v24, %v1912_v43  ;;  %v3351_v1 = vpop.f32.mrb[133].mxu0  ;;  %v3461_v20 = vpop.f32.mrb[133].mxu1  ;;  %v5136_v3 = vmax.f32 %v4273_v31, %v4275_v48  ;;  %v5137_v48 = vld [vmem:[#allocation2_spill] sm:$0xff] }
 0x1f2   :  { %v1431_v37 = vpop.f32.mrb[134].mxu0  ;;  %v1915_v38 = vpop.f32.mrb[134].mxu1  ;;  %v5138_v31 = vmax.f32 %v4285_v52, %v5137_v48 }
 0x1f3   :  { %2471 = vst.msk [vmem:[%s5001_s3 + $0x38] sm:$0xf] %vm2456_vm4, %v2931_v47  ;;  %v2932_v61 = vpack.c.bf16 %v2219_v46, %v2219_v46  ;;  %v2113_v60 = vmax.f32 %v5131_v59, %v2063_v39  ;;  %v2064_v62 = vmax.f32 %v1431_v37, %v1915_v38  ;;  %v3352_v21 = vpop.f32.mrb[135].mxu0  ;;  %v3462_v2 = vpop.f32.mrb[135].mxu1 }
 0x1f5   :  { %2472 = vst.msk [vmem:[%s5001_s3 + $0x3c] sm:$0xf] %vm2456_vm4, %v2932_v61  ;;  %v2170_v4 = vadd.f32 %v4596_v34, %v2113_v60  ;;  %v2114_v8 = vmax.f32 %v5132_v6, %v2064_v62  ;;  %v5140_v6 = vld [vmem:[#allocation4_spill] sm:$0xff] }
 0x1f7   :  { %v2220_v9 = vmax.f32 %v2170_v4, 0.0  ;;  %v2171_v15 = vadd.f32 %v4596_v34, %v2114_v8  ;;  %v5139_v4 = vld [vmem:[#allocation3_spill] sm:$0xff] }
 0x1f8   :  { %v1436_v11 = vpop.f32.mrb[136].mxu0  ;;  %v1920_v7 = vpop.f32.mrb[136].mxu1  ;;  %v5141_v8 = vmax.f32 %v5139_v4, %v5140_v6  ;;  %v5154_v6 = vld [vmem:[#allocation13_spill] sm:$0xff] }
 0x1f9   :  { %v2933_v17 = vpack.c.bf16 %v2220_v9, %v2220_v9  ;;  %v2221_v12 = vmax.f32 %v2171_v15, 0.0  ;;  %v2065_v44 = vmax.f32 %v1436_v11, %v1920_v7  ;;  %v3355_v45 = vpop.f32.mrb[137].mxu0  ;;  %v3465_v40 = vpop.f32.mrb[137].mxu1 }
 0x1fa   :  { %v1439_v0 = vpop.f32.mrb[138].mxu0  ;;  %v1923_v51 = vpop.f32.mrb[138].mxu1 }
 0x1fb   :  { %2473 = vst.msk [vmem:[%s5001_s3 + $0x40] sm:$0xf] %vm2456_vm4, %v2933_v17  ;;  %v2934_v25 = vpack.c.bf16 %v2221_v12, %v2221_v12  ;;  %v2115_v42 = vmax.f32 %v5133_v41, %v2065_v44  ;;  %v2066_v26 = vmax.f32 %v1439_v0, %v1923_v51  ;;  %v3356_v58 = vpop.f32.mrb[139].mxu0  ;;  %v3466_v10 = vpop.f32.mrb[139].mxu1  ;;  %v5142_v41 = vld [vmem:[#allocation5_spill] sm:$0xff] }
 0x1fd   :  { %2474 = vst.msk [vmem:[%s5001_s3 + $0x44] sm:$0xf] %vm2456_vm4, %v2934_v25  ;;  %v2172_v19 = vadd.f32 %v4596_v34, %v2115_v42  ;;  %v2116_v22 = vmax.f32 %v5134_v23, %v2066_v26  ;;  %v5143_v42 = vld [vmem:[#allocation6_spill] sm:$0xff] }
 0x1fe   :  { %v5144_v26 = vmax.f32 %v5142_v41, %v5143_v42 }
 0x1ff   :  { %v2222_v63 = vmax.f32 %v2172_v19, 0.0  ;;  %v2173_v49 = vadd.f32 %v4596_v34, %v2116_v22 }
 0x200   :  { %v1444_v50 = vpop.f32.mrb[140].mxu0  ;;  %v1928_v55 = vpop.f32.mrb[140].mxu1 }
 0x201   :  { %v2935_v5 = vpack.c.bf16 %v2222_v63, %v2222_v63  ;;  %v2223_v30 = vmax.f32 %v2173_v49, 0.0  ;;  %v2067_v16 = vmax.f32 %v1444_v50, %v1928_v55  ;;  %v3359_v13 = vpop.f32.mrb[141].mxu0  ;;  %v3469_v35 = vpop.f32.mrb[141].mxu1  ;;  %v5145_v63 = vld [vmem:[#allocation7_spill] sm:$0xff]  ;;  %v5146_v49 = vld [vmem:[#allocation8_spill] sm:$0xff] }
 0x202   :  { %v1447_v36 = vpop.f32.mrb[142].mxu0  ;;  %v1931_v32 = vpop.f32.mrb[142].mxu1  ;;  %v5147_v50 = vmax.f32 %v5145_v63, %v5146_v49  ;;  %v5160_v49 = vld [vmem:[#allocation17_spill] sm:$0xff] }
 0x203   :  { %2475 = vst.msk [vmem:[%s5001_s3 + $0x48] sm:$0xf] %vm2456_vm4, %v2935_v5  ;;  %v2936_v33 = vpack.c.bf16 %v2223_v30, %v2223_v30  ;;  %v2117_v54 = vmax.f32 %v5135_v53, %v2067_v16  ;;  %v2068_v14 = vmax.f32 %v1447_v36, %v1931_v32  ;;  %v3360_v18 = vpop.f32.mrb[143].mxu0  ;;  %v3470_v56 = vpop.f32.mrb[143].mxu1 }
 0x204   :  { %v5148_v56 = vld [vmem:[#allocation9_spill] sm:$0xff] }
 0x205   :  { %2476 = vst.msk [vmem:[%s5001_s3 + $0x4c] sm:$0xf] %vm2456_vm4, %v2936_v33  ;;  %v2174_v57 = vadd.f32 %v4596_v34, %v2117_v54  ;;  %v2118_v27 = vmax.f32 %v5136_v3, %v2068_v14 }
 0x207   :  { %v2224_v24 = vmax.f32 %v2174_v57, 0.0  ;;  %v2175_v43 = vadd.f32 %v4596_v34, %v2118_v27  ;;  %v5149_v57 = vld [vmem:[#allocation10_spill] sm:$0xff] }
 0x208   :  { %v1452_v47 = vpop.f32.mrb[144].mxu0  ;;  %v1936_v28 = vpop.f32.mrb[144].mxu1  ;;  %v5150_v3 = vmax.f32 %v5148_v56, %v5149_v57 }
 0x209   :  { %v2937_v29 = vpack.c.bf16 %v2224_v24, %v2224_v24  ;;  %v2225_v46 = vmax.f32 %v2175_v43, 0.0  ;;  %v2069_v39 = vmax.f32 %v1452_v47, %v1936_v28  ;;  %v3363_v1 = vpop.f32.mrb[145].mxu0  ;;  %v3473_v20 = vpop.f32.mrb[145].mxu1 }
 0x20a   :  { %v1455_v37 = vpop.f32.mrb[146].mxu0  ;;  %v1939_v38 = vpop.f32.mrb[146].mxu1 }
 0x20b   :  { %2477 = vst.msk [vmem:[%s5001_s3 + $0x50] sm:$0xf] %vm2456_vm4, %v2937_v29  ;;  %v2938_v61 = vpack.c.bf16 %v2225_v46, %v2225_v46  ;;  %v2119_v59 = vmax.f32 %v5138_v31, %v2069_v39  ;;  %v2070_v60 = vmax.f32 %v1455_v37, %v1939_v38  ;;  %v3364_v62 = vpop.f32.mrb[147].mxu0  ;;  %v3474_v21 = vpop.f32.mrb[147].mxu1  ;;  %v5151_v29 = vld [vmem:[#allocation11_spill] sm:$0xff]  ;;  %v5152_v46 = vld [vmem:[#allocation12_spill] sm:$0xff] }
 0x20c   :  { %v5153_v39 = vmax.f32 %v5151_v29, %v5152_v46  ;;  %v5166_v46 = vld [vmem:[#allocation21_spill] sm:$0xff] }
 0x20d   :  { %2478 = vst.msk [vmem:[%s5001_s3 + $0x54] sm:$0xf] %vm2456_vm4, %v2938_v61  ;;  %v2176_v2 = vadd.f32 %v4596_v34, %v2119_v59  ;;  %v2120_v9 = vmax.f32 %v5141_v8, %v2070_v60  ;;  %v5155_v8 = vld [vmem:[#allocation14_spill] sm:$0xff] }
 0x20f   :  { %v2226_v15 = vmax.f32 %v2176_v2, 0.0  ;;  %v2177_v11 = vadd.f32 %v4596_v34, %v2120_v9  ;;  %v5156_v9 = vmax.f32 %v5154_v6, %v5155_v8 }
 0x210   :  { %v1460_v7 = vpop.f32.mrb[148].mxu0  ;;  %v1944_v52 = vpop.f32.mrb[148].mxu1 }
 0x211   :  { %v2939_v17 = vpack.c.bf16 %v2226_v15, %v2226_v15  ;;  %v2227_v12 = vmax.f32 %v2177_v11, 0.0  ;;  %v2071_v44 = vmax.f32 %v1460_v7, %v1944_v52  ;;  %v3367_v45 = vpop.f32.mrb[149].mxu0  ;;  %v3477_v40 = vpop.f32.mrb[149].mxu1 }
 0x212   :  { %v1463_v0 = vpop.f32.mrb[150].mxu0  ;;  %v1947_v51 = vpop.f32.mrb[150].mxu1 }
 0x213   :  { %2479 = vst.msk [vmem:[%s5001_s3 + $0x58] sm:$0xf] %vm2456_vm4, %v2939_v17  ;;  %v2940_v25 = vpack.c.bf16 %v2227_v12, %v2227_v12  ;;  %v2121_v58 = vmax.f32 %v5144_v26, %v2071_v44  ;;  %v2072_v10 = vmax.f32 %v1463_v0, %v1947_v51  ;;  %v3368_v19 = vpop.f32.mrb[151].mxu0  ;;  %v3478_v23 = vpop.f32.mrb[151].mxu1  ;;  %v5157_v12 = vld [vmem:[#allocation15_spill] sm:$0xff]  ;;  %v5158_v44 = vld [vmem:[#allocation16_spill] sm:$0xff] }
 0x214   :  { %v5159_v45 = vmax.f32 %v5157_v12, %v5158_v44  ;;  %v5172_v44 = vld [vmem:[#allocation25_spill] sm:$0xff] }
 0x215   :  { %2480 = vst.msk [vmem:[%s5001_s3 + $0x5c] sm:$0xf] %vm2456_vm4, %v2940_v25  ;;  %v2178_v22 = vadd.f32 %v4596_v34, %v2121_v58  ;;  %v2122_v55 = vmax.f32 %v5147_v50, %v2072_v10  ;;  %v5161_v50 = vld [vmem:[#allocation18_spill] sm:$0xff] }
 0x217   :  { %v2228_v5 = vmax.f32 %v2178_v22, 0.0  ;;  %v2179_v30 = vadd.f32 %v4596_v34, %v2122_v55  ;;  %v5162_v55 = vmax.f32 %v5160_v49, %v5161_v50 }
 0x218   :  { %v1468_v16 = vpop.f32.mrb[152].mxu0  ;;  %v1952_v13 = vpop.f32.mrb[152].mxu1 }
 0x219   :  { %v2941_v35 = vpack.c.bf16 %v2228_v5, %v2228_v5  ;;  %v2229_v36 = vmax.f32 %v2179_v30, 0.0  ;;  %v2073_v32 = vmax.f32 %v1468_v16, %v1952_v13  ;;  %v3371_v33 = vpop.f32.mrb[153].mxu0  ;;  %v3481_v53 = vpop.f32.mrb[153].mxu1 }
 0x21a   :  { %v1471_v54 = vpop.f32.mrb[154].mxu0  ;;  %v1955_v14 = vpop.f32.mrb[154].mxu1 }
 0x21b   :  { %2481 = vst.msk [vmem:[%s5001_s3 + $0x60] sm:$0xf] %vm2456_vm4, %v2941_v35  ;;  %v2942_v18 = vpack.c.bf16 %v2229_v36, %v2229_v36  ;;  %v2123_v27 = vmax.f32 %v5150_v3, %v2073_v32  ;;  %v2074_v24 = vmax.f32 %v1471_v54, %v1955_v14  ;;  %v3372_v43 = vpop.f32.mrb[155].mxu0  ;;  %v3482_v47 = vpop.f32.mrb[155].mxu1  ;;  %v5163_v36 = vld [vmem:[#allocation19_spill] sm:$0xff]  ;;  %v5164_v32 = vld [vmem:[#allocation20_spill] sm:$0xff] }
 0x21c   :  { %v5165_v33 = vmax.f32 %v5163_v36, %v5164_v32  ;;  %v5178_v32 = vld [vmem:[#allocation29_spill] sm:$0xff] }
 0x21d   :  { %2482 = vst.msk [vmem:[%s5001_s3 + $0x64] sm:$0xf] %vm2456_vm4, %v2942_v18  ;;  %v2180_v28 = vadd.f32 %v4596_v34, %v2123_v27  ;;  %v2124_v1 = vmax.f32 %v5153_v39, %v2074_v24  ;;  %v5167_v39 = vld [vmem:[#allocation22_spill] sm:$0xff] }
 0x21f   :  { %v2230_v20 = vmax.f32 %v2180_v28, 0.0  ;;  %v2181_v37 = vadd.f32 %v4596_v34, %v2124_v1  ;;  %v5168_v1 = vmax.f32 %v5166_v46, %v5167_v39 }
 0x220   :  { %v1476_v38 = vpop.f32.mrb[156].mxu0  ;;  %v1960_v61 = vpop.f32.mrb[156].mxu1 }
 0x221   :  { %v2943_v48 = vpack.c.bf16 %v2230_v20, %v2230_v20  ;;  %v2231_v31 = vmax.f32 %v2181_v37, 0.0  ;;  %v2075_v59 = vmax.f32 %v1476_v38, %v1960_v61  ;;  %v3375_v60 = vpop.f32.mrb[157].mxu0  ;;  %v3485_v62 = vpop.f32.mrb[157].mxu1 }
 0x222   :  { %v1479_v21 = vpop.f32.mrb[158].mxu0  ;;  %v1963_v2 = vpop.f32.mrb[158].mxu1 }
 0x223   :  { %2483 = vst.msk [vmem:[%s5001_s3 + $0x68] sm:$0xf] %vm2456_vm4, %v2943_v48  ;;  %v2944_v4 = vpack.c.bf16 %v2231_v31, %v2231_v31  ;;  %v2125_v15 = vmax.f32 %v5156_v9, %v2075_v59  ;;  %v2076_v11 = vmax.f32 %v1479_v21, %v1963_v2  ;;  %v3376_v7 = vpop.f32.mrb[159].mxu0  ;;  %v3486_v52 = vpop.f32.mrb[159].mxu1  ;;  %v5169_v31 = vld [vmem:[#allocation23_spill] sm:$0xff]  ;;  %v5170_v59 = vld [vmem:[#allocation24_spill] sm:$0xff] }
 0x224   :  { %v5171_v60 = vmax.f32 %v5169_v31, %v5170_v59  ;;  %v5184_v59 = vld [vmem:[#allocation33_spill] sm:$0xff] }
 0x225   :  { %2484 = vst.msk [vmem:[%s5001_s3 + $0x6c] sm:$0xf] %vm2456_vm4, %v2944_v4  ;;  %v2182_v17 = vadd.f32 %v4596_v34, %v2125_v15  ;;  %v2126_v40 = vmax.f32 %v5159_v45, %v2076_v11  ;;  %v5173_v45 = vld [vmem:[#allocation26_spill] sm:$0xff] }
 0x227   :  { %v2232_v0 = vmax.f32 %v2182_v17, 0.0  ;;  %v2183_v51 = vadd.f32 %v4596_v34, %v2126_v40  ;;  %v5174_v40 = vmax.f32 %v5172_v44, %v5173_v45 }
 0x228   :  { %v1484_v25 = vpop.f32.mrb[160].mxu0  ;;  %v1968_v41 = vpop.f32.mrb[160].mxu1 }
 0x229   :  { %v2945_v42 = vpack.c.bf16 %v2232_v0, %v2232_v0  ;;  %v2233_v26 = vmax.f32 %v2183_v51, 0.0  ;;  %v2077_v58 = vmax.f32 %v1484_v25, %v1968_v41  ;;  %v3379_v10 = vpop.f32.mrb[161].mxu0  ;;  %v3489_v19 = vpop.f32.mrb[161].mxu1 }
 0x22a   :  { %v1487_v23 = vpop.f32.mrb[162].mxu0  ;;  %v1971_v22 = vpop.f32.mrb[162].mxu1 }
 0x22b   :  { %2485 = vst.msk [vmem:[%s5001_s3 + $0x70] sm:$0xf] %vm2456_vm4, %v2945_v42  ;;  %v2946_v63 = vpack.c.bf16 %v2233_v26, %v2233_v26  ;;  %v2127_v5 = vmax.f32 %v5162_v55, %v2077_v58  ;;  %v2078_v30 = vmax.f32 %v1487_v23, %v1971_v22  ;;  %v3380_v16 = vpop.f32.mrb[163].mxu0  ;;  %v3490_v13 = vpop.f32.mrb[163].mxu1  ;;  %v5175_v26 = vld [vmem:[#allocation27_spill] sm:$0xff]  ;;  %v5176_v58 = vld [vmem:[#allocation28_spill] sm:$0xff] }
 0x22c   :  { %v5177_v10 = vmax.f32 %v5175_v26, %v5176_v58  ;;  %v5190_v58 = vld [vmem:[#allocation37_spill] sm:$0xff] }
 0x22d   :  { %2486 = vst.msk [vmem:[%s5001_s3 + $0x74] sm:$0xf] %vm2456_vm4, %v2946_v63  ;;  %v2184_v35 = vadd.f32 %v4596_v34, %v2127_v5  ;;  %v2128_v53 = vmax.f32 %v5165_v33, %v2078_v30  ;;  %v5179_v33 = vld [vmem:[#allocation30_spill] sm:$0xff] }
 0x22f   :  { %v2234_v54 = vmax.f32 %v2184_v35, 0.0  ;;  %v2185_v14 = vadd.f32 %v4596_v34, %v2128_v53  ;;  %v5180_v53 = vmax.f32 %v5178_v32, %v5179_v33 }
 0x230   :  { %v1492_v18 = vpop.f32.mrb[164].mxu0  ;;  %v1976_v56 = vpop.f32.mrb[164].mxu1 }
 0x231   :  { %v2947_v57 = vpack.c.bf16 %v2234_v54, %v2234_v54  ;;  %v2235_v3 = vmax.f32 %v2185_v14, 0.0  ;;  %v2079_v27 = vmax.f32 %v1492_v18, %v1976_v56  ;;  %v3383_v24 = vpop.f32.mrb[165].mxu0  ;;  %v3493_v43 = vpop.f32.mrb[165].mxu1 }
 0x232   :  { %v1495_v47 = vpop.f32.mrb[166].mxu0  ;;  %v1979_v28 = vpop.f32.mrb[166].mxu1 }
 0x233   :  { %2487 = vst.msk [vmem:[%s5001_s3 + $0x78] sm:$0xf] %vm2456_vm4, %v2947_v57  ;;  %v2948_v29 = vpack.c.bf16 %v2235_v3, %v2235_v3  ;;  %v2129_v20 = vmax.f32 %v5168_v1, %v2079_v27  ;;  %v2080_v37 = vmax.f32 %v1495_v47, %v1979_v28  ;;  %v3384_v38 = vpop.f32.mrb[167].mxu0  ;;  %v3494_v61 = vpop.f32.mrb[167].mxu1  ;;  %v5181_v3 = vld [vmem:[#allocation31_spill] sm:$0xff]  ;;  %v5182_v27 = vld [vmem:[#allocation32_spill] sm:$0xff] }
 0x234   :  { %v5183_v24 = vmax.f32 %v5181_v3, %v5182_v27  ;;  %v5196_v27 = vld [vmem:[#allocation41_spill] sm:$0xff] }
 0x235   :  { %2488 = vst.msk [vmem:[%s5001_s3 + $0x7c] sm:$0xf] %vm2456_vm4, %v2948_v29  ;;  %v2186_v48 = vadd.f32 %v4596_v34, %v2129_v20  ;;  %v2130_v62 = vmax.f32 %v5171_v60, %v2080_v37  ;;  %v5185_v60 = vld [vmem:[#allocation34_spill] sm:$0xff] }
 0x237   :  { %v2236_v21 = vmax.f32 %v2186_v48, 0.0  ;;  %v2187_v2 = vadd.f32 %v4596_v34, %v2130_v62  ;;  %v5186_v62 = vmax.f32 %v5184_v59, %v5185_v60 }
 0x238   :  { %v1500_v4 = vpop.f32.mrb[168].mxu0  ;;  %v1984_v6 = vpop.f32.mrb[168].mxu1 }
 0x239   :  { %v2949_v8 = vpack.c.bf16 %v2236_v21, %v2236_v21  ;;  %v2237_v9 = vmax.f32 %v2187_v2, 0.0  ;;  %v2081_v15 = vmax.f32 %v1500_v4, %v1984_v6  ;;  %v3387_v11 = vpop.f32.mrb[169].mxu0  ;;  %v3497_v7 = vpop.f32.mrb[169].mxu1 }
 0x23a   :  { %v1503_v52 = vpop.f32.mrb[170].mxu0  ;;  %v1987_v17 = vpop.f32.mrb[170].mxu1 }
 0x23b   :  { %2489 = vst.msk [vmem:[%s5001_s3 + $0x80] sm:$0xf] %vm2456_vm4, %v2949_v8  ;;  %v2950_v12 = vpack.c.bf16 %v2237_v9, %v2237_v9  ;;  %v2131_v0 = vmax.f32 %v5174_v40, %v2081_v15  ;;  %v2082_v51 = vmax.f32 %v1503_v52, %v1987_v17  ;;  %v3388_v25 = vpop.f32.mrb[171].mxu0  ;;  %v3498_v41 = vpop.f32.mrb[171].mxu1  ;;  %v5187_v9 = vld [vmem:[#allocation35_spill] sm:$0xff]  ;;  %v5188_v15 = vld [vmem:[#allocation36_spill] sm:$0xff] }
 0x23c   :  { %v5189_v11 = vmax.f32 %v5187_v9, %v5188_v15  ;;  %v5202_v15 = vld [vmem:[#allocation45_spill] sm:$0xff] }
 0x23d   :  { %2490 = vst.msk [vmem:[%s5001_s3 + $0x84] sm:$0xf] %vm2456_vm4, %v2950_v12  ;;  %v2188_v42 = vadd.f32 %v4596_v34, %v2131_v0  ;;  %v2132_v19 = vmax.f32 %v5177_v10, %v2082_v51  ;;  %v5191_v10 = vld [vmem:[#allocation38_spill] sm:$0xff] }
 0x23f   :  { %v2238_v23 = vmax.f32 %v2188_v42, 0.0  ;;  %v2189_v22 = vadd.f32 %v4596_v34, %v2132_v19  ;;  %v5192_v19 = vmax.f32 %v5190_v58, %v5191_v10 }
 0x240   :  { %v1508_v63 = vpop.f32.mrb[172].mxu0  ;;  %v1992_v49 = vpop.f32.mrb[172].mxu1 }
 0x241   :  { %v2951_v50 = vpack.c.bf16 %v2238_v23, %v2238_v23  ;;  %v2239_v55 = vmax.f32 %v2189_v22, 0.0  ;;  %v2083_v5 = vmax.f32 %v1508_v63, %v1992_v49  ;;  %v3391_v30 = vpop.f32.mrb[173].mxu0  ;;  %v3501_v16 = vpop.f32.mrb[173].mxu1 }
 0x242   :  { %v1511_v13 = vpop.f32.mrb[174].mxu0  ;;  %v1995_v35 = vpop.f32.mrb[174].mxu1 }
 0x243   :  { %2491 = vst.msk [vmem:[%s5001_s3 + $0x88] sm:$0xf] %vm2456_vm4, %v2951_v50  ;;  %v2952_v36 = vpack.c.bf16 %v2239_v55, %v2239_v55  ;;  %v2133_v54 = vmax.f32 %v5180_v53, %v2083_v5  ;;  %v2084_v14 = vmax.f32 %v1511_v13, %v1995_v35  ;;  %v3392_v18 = vpop.f32.mrb[175].mxu0  ;;  %v3502_v56 = vpop.f32.mrb[175].mxu1  ;;  %v5193_v55 = vld [vmem:[#allocation39_spill] sm:$0xff]  ;;  %v5194_v5 = vld [vmem:[#allocation40_spill] sm:$0xff] }
 0x244   :  { %v5195_v30 = vmax.f32 %v5193_v55, %v5194_v5  ;;  %v5208_v5 = vld [vmem:[#allocation49_spill] sm:$0xff] }
 0x245   :  { %2492 = vst.msk [vmem:[%s5001_s3 + $0x8c] sm:$0xf] %vm2456_vm4, %v2952_v36  ;;  %v2190_v57 = vadd.f32 %v4596_v34, %v2133_v54  ;;  %v2134_v43 = vmax.f32 %v5183_v24, %v2084_v14  ;;  %v5197_v24 = vld [vmem:[#allocation42_spill] sm:$0xff] }
 0x247   :  { %v2240_v47 = vmax.f32 %v2190_v57, 0.0  ;;  %v2191_v28 = vadd.f32 %v4596_v34, %v2134_v43  ;;  %v5198_v43 = vmax.f32 %v5196_v27, %v5197_v24 }
 0x248   :  { %v1516_v29 = vpop.f32.mrb[176].mxu0  ;;  %v2000_v46 = vpop.f32.mrb[176].mxu1 }
 0x249   :  { %v2953_v39 = vpack.c.bf16 %v2240_v47, %v2240_v47  ;;  %v2241_v1 = vmax.f32 %v2191_v28, 0.0  ;;  %v2085_v20 = vmax.f32 %v1516_v29, %v2000_v46  ;;  %v3395_v37 = vpop.f32.mrb[177].mxu0  ;;  %v3505_v38 = vpop.f32.mrb[177].mxu1 }
 0x24a   :  { %v1519_v61 = vpop.f32.mrb[178].mxu0  ;;  %v2003_v48 = vpop.f32.mrb[178].mxu1 }
 0x24b   :  { %2493 = vst.msk [vmem:[%s5001_s3 + $0x90] sm:$0xf] %vm2456_vm4, %v2953_v39  ;;  %v2954_v31 = vpack.c.bf16 %v2241_v1, %v2241_v1  ;;  %v2135_v21 = vmax.f32 %v5186_v62, %v2085_v20  ;;  %v2086_v2 = vmax.f32 %v1519_v61, %v2003_v48  ;;  %v3396_v4 = vpop.f32.mrb[179].mxu0  ;;  %v3506_v6 = vpop.f32.mrb[179].mxu1  ;;  %v5199_v1 = vld [vmem:[#allocation43_spill] sm:$0xff]  ;;  %v5200_v20 = vld [vmem:[#allocation44_spill] sm:$0xff] }
 0x24c   :  { %v5201_v37 = vmax.f32 %v5199_v1, %v5200_v20  ;;  %v5214_v20 = vld [vmem:[#allocation53_spill] sm:$0xff] }
 0x24d   :  { %2494 = vst.msk [vmem:[%s5001_s3 + $0x94] sm:$0xf] %vm2456_vm4, %v2954_v31  ;;  %v2192_v8 = vadd.f32 %v4596_v34, %v2135_v21  ;;  %v2136_v7 = vmax.f32 %v5189_v11, %v2086_v2  ;;  %v5203_v11 = vld [vmem:[#allocation46_spill] sm:$0xff] }
 0x24f   :  { %v2242_v52 = vmax.f32 %v2192_v8, 0.0  ;;  %v2193_v17 = vadd.f32 %v4596_v34, %v2136_v7  ;;  %v5204_v7 = vmax.f32 %v5202_v15, %v5203_v11 }
 0x250   :  { %v1524_v12 = vpop.f32.mrb[180].mxu0  ;;  %v2008_v44 = vpop.f32.mrb[180].mxu1 }
 0x251   :  { %v2955_v45 = vpack.c.bf16 %v2242_v52, %v2242_v52  ;;  %v2243_v40 = vmax.f32 %v2193_v17, 0.0  ;;  %v2087_v0 = vmax.f32 %v1524_v12, %v2008_v44  ;;  %v3399_v51 = vpop.f32.mrb[181].mxu0  ;;  %v3509_v25 = vpop.f32.mrb[181].mxu1 }
 0x252   :  { %v1527_v41 = vpop.f32.mrb[182].mxu0  ;;  %v2011_v42 = vpop.f32.mrb[182].mxu1 }
 0x253   :  { %2495 = vst.msk [vmem:[%s5001_s3 + $0x98] sm:$0xf] %vm2456_vm4, %v2955_v45  ;;  %v2956_v26 = vpack.c.bf16 %v2243_v40, %v2243_v40  ;;  %v2137_v23 = vmax.f32 %v5192_v19, %v2087_v0  ;;  %v2088_v22 = vmax.f32 %v1527_v41, %v2011_v42  ;;  %v3400_v63 = vpop.f32.mrb[183].mxu0  ;;  %v3510_v49 = vpop.f32.mrb[183].mxu1  ;;  %v5205_v40 = vld [vmem:[#allocation47_spill] sm:$0xff]  ;;  %v5206_v0 = vld [vmem:[#allocation48_spill] sm:$0xff] }
 0x254   :  { %v5207_v51 = vmax.f32 %v5205_v40, %v5206_v0 }
 0x255   :  { %2496 = vst.msk [vmem:[%s5001_s3 + $0x9c] sm:$0xf] %vm2456_vm4, %v2956_v26  ;;  %v2194_v50 = vadd.f32 %v4596_v34, %v2137_v23  ;;  %v2138_v16 = vmax.f32 %v5195_v30, %v2088_v22  ;;  %v5209_v30 = vld [vmem:[#allocation50_spill] sm:$0xff] }
 0x257   :  { %v2244_v13 = vmax.f32 %v2194_v50, 0.0  ;;  %v2195_v35 = vadd.f32 %v4596_v34, %v2138_v16  ;;  %v5210_v16 = vmax.f32 %v5208_v5, %v5209_v30 }
 0x258   :  { %v1532_v36 = vpop.f32.mrb[184].mxu0  ;;  %v2016_v32 = vpop.f32.mrb[184].mxu1 }
 0x259   :  { %v2957_v33 = vpack.c.bf16 %v2244_v13, %v2244_v13  ;;  %v2245_v53 = vmax.f32 %v2195_v35, 0.0  ;;  %v2089_v54 = vmax.f32 %v1532_v36, %v2016_v32  ;;  %v3403_v14 = vpop.f32.mrb[185].mxu0  ;;  %v3513_v18 = vpop.f32.mrb[185].mxu1 }
 0x25a   :  { %v1535_v56 = vpop.f32.mrb[186].mxu0  ;;  %v2019_v57 = vpop.f32.mrb[186].mxu1 }
 0x25b   :  { %2497 = vst.msk [vmem:[%s5001_s3 + $0xa0] sm:$0xf] %vm2456_vm4, %v2957_v33  ;;  %v2958_v3 = vpack.c.bf16 %v2245_v53, %v2245_v53  ;;  %v2139_v47 = vmax.f32 %v5198_v43, %v2089_v54  ;;  %v2090_v28 = vmax.f32 %v1535_v56, %v2019_v57  ;;  %v3404_v29 = vpop.f32.mrb[187].mxu0  ;;  %v3514_v46 = vpop.f32.mrb[187].mxu1  ;;  %v5211_v53 = vld [vmem:[#allocation51_spill] sm:$0xff]  ;;  %v5212_v54 = vld [vmem:[#allocation52_spill] sm:$0xff] }
 0x25c   :  { %v5213_v14 = vmax.f32 %v5211_v53, %v5212_v54 }
 0x25d   :  { %2498 = vst.msk [vmem:[%s5001_s3 + $0xa4] sm:$0xf] %vm2456_vm4, %v2958_v3  ;;  %v2196_v39 = vadd.f32 %v4596_v34, %v2139_v47  ;;  %v2140_v38 = vmax.f32 %v5201_v37, %v2090_v28  ;;  %v5215_v37 = vld [vmem:[#allocation54_spill] sm:$0xff] }
 0x25f   :  { %v2246_v61 = vmax.f32 %v2196_v39, 0.0  ;;  %v2197_v48 = vadd.f32 %v4596_v34, %v2140_v38  ;;  %v5216_v38 = vmax.f32 %v5214_v20, %v5215_v37 }
 0x260   :  { %v1540_v31 = vpop.f32.mrb[188].mxu0  ;;  %v2024_v59 = vpop.f32.mrb[188].mxu1 }
 0x261   :  { %v2959_v60 = vpack.c.bf16 %v2246_v61, %v2246_v61  ;;  %v2247_v62 = vmax.f32 %v2197_v48, 0.0  ;;  %v2091_v21 = vmax.f32 %v1540_v31, %v2024_v59  ;;  %v3407_v2 = vpop.f32.mrb[189].mxu0  ;;  %v3517_v4 = vpop.f32.mrb[189].mxu1 }
 0x262   :  { %v1543_v6 = vpop.f32.mrb[190].mxu0  ;;  %v2027_v8 = vpop.f32.mrb[190].mxu1 }
 0x263   :  { %2499 = vst.msk [vmem:[%s5001_s3 + $0xa8] sm:$0xf] %vm2456_vm4, %v2959_v60  ;;  %v2960_v9 = vpack.c.bf16 %v2247_v62, %v2247_v62  ;;  %v2141_v52 = vmax.f32 %v5204_v7, %v2091_v21  ;;  %v2092_v17 = vmax.f32 %v1543_v6, %v2027_v8  ;;  %v3408_v12 = vpop.f32.mrb[191].mxu0  ;;  %v3518_v44 = vpop.f32.mrb[191].mxu1  ;;  %v5217_v62 = vld [vmem:[#allocation55_spill] sm:$0xff]  ;;  %v5218_v21 = vld [vmem:[#allocation56_spill] sm:$0xff] }
 0x264   :  { %v5219_v2 = vmax.f32 %v5217_v62, %v5218_v21 }
 0x265   :  { %2500 = vst.msk [vmem:[%s5001_s3 + $0xac] sm:$0xf] %vm2456_vm4, %v2960_v9  ;;  %v2198_v45 = vadd.f32 %v4596_v34, %v2141_v52  ;;  %v2142_v25 = vmax.f32 %v5207_v51, %v2092_v17 }
 0x267   :  { %v2248_v41 = vmax.f32 %v2198_v45, 0.0  ;;  %v2199_v42 = vadd.f32 %v4596_v34, %v2142_v25 }
 0x268   :  { %v1548_v26 = vpop.f32.mrb[192].mxu0  ;;  %v2032_v58 = vpop.f32.mrb[192].mxu1 }
 0x269   :  { %v2961_v10 = vpack.c.bf16 %v2248_v41, %v2248_v41  ;;  %v2249_v19 = vmax.f32 %v2199_v42, 0.0  ;;  %v2093_v23 = vmax.f32 %v1548_v26, %v2032_v58  ;;  %v3411_v22 = vpop.f32.mrb[193].mxu0  ;;  %v3521_v63 = vpop.f32.mrb[193].mxu1 }
 0x26a   :  { %v1551_v49 = vpop.f32.mrb[194].mxu0  ;;  %v2035_v50 = vpop.f32.mrb[194].mxu1 }
 0x26b   :  { %2501 = vst.msk [vmem:[%s5001_s3 + $0xb0] sm:$0xf] %vm2456_vm4, %v2961_v10  ;;  %v2962_v55 = vpack.c.bf16 %v2249_v19, %v2249_v19  ;;  %v2143_v13 = vmax.f32 %v5210_v16, %v2093_v23  ;;  %v2094_v35 = vmax.f32 %v1551_v49, %v2035_v50  ;;  %v3412_v36 = vpop.f32.mrb[195].mxu0  ;;  %v3522_v32 = vpop.f32.mrb[195].mxu1 }
 0x26d   :  { %2502 = vst.msk [vmem:[%s5001_s3 + $0xb4] sm:$0xf] %vm2456_vm4, %v2962_v55  ;;  %v2200_v33 = vadd.f32 %v4596_v34, %v2143_v13  ;;  %v2144_v18 = vmax.f32 %v5213_v14, %v2094_v35 }
 0x26f   :  { %v2250_v56 = vmax.f32 %v2200_v33, 0.0  ;;  %v2201_v57 = vadd.f32 %v4596_v34, %v2144_v18 }
 0x270   :  { %v1556_v3 = vpop.f32.mrb[196].mxu0  ;;  %v2040_v27 = vpop.f32.mrb[196].mxu1 }
 0x271   :  { %v2963_v24 = vpack.c.bf16 %v2250_v56, %v2250_v56  ;;  %v2251_v43 = vmax.f32 %v2201_v57, 0.0  ;;  %v2095_v47 = vmax.f32 %v1556_v3, %v2040_v27  ;;  %v3415_v28 = vpop.f32.mrb[197].mxu0  ;;  %v3525_v29 = vpop.f32.mrb[197].mxu1 }
 0x272   :  { %v1559_v46 = vpop.f32.mrb[198].mxu0  ;;  %v2043_v39 = vpop.f32.mrb[198].mxu1 }
 0x273   :  { %2503 = vst.msk [vmem:[%s5001_s3 + $0xb8] sm:$0xf] %vm2456_vm4, %v2963_v24  ;;  %v2964_v1 = vpack.c.bf16 %v2251_v43, %v2251_v43  ;;  %v2145_v61 = vmax.f32 %v5216_v38, %v2095_v47  ;;  %v2096_v48 = vmax.f32 %v1559_v46, %v2043_v39  ;;  %v3416_v31 = vpop.f32.mrb[199].mxu0  ;;  %v3526_v59 = vpop.f32.mrb[199].mxu1 }
 0x275   :  { %2504 = vst.msk [vmem:[%s5001_s3 + $0xbc] sm:$0xf] %vm2456_vm4, %v2964_v1  ;;  %v2202_v60 = vadd.f32 %v4596_v34, %v2145_v61  ;;  %v2146_v4 = vmax.f32 %v5219_v2, %v2096_v48 }
 0x277   :  { %v2252_v6 = vmax.f32 %v2202_v60, 0.0  ;;  %v2203_v8 = vadd.f32 %v4596_v34, %v2146_v4 }
 0x279   :  { %v2965_v9 = vpack.c.bf16 %v2252_v6, %v2252_v6  ;;  %v2253_v15 = vmax.f32 %v2203_v8, 0.0 }
 0x27b   :  { %2505 = vst.msk [vmem:[%s5001_s3 + $0xc0] sm:$0xf] %vm2456_vm4, %v2965_v9  ;;  %v2966_v11 = vpack.c.bf16 %v2253_v15, %v2253_v15 }
 0x27d   :  { %2506 = vst.msk [vmem:[%s5001_s3 + $0xc4] sm:$0xf] %vm2456_vm4, %v2966_v11 }

// kernel: convnet_forward.4
= control target key start
LH: loop header
LB: loop body
LE: loop exit
PB: predicated region body
PF: predicated region fallthrough
CT: control target
= control target key end

     0   :  { %v833_v0 = vmov 0   ;;  %vm135_vm0 = vcmask 179200   ;;  %vm148_vm1 = vcmask 1042432   ;;  %vm662_vm2 = vcmask 125952   ;;  %s1177_s1 = inlined_call_operand.vmem [shape: bf16[150,16], index: 1, kind: input, shape index: {}]   ;;  %s1178_s0 = inlined_call_operand.vmem [shape: bf16[4,2,32,150], index: 0, kind: input, shape index: {}]   ;;  %s1179_s2 = inlined_call_operand.vmem [shape: f32[1,16], index: 2, kind: input, shape index: {}]   ;;  %s1180_s3 = inlined_call_operand.vmem [shape: bf16[2,32,16], index: 3, kind: output, shape index: {}]  }
   0x1   :  { %152 = vmatprep.subr.bf16.mxu0 %v833_v0  ;;  %274 = vmatprep.subr.bf16.mxu1 %v833_v0  ;;  %v859_v1 = vld [vmem:[%s1177_s1] sm:$0xff]   ;;  %v866_v2 = vld [vmem:[%s1177_s1 + $0x8] sm:$0xff]   ;;  %v875_v3 = vld [vmem:[%s1177_s1 + $0x10] sm:$0xff]  }
   0x2   :  { %153 = vmatpush1.bf16.msra.mxu0 %v859_v1  ;;  %275 = vmatpush1.bf16.msra.mxu1 %v859_v1  ;;  %v884_v4 = vld [vmem:[%s1177_s1 + $0x18] sm:$0xff]   ;;  %v787_v5 = vld [vmem:[%s1178_s0 + $0x4] ss:$8 sps:$4 sm:$0xff]   ;;  %v919_v9 = vld [vmem:[%s1177_s1 + $0x30] sm:$0xff]  }
   0x3   :  { %154 = vmatprep.subr.bf16.mxu0 %v833_v0  ;;  %276 = vmatprep.subr.bf16.mxu1 %v833_v0  ;;  %v790_v6 = vld [vmem:[%s1178_s0 + $0x44] ss:$8 sps:$4 sm:$0xff]   ;;  %v928_v10 = vld [vmem:[%s1177_s1 + $0x38] sm:$0xff]   ;;  %v784_v12 = vld [vmem:[%s1177_s1 + $0x48] ss:$0 sps:$4 sm:$0x77]  }
   0x4   :  { %693 = vmatprep.mubr.msk.bf16.mxu0 %vm135_vm0, %v787_v5  ;;  %v900_v7 = vld [vmem:[%s1177_s1 + $0x20] sm:$0xff]   ;;  %713 = vmatprep.mubr.msk.bf16.mxu1 %vm135_vm0, %v790_v6  ;;  %v910_v8 = vld [vmem:[%s1177_s1 + $0x28] sm:$0xff]   ;;  %v948_v13 = vsel %vm148_vm1, %v784_v12, 0  ;;  %v791_v16 = vld [vmem:[%s1178_s0 + $0x14] ss:$8 sps:$4 sm:$0xff]  }
   0x5   :  { %v937_v11 = vld [vmem:[%s1177_s1 + $0x40] sm:$0xff]   ;;  %v793_v17 = vld [vmem:[%s1178_s0 + $0x54] ss:$8 sps:$4 sm:$0xff]   ;;  %v795_v18 = vld [vmem:[%s1178_s0 + $0x10] ss:$8 sps:$4 sm:$0xff]  }
   0x6   :  { %155 = vmatpush1.bf16.msra.mxu0 %v866_v2  ;;  %277 = vmatpush1.bf16.msra.mxu1 %v866_v2  ;;  %v785_v14 = vld [vmem:[%s1178_s0] ss:$8 sps:$4 sm:$0xff]   ;;  %v796_v19 = vld [vmem:[%s1178_s0 + $0x50] ss:$8 sps:$4 sm:$0xff]   ;;  %v797_v20 = vld [vmem:[%s1178_s0 + $0x24] ss:$8 sps:$4 sm:$0xff]  }
   0x7   :  { %156 = vmatprep.subr.bf16.mxu0 %v833_v0  ;;  %278 = vmatprep.subr.bf16.mxu1 %v833_v0  ;;  %v788_v15 = vld [vmem:[%s1178_s0 + $0x40] ss:$8 sps:$4 sm:$0xff]   ;;  %v799_v21 = vld [vmem:[%s1178_s0 + $0x64] ss:$8 sps:$4 sm:$0xff]   ;;  %v803_v24 = vld [vmem:[%s1178_s0 + $0x34] ss:$8 sps:$4 sm:$0xff]  }
   0x8   :  { %v801_v22 = vld [vmem:[%s1178_s0 + $0x20] ss:$8 sps:$4 sm:$0xff]   ;;  %v805_v25 = vld [vmem:[%s1178_s0 + $0x74] ss:$8 sps:$4 sm:$0xff]   ;;  %v807_v26 = vld [vmem:[%s1178_s0 + $0x30] ss:$8 sps:$4 sm:$0xff]  }
   0x9   :  { %v802_v23 = vld [vmem:[%s1178_s0 + $0x60] ss:$8 sps:$4 sm:$0xff]   ;;  %v808_v27 = vld [vmem:[%s1178_s0 + $0x70] ss:$8 sps:$4 sm:$0xff]   ;;  %v811_v28 = vld [vmem:[%s1178_s0 + $0x84] ss:$8 sps:$4 sm:$0xff]  }
   0xa   :  { %157 = vmatpush1.bf16.msra.mxu0 %v875_v3  ;;  %279 = vmatpush1.bf16.msra.mxu1 %v875_v3  ;;  %v814_v29 = vld [vmem:[%s1178_s0 + $0xc4] ss:$8 sps:$4 sm:$0xff]   ;;  %v809_v30 = vld [vmem:[%s1178_s0 + $0x80] ss:$8 sps:$4 sm:$0xff]   ;;  %v815_v32 = vld [vmem:[%s1178_s0 + $0x94] ss:$8 sps:$4 sm:$0xff]  }
   0xb   :  { %158 = vmatprep.subr.bf16.mxu0 %v833_v0  ;;  %280 = vmatprep.subr.bf16.mxu1 %v833_v0  ;;  %v812_v31 = vld [vmem:[%s1178_s0 + $0xc0] ss:$8 sps:$4 sm:$0xff]   ;;  %v817_v33 = vld [vmem:[%s1178_s0 + $0xd4] ss:$8 sps:$4 sm:$0xff]   ;;  %v819_v34 = vld [vmem:[%s1178_s0 + $0x90] ss:$8 sps:$4 sm:$0xff]  }
   0xc   :  { %v820_v35 = vld [vmem:[%s1178_s0 + $0xd0] ss:$8 sps:$4 sm:$0xff]   ;;  %v821_v36 = vld [vmem:[%s1178_s0 + $0xa4] ss:$8 sps:$4 sm:$0xff]   ;;  %v825_v38 = vld [vmem:[%s1178_s0 + $0xa0] ss:$8 sps:$4 sm:$0xff]  }
   0xd   :  { %v823_v37 = vld [vmem:[%s1178_s0 + $0xe4] ss:$8 sps:$4 sm:$0xff]   ;;  %v826_v39 = vld [vmem:[%s1178_s0 + $0xe0] ss:$8 sps:$4 sm:$0xff]   ;;  %v827_v40 = vld [vmem:[%s1178_s0 + $0xb4] ss:$8 sps:$4 sm:$0xff]  }
   0xe   :  { %159 = vmatpush1.bf16.msra.mxu0 %v884_v4  ;;  %281 = vmatpush1.bf16.msra.mxu1 %v884_v4  ;;  %v829_v41 = vld [vmem:[%s1178_s0 + $0xf4] ss:$8 sps:$4 sm:$0xff]   ;;  %v831_v42 = vld [vmem:[%s1178_s0 + $0xb0] ss:$8 sps:$4 sm:$0xff]  }
   0xf   :  { %160 = vmatprep.subr.bf16.mxu0 %v833_v0  ;;  %282 = vmatprep.subr.bf16.mxu1 %v833_v0  ;;  %v832_v43 = vld [vmem:[%s1178_s0 + $0xf0] ss:$8 sps:$4 sm:$0xff]  }
  0x12   :  { %161 = vmatpush1.bf16.msra.mxu0 %v900_v7  ;;  %283 = vmatpush1.bf16.msra.mxu1 %v900_v7 }
  0x13   :  { %162 = vmatprep.subr.bf16.mxu0 %v833_v0  ;;  %284 = vmatprep.subr.bf16.mxu1 %v833_v0 }
  0x16   :  { %163 = vmatpush1.bf16.msra.mxu0 %v910_v8  ;;  %285 = vmatpush1.bf16.msra.mxu1 %v910_v8 }
  0x17   :  { %164 = vmatprep.subr.bf16.mxu0 %v833_v0  ;;  %286 = vmatprep.subr.bf16.mxu1 %v833_v0 }
  0x1a   :  { %165 = vmatpush1.bf16.msra.mxu0 %v919_v9  ;;  %287 = vmatpush1.bf16.msra.mxu1 %v919_v9 }
  0x1b   :  { %166 = vmatprep.subr.bf16.mxu0 %v833_v0  ;;  %288 = vmatprep.subr.bf16.mxu1 %v833_v0 }
  0x1e   :  { %167 = vmatpush1.bf16.msra.mxu0 %v928_v10  ;;  %289 = vmatpush1.bf16.msra.mxu1 %v928_v10 }
  0x1f   :  { %168 = vmatprep.subr.bf16.mxu0 %v833_v0  ;;  %290 = vmatprep.subr.bf16.mxu1 %v833_v0 }
  0x22   :  { %169 = vmatpush1.bf16.msra.mxu0 %v937_v11  ;;  %291 = vmatpush1.bf16.msra.mxu1 %v937_v11 }
  0x23   :  { %170 = vmatprep.subr.bf16.mxu0 %v833_v0  ;;  %292 = vmatprep.subr.bf16.mxu1 %v833_v0 }
  0x26   :  { %171 = vmatpush1.bf16.msra.mxu0 %v948_v13  ;;  %293 = vmatpush1.bf16.msra.mxu1 %v948_v13 }
  0x27   :  { %404 = vmatprep.subr.bf16.mxu0 %v833_v0  ;;  %526 = vmatprep.subr.bf16.mxu1 %v833_v0 }
  0x29   :  { %185 = vmatmul.mubr.bf16.vlgmr.msra.gmra.mrb[0].mxu0 %v785_v14  ;;  %307 = vmatmul.mubr.bf16.vlgmr.msra.gmra.mrb[0].mxu1 %v788_v15 }
  0x2a   :  { %405 = vmatpush1.bf16.msra.mxu0 %v859_v1  ;;  %527 = vmatpush1.bf16.msra.mxu1 %v859_v1 }
  0x2b   :  { %406 = vmatprep.subr.bf16.mxu0 %v833_v0  ;;  %528 = vmatprep.subr.bf16.mxu1 %v833_v0 }
  0x2c   :  { %694 = vmatprep.mubr.msk.bf16.mxu0 %vm135_vm0, %v791_v16  ;;  %714 = vmatprep.mubr.msk.bf16.mxu1 %vm135_vm0, %v793_v17 }
  0x2e   :  { %407 = vmatpush1.bf16.msra.mxu0 %v866_v2  ;;  %529 = vmatpush1.bf16.msra.mxu1 %v866_v2 }
  0x2f   :  { %408 = vmatprep.subr.bf16.mxu0 %v833_v0  ;;  %530 = vmatprep.subr.bf16.mxu1 %v833_v0 }
  0x31   :  { %193 = vmatmul.mubr.bf16.gmra.mrb[4].mxu0 %v795_v18  ;;  %315 = vmatmul.mubr.bf16.gmra.mrb[4].mxu1 %v796_v19 }
  0x32   :  { %409 = vmatpush1.bf16.msra.mxu0 %v875_v3  ;;  %531 = vmatpush1.bf16.msra.mxu1 %v875_v3 }
  0x33   :  { %410 = vmatprep.subr.bf16.mxu0 %v833_v0  ;;  %532 = vmatprep.subr.bf16.mxu1 %v833_v0 }
  0x34   :  { %695 = vmatprep.mubr.msk.bf16.mxu0 %vm135_vm0, %v797_v20  ;;  %715 = vmatprep.mubr.msk.bf16.mxu1 %vm135_vm0, %v799_v21 }
  0x36   :  { %411 = vmatpush1.bf16.msra.mxu0 %v884_v4  ;;  %533 = vmatpush1.bf16.msra.mxu1 %v884_v4 }
  0x37   :  { %412 = vmatprep.subr.bf16.mxu0 %v833_v0  ;;  %534 = vmatprep.subr.bf16.mxu1 %v833_v0 }
  0x39   :  { %201 = vmatmul.mubr.bf16.gmra.mrb[8].mxu0 %v801_v22  ;;  %323 = vmatmul.mubr.bf16.gmra.mrb[8].mxu1 %v802_v23 }
  0x3a   :  { %413 = vmatpush1.bf16.msra.mxu0 %v900_v7  ;;  %535 = vmatpush1.bf16.msra.mxu1 %v900_v7 }
  0x3b   :  { %414 = vmatprep.subr.bf16.mxu0 %v833_v0  ;;  %536 = vmatprep.subr.bf16.mxu1 %v833_v0 }
  0x3c   :  { %696 = vmatprep.mubr.msk.bf16.mxu0 %vm135_vm0, %v803_v24  ;;  %716 = vmatprep.mubr.msk.bf16.mxu1 %vm135_vm0, %v805_v25  ;;  %v1123_v25 = vld [vmem:[%s1179_s2] ss:$0 sm:$0xff] }
  0x3e   :  { %415 = vmatpush1.bf16.msra.mxu0 %v910_v8  ;;  %537 = vmatpush1.bf16.msra.mxu1 %v910_v8 }
  0x3f   :  { %416 = vmatprep.subr.bf16.mxu0 %v833_v0  ;;  %538 = vmatprep.subr.bf16.mxu1 %v833_v0 }
  0x41   :  { %209 = vmatmul.mubr.bf16.gmra.mrb[12].mxu0 %v807_v26  ;;  %331 = vmatmul.mubr.bf16.gmra.mrb[12].mxu1 %v808_v27 }
  0x42   :  { %417 = vmatpush1.bf16.msra.mxu0 %v919_v9  ;;  %539 = vmatpush1.bf16.msra.mxu1 %v919_v9 }
  0x43   :  { %418 = vmatprep.subr.bf16.mxu0 %v833_v0  ;;  %540 = vmatprep.subr.bf16.mxu1 %v833_v0 }
  0x44   :  { %733 = vmatprep.mubr.msk.bf16.mxu0 %vm135_vm0, %v811_v28  ;;  %753 = vmatprep.mubr.msk.bf16.mxu1 %vm135_vm0, %v814_v29 }
  0x46   :  { %419 = vmatpush1.bf16.msra.mxu0 %v928_v10  ;;  %541 = vmatpush1.bf16.msra.mxu1 %v928_v10 }
  0x47   :  { %420 = vmatprep.subr.bf16.mxu0 %v833_v0  ;;  %542 = vmatprep.subr.bf16.mxu1 %v833_v0 }
  0x4a   :  { %421 = vmatpush1.bf16.msra.mxu0 %v937_v11  ;;  %543 = vmatpush1.bf16.msra.mxu1 %v937_v11 }
  0x4b   :  { %422 = vmatprep.subr.bf16.mxu0 %v833_v0  ;;  %544 = vmatprep.subr.bf16.mxu1 %v833_v0 }
  0x4e   :  { %423 = vmatpush1.bf16.msra.mxu0 %v948_v13  ;;  %545 = vmatpush1.bf16.msra.mxu1 %v948_v13 }
  0x51   :  { %437 = vmatmul.mubr.bf16.vlgmr.msra.gmra.mrb[16].mxu0 %v809_v30  ;;  %559 = vmatmul.mubr.bf16.vlgmr.msra.gmra.mrb[16].mxu1 %v812_v31 }
  0x52   :  { %734 = vmatprep.mubr.msk.bf16.mxu0 %vm135_vm0, %v815_v32  ;;  %754 = vmatprep.mubr.msk.bf16.mxu1 %vm135_vm0, %v817_v33 }
  0x59   :  { %445 = vmatmul.mubr.bf16.gmra.mrb[20].mxu0 %v819_v34  ;;  %567 = vmatmul.mubr.bf16.gmra.mrb[20].mxu1 %v820_v35 }
  0x5a   :  { %735 = vmatprep.mubr.msk.bf16.mxu0 %vm135_vm0, %v821_v36  ;;  %755 = vmatprep.mubr.msk.bf16.mxu1 %vm135_vm0, %v823_v37 }
  0x61   :  { %453 = vmatmul.mubr.bf16.gmra.mrb[24].mxu0 %v825_v38  ;;  %575 = vmatmul.mubr.bf16.gmra.mrb[24].mxu1 %v826_v39 }
  0x62   :  { %736 = vmatprep.mubr.msk.bf16.mxu0 %vm135_vm0, %v827_v40  ;;  %756 = vmatprep.mubr.msk.bf16.mxu1 %vm135_vm0, %v829_v41 }
  0x69   :  { %461 = vmatmul.mubr.bf16.gmra.mrb[28].mxu0 %v831_v42  ;;  %583 = vmatmul.mubr.bf16.gmra.mrb[28].mxu1 %v832_v43 }
  0xfc   :  { %v186_v44 = vpop.f32.mrb[0].mxu0  ;;  %v308_v45 = vpop.f32.mrb[0].mxu1 }
  0xfd   :  { %v339_v46 = vmax.f32 %v186_v44, %v308_v45  ;;  %v188_v47 = vpop.f32.mrb[1].mxu0  ;;  %v310_v48 = vpop.f32.mrb[1].mxu1 }
  0xfe   :  { %v189_v49 = vpop.f32.mrb[2].mxu0  ;;  %v311_v50 = vpop.f32.mrb[2].mxu1 }
  0xff   :  { %v340_v51 = vmax.f32 %v189_v49, %v311_v50  ;;  %v191_v52 = vpop.f32.mrb[3].mxu0  ;;  %v313_v53 = vpop.f32.mrb[3].mxu1 }
 0x104   :  { %v194_v54 = vpop.f32.mrb[4].mxu0  ;;  %v316_v55 = vpop.f32.mrb[4].mxu1 }
 0x105   :  { %v341_v56 = vmax.f32 %v194_v54, %v316_v55  ;;  %v196_v57 = vpop.f32.mrb[5].mxu0  ;;  %v318_v58 = vpop.f32.mrb[5].mxu1 }
 0x106   :  { %v197_v59 = vpop.f32.mrb[6].mxu0  ;;  %v319_v60 = vpop.f32.mrb[6].mxu1 }
 0x107   :  { %v342_v61 = vmax.f32 %v197_v59, %v319_v60  ;;  %v199_v62 = vpop.f32.mrb[7].mxu0  ;;  %v321_v63 = vpop.f32.mrb[7].mxu1 }
 0x10c   :  { %v1096_v0 = vpop.f32.mrb[8].mxu0  ;;  %v1098_v1 = vpop.f32.mrb[8].mxu1 }
 0x10d   :  { %v343_v2 = vmax.f32 %v1096_v0, %v1098_v1  ;;  %v204_v3 = vpop.f32.mrb[9].mxu0  ;;  %v326_v4 = vpop.f32.mrb[9].mxu1 }
 0x10e   :  { %v1102_v5 = vpop.f32.mrb[10].mxu0  ;;  %v1104_v6 = vpop.f32.mrb[10].mxu1 }
 0x10f   :  { %v344_v7 = vmax.f32 %v1102_v5, %v1104_v6  ;;  %v207_v8 = vpop.f32.mrb[11].mxu0  ;;  %v329_v9 = vpop.f32.mrb[11].mxu1 }
 0x114   :  { %v1108_v10 = vpop.f32.mrb[12].mxu0  ;;  %v1110_v11 = vpop.f32.mrb[12].mxu1 }
 0x115   :  { %v345_v12 = vmax.f32 %v1108_v10, %v1110_v11  ;;  %v212_v13 = vpop.f32.mrb[13].mxu0  ;;  %v334_v14 = vpop.f32.mrb[13].mxu1 }
 0x116   :  { %v1114_v15 = vpop.f32.mrb[14].mxu0  ;;  %v1116_v16 = vpop.f32.mrb[14].mxu1 }
 0x117   :  { %v346_v17 = vmax.f32 %v1114_v15, %v1116_v16  ;;  %v215_v18 = vpop.f32.mrb[15].mxu0  ;;  %v337_v19 = vpop.f32.mrb[15].mxu1 }
 0x124   :  { %v438_v20 = vpop.f32.mrb[16].mxu0  ;;  %v560_v21 = vpop.f32.mrb[16].mxu1 }
 0x125   :  { %v591_v22 = vmax.f32 %v438_v20, %v560_v21  ;;  %v440_v23 = vpop.f32.mrb[17].mxu0  ;;  %v562_v24 = vpop.f32.mrb[17].mxu1 }
 0x126   :  { %v441_v26 = vpop.f32.mrb[18].mxu0  ;;  %v563_v27 = vpop.f32.mrb[18].mxu1 }
 0x127   :  { %v599_v28 = vmax.f32 %v339_v46, %v591_v22  ;;  %v592_v29 = vmax.f32 %v441_v26, %v563_v27  ;;  %v443_v30 = vpop.f32.mrb[19].mxu0  ;;  %v565_v31 = vpop.f32.mrb[19].mxu1 }
 0x129   :  { %v614_v32 = vadd.f32 %v1123_v25, %v599_v28  ;;  %v600_v33 = vmax.f32 %v340_v51, %v592_v29 }
 0x12b   :  { %v622_v34 = vmax.f32 %v614_v32, 0.0  ;;  %v615_v35 = vadd.f32 %v1123_v25, %v600_v33 }
 0x12c   :  { %v446_v36 = vpop.f32.mrb[20].mxu0  ;;  %v568_v37 = vpop.f32.mrb[20].mxu1 }
 0x12d   :  { %v766_v38 = vpack.c.bf16 %v622_v34, %v622_v34  ;;  %v623_v39 = vmax.f32 %v615_v35, 0.0  ;;  %v593_v40 = vmax.f32 %v446_v36, %v568_v37  ;;  %v448_v41 = vpop.f32.mrb[21].mxu0  ;;  %v570_v42 = vpop.f32.mrb[21].mxu1 }
 0x12e   :  { %v449_v43 = vpop.f32.mrb[22].mxu0  ;;  %v571_v44 = vpop.f32.mrb[22].mxu1 }
 0x12f   :  { %663 = vst.msk [vmem:[%s1180_s3] sm:$0xf] %vm662_vm2, %v766_v38  ;;  %v767_v45 = vpack.c.bf16 %v623_v39, %v623_v39  ;;  %v601_v46 = vmax.f32 %v341_v56, %v593_v40  ;;  %v594_v47 = vmax.f32 %v449_v43, %v571_v44  ;;  %v451_v48 = vpop.f32.mrb[23].mxu0  ;;  %v573_v49 = vpop.f32.mrb[23].mxu1 }
 0x131   :  { %664 = vst.msk [vmem:[%s1180_s3 + $0x4] sm:$0xf] %vm662_vm2, %v767_v45  ;;  %v616_v50 = vadd.f32 %v1123_v25, %v601_v46  ;;  %v602_v51 = vmax.f32 %v342_v61, %v594_v47 }
 0x133   :  { %v624_v52 = vmax.f32 %v616_v50, 0.0  ;;  %v617_v53 = vadd.f32 %v1123_v25, %v602_v51 }
 0x134   :  { %v454_v54 = vpop.f32.mrb[24].mxu0  ;;  %v576_v55 = vpop.f32.mrb[24].mxu1 }
 0x135   :  { %v768_v57 = vpack.c.bf16 %v624_v52, %v624_v52  ;;  %v625_v58 = vmax.f32 %v617_v53, 0.0  ;;  %v595_v59 = vmax.f32 %v454_v54, %v576_v55  ;;  %v456_v56 = vpop.f32.mrb[25].mxu0  ;;  %v578_v60 = vpop.f32.mrb[25].mxu1 }
 0x136   :  { %v457_v62 = vpop.f32.mrb[26].mxu0  ;;  %v579_v63 = vpop.f32.mrb[26].mxu1 }
 0x137   :  { %665 = vst.msk [vmem:[%s1180_s3 + $0x8] sm:$0xf] %vm662_vm2, %v768_v57  ;;  %v769_v3 = vpack.c.bf16 %v625_v58, %v625_v58  ;;  %v603_v61 = vmax.f32 %v343_v2, %v595_v59  ;;  %v596_v4 = vmax.f32 %v457_v62, %v579_v63  ;;  %v459_v8 = vpop.f32.mrb[27].mxu0  ;;  %v581_v9 = vpop.f32.mrb[27].mxu1 }
 0x139   :  { %666 = vst.msk [vmem:[%s1180_s3 + $0xc] sm:$0xf] %vm662_vm2, %v769_v3  ;;  %v618_v13 = vadd.f32 %v1123_v25, %v603_v61  ;;  %v604_v14 = vmax.f32 %v344_v7, %v596_v4 }
 0x13b   :  { %v626_v18 = vmax.f32 %v618_v13, 0.0  ;;  %v619_v19 = vadd.f32 %v1123_v25, %v604_v14 }
 0x13c   :  { %v462_v20 = vpop.f32.mrb[28].mxu0  ;;  %v584_v0 = vpop.f32.mrb[28].mxu1 }
 0x13d   :  { %v770_v1 = vpack.c.bf16 %v626_v18, %v626_v18  ;;  %v627_v2 = vmax.f32 %v619_v19, 0.0  ;;  %v597_v21 = vmax.f32 %v462_v20, %v584_v0  ;;  %v464_v22 = vpop.f32.mrb[29].mxu0  ;;  %v586_v23 = vpop.f32.mrb[29].mxu1 }
 0x13e   :  { %v465_v24 = vpop.f32.mrb[30].mxu0  ;;  %v587_v26 = vpop.f32.mrb[30].mxu1 }
 0x13f   :  { %667 = vst.msk [vmem:[%s1180_s3 + $0x10] sm:$0xf] %vm662_vm2, %v770_v1  ;;  %v771_v27 = vpack.c.bf16 %v627_v2, %v627_v2  ;;  %v605_v5 = vmax.f32 %v345_v12, %v597_v21  ;;  %v598_v6 = vmax.f32 %v465_v24, %v587_v26  ;;  %v467_v7 = vpop.f32.mrb[31].mxu0  ;;  %v589_v28 = vpop.f32.mrb[31].mxu1 }
 0x141   :  { %668 = vst.msk [vmem:[%s1180_s3 + $0x14] sm:$0xf] %vm662_vm2, %v771_v27  ;;  %v620_v29 = vadd.f32 %v1123_v25, %v605_v5  ;;  %v606_v30 = vmax.f32 %v346_v17, %v598_v6 }
 0x143   :  { %v628_v31 = vmax.f32 %v620_v29, 0.0  ;;  %v621_v32 = vadd.f32 %v1123_v25, %v606_v30 }
 0x145   :  { %v772_v33 = vpack.c.bf16 %v628_v31, %v628_v31  ;;  %v629_v10 = vmax.f32 %v621_v32, 0.0 }
 0x147   :  { %669 = vst.msk [vmem:[%s1180_s3 + $0x18] sm:$0xf] %vm662_vm2, %v772_v33  ;;  %v773_v11 = vpack.c.bf16 %v629_v10, %v629_v10 }
 0x149   :  { %670 = vst.msk [vmem:[%s1180_s3 + $0x1c] sm:$0xf] %vm662_vm2, %v773_v11 }

// kernel: convnet_forward.5
= control target key start
LH: loop header
LB: loop body
LE: loop exit
PB: predicated region body
PF: predicated region fallthrough
CT: control target
= control target key end

     0   :  { %v770_v1 = vmov 0   ;;  %v98_v20 = vlaneseq  ;;  %v771_v25 = vmov 1966171168   ;;  %vm264_vm0 = vcmask 130048   ;;  %s981_s0 = inlined_call_operand.vmem [shape: bf16[2,400], index: 0, kind: input, shape index: {}]   ;;  %s982_s1 = inlined_call_operand.vmem [shape: bf16[400,120], index: 1, kind: input, shape index: {}]   ;;  %s983_s2 = inlined_call_operand.vmem [shape: f32[1,120], index: 2, kind: input, shape index: {}]   ;;  %s984_s3 = inlined_call_operand.vmem [shape: bf16[120,84], index: 3, kind: input, shape index: {}]   ;;  %s985_s4 = inlined_call_operand.vmem [shape: f32[1,84], index: 4, kind: input, shape index: {}]   ;;  %s986_s5 = inlined_call_operand.vmem [shape: bf16[84,10], index: 5, kind: input, shape index: {}]   ;;  %s987_s6 = inlined_call_operand.vmem [shape: f32[1,10], index: 6, kind: input, shape index: {}]   ;;  %s988_s7 = inlined_call_operand.hbm [shape: f32[2,10], index: 7, kind: output, shape index: {}]  }
   0x1   :  { %v707_v0 = vld [vmem:[%s982_s1 + $0x40] sm:$0xff]   ;;  %308 = vmatprep.subr.bf16.mxu1 %v770_v1  ;;  %v710_v4 = vld [vmem:[%s982_s1 + $0x48] sm:$0xff]   ;;  %v713_v7 = vld [vmem:[%s982_s1 + $0x50] sm:$0xff]   ;;  %v96_v26 = vunpack.c.l.s4 %v771_v25  ;;  %v772_v38 = vmov 0.0  }
   0x2   :  { %v708_v2 = vld [vmem:[%s982_s1 + $0x80] sm:$0xff]   ;;  %628 = vmatprep.subr.bf16.mxu0 %v707_v0  ;;  %v711_v5 = vld [vmem:[%s982_s1 + $0x88] sm:$0xff]   ;;  %v714_v8 = vld [vmem:[%s982_s1 + $0x90] sm:$0xff]   ;;  %v99_v27 = vshrl.u32 %v98_v20, 7 }
   0x3   :  { %v709_v3 = vld [vmem:[%s982_s1] sm:$0xff]   ;;  %309 = vmatpush1.bf16.msra.mxu1 %v708_v2  ;;  %v712_v6 = vld [vmem:[%s982_s1 + $0x8] sm:$0xff]   ;;  %v715_v9 = vld [vmem:[%s982_s1 + $0x10] sm:$0xff]   ;;  %v97_v30 = vunpack.c.0.s8 %v96_v26 }
   0x4   :  { %629 = vmatpush3.bf16.msra.mxu0 %v709_v3  ;;  %310 = vmatprep.subr.bf16.mxu1 %v770_v1  ;;  %v716_v10 = vld [vmem:[%s982_s1 + $0x58] sm:$0xff]   ;;  %v719_v13 = vld [vmem:[%s982_s1 + $0x60] sm:$0xff]   ;;  %v722_v16 = vld [vmem:[%s982_s1 + $0x68] sm:$0xff]  }
   0x5   :  { %630 = vmatprep.subr.bf16.mxu0 %v710_v4  ;;  %v717_v11 = vld [vmem:[%s982_s1 + $0x98] sm:$0xff]   ;;  %v720_v14 = vld [vmem:[%s982_s1 + $0xa0] sm:$0xff]   ;;  %v723_v17 = vld [vmem:[%s982_s1 + $0xa8] sm:$0xff]   ;;  %v100_v32 = vsub.s32 %v97_v30, %v99_v27 }
   0x6   :  { %v718_v12 = vld [vmem:[%s982_s1 + $0x18] sm:$0xff]   ;;  %v721_v15 = vld [vmem:[%s982_s1 + $0x20] sm:$0xff]   ;;  %v724_v18 = vld [vmem:[%s982_s1 + $0x28] sm:$0xff]  }
   0x7   :  { %311 = vmatpush1.bf16.msra.mxu1 %v711_v5  ;;  %v725_v19 = vld [vmem:[%s982_s1 + $0x70] sm:$0xff]   ;;  %v583_v23 = vld.sshfl [vmem:[%s981_s0] sm:$0x33 pattern:$0x75316420]  ;;  %v728_v24 = vld [vmem:[%s982_s1 + $0x78] sm:$0xff]  }
   0x8   :  { %631 = vmatpush3.bf16.msra.mxu0 %v712_v6  ;;  %312 = vmatprep.subr.bf16.mxu1 %v770_v1  ;;  %v726_v21 = vld [vmem:[%s982_s1 + $0xb0] sm:$0xff]   ;;  %v729_v28 = vld [vmem:[%s982_s1 + $0xb8] sm:$0xff]   ;;  %v94_v29 = vcombine.high %v583_v23, %v583_v23  ;;  %v731_v33 = vld [vmem:[%s982_s1 + $0xc0] sm:$0xff]   ;;  %v101_v36 = vrot.slane %v583_v23, %v100_v32 }
   0x9   :  { %632 = vmatprep.subr.bf16.mxu0 %v713_v7  ;;  %v727_v22 = vld [vmem:[%s982_s1 + $0x30] sm:$0xff]   ;;  %v730_v31 = vld [vmem:[%s982_s1 + $0x38] sm:$0xff]   ;;  %v732_v34 = vld [vmem:[%s984_s3] sm:$0xff]  }
   0xa   :  { %v108_v35 = vrot.slane %v94_v29, %v100_v32  ;;  %v109_v39 = vcombine.high %v101_v36, %v101_v36  ;;  %v733_v40 = vld [vmem:[%s984_s3 + $0x8] sm:$0xff]  }
   0xb   :  { %313 = vmatpush1.bf16.msra.mxu1 %v714_v8 }
   0xc   :  { %633 = vmatpush3.bf16.msra.mxu0 %v715_v9  ;;  %314 = vmatprep.subr.bf16.mxu1 %v770_v1  ;;  %v110_v37 = vcombine.high %v108_v35, %v108_v35 }
   0xd   :  { %634 = vmatprep.subr.bf16.mxu0 %v716_v10  ;;  %300 = vmatprep.mubr.bf16.mxu0 %v108_v35 }
   0xe   :  { %609 = vmatprep.mubr.msk.bf16.mxu1 %vm264_vm0, %v110_v37 }
   0xf   :  { %315 = vmatpush1.bf16.msra.mxu1 %v717_v11 }
  0x10   :  { %635 = vmatpush3.bf16.msra.mxu0 %v718_v12  ;;  %316 = vmatprep.subr.bf16.mxu1 %v770_v1 }
  0x11   :  { %636 = vmatprep.subr.bf16.mxu0 %v719_v13 }
  0x13   :  { %317 = vmatpush1.bf16.msra.mxu1 %v720_v14 }
  0x14   :  { %637 = vmatpush3.bf16.msra.mxu0 %v721_v15  ;;  %318 = vmatprep.subr.bf16.mxu1 %v770_v1 }
  0x15   :  { %638 = vmatprep.subr.bf16.mxu0 %v722_v16 }
  0x17   :  { %319 = vmatpush1.bf16.msra.mxu1 %v723_v17 }
  0x18   :  { %639 = vmatpush3.bf16.msra.mxu0 %v724_v18  ;;  %320 = vmatprep.subr.bf16.mxu1 %v770_v1 }
  0x19   :  { %640 = vmatprep.subr.bf16.mxu0 %v725_v19 }
  0x1b   :  { %321 = vmatpush1.bf16.msra.mxu1 %v726_v21 }
  0x1c   :  { %641 = vmatpush3.bf16.msra.mxu0 %v727_v22  ;;  %322 = vmatprep.subr.bf16.mxu1 %v770_v1 }
  0x1d   :  { %642 = vmatprep.subr.bf16.mxu0 %v728_v24 }
  0x1f   :  { %323 = vmatpush1.bf16.msra.mxu1 %v729_v28 }
  0x20   :  { %643 = vmatpush3.bf16.msra.mxu0 %v730_v31  ;;  %324 = vmatprep.subr.bf16.mxu1 %v770_v1 }
  0x21   :  { %666 = vmatprep.subr.bf16.mxu0 %v772_v38 }
  0x23   :  { %301 = vmatmul.mubr.bf16.vlgmr.msra.gmra.mrb[0].mxu0 %v101_v36  ;;  %325 = vmatpush1.bf16.msra.mxu1 %v731_v33 }
  0x24   :  { %667 = vmatpush3.bf16.msra.mxu0 %v732_v34 }
  0x25   :  { %12 = vsyncpa [#allocation3], 0  ;;  %668 = vmatprep.subr.bf16.mxu0 %v772_v38  ;;  %686 = vmatprep.subr.bf16.mxu1 %v772_v38  ;;  %v734_v41 = vld [vmem:[%s984_s3 + $0x10] sm:$0xff]   ;;  %v735_v42 = vld [vmem:[%s984_s3 + $0x18] sm:$0xff]   ;;  %vm421_vm1 = vcmask 1043456   ;;  %vm773_vm2 = vmmov 0  }
  0x26   :  { %341 = vmatmul.mubr.bf16.vlgmr.msra.gmra.mrb[0].mxu1 %v109_v39  ;;  %v736_v43 = vld [vmem:[%s984_s3 + $0x20] sm:$0xff]   ;;  %v737_v44 = vld [vmem:[%s984_s3 + $0x28] sm:$0xff]   ;;  %v738_v45 = vld [vmem:[%s984_s3 + $0x30] sm:$0xff]   ;;  %682 = vmatprep.mubr.msk.bf16.mxu0 %vm773_vm2, %v772_v38  ;;  %vm417_vm3 = vcmask 982016   ;;  %vm522_vm4 = vcmask 1041408   ;;  %vm518_vm5 = vcmask 687104  }
  0x27   :  { %v739_v46 = vld [vmem:[%s984_s3 + $0x38] ss:$0 sps:$4 sm:$0xff]   ;;  %698 = vmatprep.mubr.msk.bf16.mxu1 %vm773_vm2, %v772_v38  ;;  %v740_v48 = vld [vmem:[%s986_s5] sm:$0xff]   ;;  %v741_v49 = vld [vmem:[%s986_s5 + $0x8] sm:$0xff]   ;;  %vm566_vm6 = vcmask 74752  }
  0x28   :  { %669 = vmatpush3.bf16.msra.mxu0 %v733_v40  ;;  %v423_v47 = vsel %vm421_vm1, %v739_v46, 0  ;;  %687 = vmatpush3.bf16.msra.mxu1 %v740_v48  ;;  %v742_v50 = vld [vmem:[%s986_s5 + $0x10] sm:$0xff]   ;;  %v743_v51 = vld [vmem:[%s986_s5 + $0x18] sm:$0xff]   ;;  %v582_v54 = vld [vmem:[%s983_s2] ss:$0 sm:$0xff] }
  0x29   :  { %670 = vmatprep.subr.bf16.mxu0 %v772_v38  ;;  %688 = vmatprep.subr.bf16.mxu1 %v772_v38  ;;  %v744_v2 = vld [vmem:[%s986_s5 + $0x20] sm:$0xff]   ;;  %v745_v3 = vld [vmem:[%s986_s5 + $0x28] ss:$0 sps:$4 sm:$0x33]   ;;  %s774_s5 = smov [#allocation2]  }
  0x2a   :  { %v524_v4 = vsel %vm522_vm4, %v745_v3, 0  ;;  %v610_v5 = vld [vmem:[%s985_s4] ss:$0 sm:$0xff]  ;;  %s574_s12 = sshll.u32 %s774_s5, 4  ;;  %s575_s12 = int_to_ptr.vmem [resolvable:$true] %s574_s12 }
  0x2b   :  { %v620_v13 = vld [vmem:[%s987_s6] ss:$0 sm:$0xff]  ;;  %s746_s4 = scalar_lea.vmem %s575_s12, 32  ;;  %p751_p1 = scmp.lt.s32.totalorder %s575_s12, %s575_s12 }
  0x2c   :  { %671 = vmatpush3.bf16.msra.mxu0 %v734_v41  ;;  %689 = vmatpush3.bf16.msra.mxu1 %v741_v49  ;;  %p747_p0 = scmp.ne.s32.totalorder %s575_s12, %s746_s4  ;;  %p752_p2 = scmp.lt.s32.totalorder %s746_s4, %s746_s4 }
  0x2d   :  { %672 = vmatprep.subr.bf16.mxu0 %v772_v38  ;;  %690 = vmatprep.subr.bf16.mxu1 %v772_v38 }
  0x2e   :  { %p753_p3 = por %p752_p2, %p751_p1 }
  0x30   :  { %673 = vmatpush3.bf16.msra.mxu0 %v735_v42  ;;  %691 = vmatpush3.bf16.msra.mxu1 %v742_v50  ;;  %p754_p4 = pnand %p753_p3, %p747_p0 }
  0x31   :  { %674 = vmatprep.subr.bf16.mxu0 %v772_v38  ;;  %692 = vmatprep.subr.bf16.mxu1 %v772_v38 }
  0x34   :  { %675 = vmatpush3.bf16.msra.mxu0 %v736_v43  ;;  %693 = vmatpush3.bf16.msra.mxu1 %v743_v51 }
  0x35   :  { %676 = vmatprep.subr.bf16.mxu0 %v772_v38  ;;  %694 = vmatprep.subr.bf16.mxu1 %v772_v38 }
  0x38   :  { %677 = vmatpush3.bf16.msra.mxu0 %v737_v44  ;;  %695 = vmatpush3.bf16.msra.mxu1 %v744_v2 }
  0x39   :  { %678 = vmatprep.subr.bf16.mxu0 %v772_v38  ;;  %696 = vmatprep.subr.bf16.mxu1 %v772_v38 }
  0x3c   :  { %679 = vmatpush3.bf16.msra.mxu0 %v738_v45  ;;  %697 = vmatpush3.bf16.msra.mxu1 %v524_v4 }
  0x3d   :  { %680 = vmatprep.subr.bf16.mxu0 %v772_v38 }
  0x40   :  { %681 = vmatpush3.bf16.msra.mxu0 %v423_v47 }
  0xf6   :  { %v644_v52 = vpop.f32.mrb[0].mxu0 }
  0xf7   :  { %v645_v53 = vpop.f32.mrb[1].mxu0 }
  0xf8   :  { %v646_v55 = vadd.f32 %v645_v53, %v644_v52  ;;  %v647_v56 = vpop.f32.mrb[2].mxu0 }
  0xf9   :  { %v648_v57 = vpop.f32.mrb[3].mxu0  ;;  %v342_v58 = vpop.f32.mrb[0].mxu1 }
  0xfa   :  { %v303_v59 = vadd.f32 %v646_v55, %v582_v54  ;;  %v344_v60 = vpop.f32.mrb[1].mxu1 }
  0xfb   :  { %v345_v61 = vpop.f32.mrb[2].mxu1 }
  0xfc   :  { %v343_v62 = vadd.f32 %v342_v58, %v303_v59  ;;  %v346_v63 = vpop.f32.mrb[3].mxu1 }
  0xfe   :  { %v348_v0 = vmax.f32 %v343_v62, 0.0 }
 0x100   :  { %v349_v1 = vpack.c.bf16 %v348_v0, %v348_v0 }
 0x102   :  { %683 = vmatmul.mubr.msk.bf16.vlgmr.msra.gmra.mrb[4].mxu0 %vm417_vm3, %v349_v1 }
 0x1d5   :  { %v459_v6 = vpop.f32.mrb[4].mxu0 }
 0x1d6   :  { %v460_v7 = vadd.f32 %v610_v5, %v459_v6  ;;  %v684_v8 = vpop.f32.mrb[5].mxu0 }
 0x1d7   :  { %v462_v9 = vpop.f32.mrb[6].mxu0 }
 0x1d8   :  { %v465_v10 = vmax.f32 %v460_v7, 0.0  ;;  %v685_v11 = vpop.f32.mrb[7].mxu0 }
 0x1da   :  { %v466_v12 = vpack.c.bf16 %v465_v10, %v465_v10 }
 0x1dc   :  { %699 = vmatmul.mubr.msk.bf16.vlgmr.msra.gmra.mrb[4].mxu1 %vm518_vm5, %v466_v12 }
 0x2af   :  { %v560_v14 = vpop.f32.mrb[4].mxu1 }
 0x2b0   :  { %v561_v15 = vadd.f32 %v620_v13, %v560_v14  ;;  %v700_v16 = vpop.f32.mrb[5].mxu1 }
 0x2b1   :  { %v563_v17 = vpop.f32.mrb[6].mxu1 }
 0x2b2   :  { %v701_v18 = vpop.f32.mrb[7].mxu1  ;;  %567 = vst.msk [vmem:[#allocation2] sm:$0x3] %vm566_vm6, %v561_v15 }
 0x2b3   :  { %757 = shalt.err (!%p754_p4)
}
 0x2b4   :  { %s758_s6 = scalar_lea.hbm %s988_s7, 32 }
 0x2b5   :  { %p759_p5 = scmp.ne.s32.totalorder %s988_s7, %s758_s6  ;;  %p762_p6 = scmp.lt.u32.totalorder %s758_s6, %s988_s7 }
 0x2b7   :  { %p764_p7 = pnand %p762_p6, %p759_p5 }
 0x2b9   :  { %767 = shalt.err (!%p764_p7)
}
 0x2ba   :  { %577 = dma.vmem_to_hbm [thread:$0]  %s575_s12, 32, %s988_s7, [#allocation3]  }
 0x2bb   :  { %768 = dma.done.wait [#allocation3], 32  }
 0x2bc   :  { %769 = vsyncadd [#allocation3], 4294967264 }
 0x2bd   :  { %581 = vsyncpa [#allocation3], 1 }

</bundles_post_ra>
